<compile_context>
chip_gen: v7x
topology: tpu7x:2x2x1
jax: 0.10.0
libtpu: 0.0.40
codegen_flags: <defaults>
</compile_context>

<pallas_src>
import jax
import jax.numpy as jnp
from jax.experimental import pallas as pl
from jax.experimental.pallas import tpu as pltpu

# ---- hyperparameters implied by ModelEmbeddings.__init__ (small synthetic sizes) ----
EMBED_SIZE   = 32     # embed_size
CHAR_SIZE    = 50     # self.char_size
KERNEL_SIZE  = 5      # standard a5 CNN kernel width
MAX_WORD_LEN = 21     # max_word_length
N_CHARS      = 96     # len(vocab.char2id)
PAD_IDX      = 0      # vocab.char2id['<pad>']


def _maxpool_positions(conv, P, E):
    """Max over the P window positions of conv (TN, P*E) -> (TN, E).

    Lane-aligned tree: full-128-lane VPU maxes + XLU rolls (otherwise-idle slot),
    with a safe fallback to the simple slice loop if the layout doesn't allow it."""
    if (128 % E != 0) or (P * E < 128):
        pooled = conv[:, 0:E]
        for t in range(1, P):
            pooled = jnp.maximum(pooled, conv[:, t * E:(t + 1) * E])
        return pooled
    G = 128 // E                      # window positions per 128-lane vreg
    nfull = (P * E) // 128            # number of full, lane-aligned 128-wide blocks
    m = conv[:, 0:128]
    for b in range(1, nfull):
        m = jnp.maximum(m, conv[:, b * 128:(b + 1) * 128])       # full-width VPU maxes
    s = 64
    while s >= E:
        m = jnp.maximum(m, pltpu.roll(m, shift=s, axis=1))       # XLU rolls collapse groups
        s //= 2
    pooled = m[:, 0:E]
    for t in range(nfull * G, P):                                # residual tail positions
        pooled = jnp.maximum(pooled, conv[:, t * E:(t + 1) * E])
    return pooled


def _make_kernel(P, K, E):
    def kernel(ids_ref, r_ref, cpat_ref, bigw_ref, whw_ref, b_ref, out_ref):
        # ids_ref : (TN, L)      int32  char ids for TN words
        # r_ref   : (L, L*NC)    bf16   lane-replication matrix (repeat each id NC times)
        # cpat_ref: (1, L*NC)    f32    char-id pattern [0..NC-1] tiled L times
        # bigw_ref: (L*NC, P*E)  bf16   fused (embedding @ conv) weight, window-banded
        # whw_ref : (E, 2*E)     f32    packed highway weights [Wproj | Wgate]
        # b_ref   : (1, 3*E)     f32    packed biases [bconv | bproj | bgate]
        # out_ref : (TN, E)      f32
        ids = ids_ref[...].astype(jnp.bfloat16)                   # ids <= 95 -> exact in bf16

        # ids_rep[n, l*NC + c] = ids[n, l]  (exact-integer bf16 matmul, f32 accumulate)
        ids_rep = jnp.dot(ids, r_ref[...], preferred_element_type=jnp.float32)    # (TN, L*NC)
        onehot = (ids_rep == cpat_ref[...]).astype(jnp.bfloat16)                  # exact 0/1

        # fused embedding-gather + Conv1d for ALL P window positions in ONE bf16 MXU matmul:
        #   conv[n, t*E + e] = sum_k (emb[ids[n, t+k]] @ Wconv[k])[e]
        conv = jnp.dot(onehot, bigw_ref[...], preferred_element_type=jnp.float32)  # (TN, P*E)

        # max-over-time; bias-add and ReLU commute with the max (ReLU is monotone)
        pooled = _maxpool_positions(conv, P, E)
        pooled = jnp.maximum(pooled + b_ref[:, 0:E], 0.0)          # == maxpool(relu(conv + b))

        # Highway, both matmuls fused: [proj_pre | gate_pre] = pooled @ [Wproj|Wgate] + [bp|bg]
        hw = jnp.dot(pooled, whw_ref[...], preferred_element_type=jnp.float32) + b_ref[:, E:3 * E]
        proj = jnp.maximum(hw[:, 0:E], 0.0)
        gate = jax.nn.sigmoid(hw[:, E:2 * E])
        out_ref[...] = gate * proj + (1.0 - gate) * pooled
        # TODO(synk): nn.Dropout(0.3) is identity at inference; training-time RNG mask not reproduced.
    return kernel


def init_params(key):
    """Deterministic synthetic parameters matching the module's shapes."""
    ks = jax.random.split(key, 7)
    emb = 0.1 * jax.random.normal(ks[0], (N_CHARS, CHAR_SIZE), jnp.float32)
    emb = emb.at[PAD_IDX].set(0.0)               # padding_idx row is zero
    wconv = 0.1 * jax.random.normal(ks[1], (KERNEL_SIZE, CHAR_SIZE, EMBED_SIZE), jnp.float32)
    bconv = 0.1 * jax.random.normal(ks[2], (1, EMBED_SIZE), jnp.float32)
    wproj = 0.1 * jax.random.normal(ks[3], (EMBED_SIZE, EMBED_SIZE), jnp.float32)
    bproj = 0.1 * jax.random.normal(ks[4], (1, EMBED_SIZE), jnp.float32)
    wgate = 0.1 * jax.random.normal(ks[5], (EMBED_SIZE, EMBED_SIZE), jnp.float32)
    bgate = 0.1 * jax.random.normal(ks[6], (1, EMBED_SIZE), jnp.float32)
    return dict(emb=emb, wconv=wconv, bconv=bconv,
                wproj=wproj, bproj=bproj, wgate=wgate, bgate=bgate)


def _build_tables(params, L):
    """Host-side constant folding (done once per parameter set)."""
    K, E, NC = KERNEL_SIZE, EMBED_SIZE, N_CHARS
    P = L - K + 1
    # M[k, v, e] = sum_c emb[v, c] * Wconv[k, c, e]   (embedding folded into conv weight)
    m = jnp.einsum('vc,kce->kve', params['emb'], params['wconv'])            # (K, NC, E) f32
    bigw = jnp.zeros((L, NC, P, E), jnp.float32)
    for t in range(P):                                # BigW[(l, c), (t, e)] = M[l - t, c, e]
        bigw = bigw.at[t:t + K, :, t, :].set(m)
    bigw = bigw.reshape(L * NC, P * E).astype(jnp.bfloat16)                  # ship bf16
    r = jnp.repeat(jnp.eye(L, dtype=jnp.float32), NC, axis=1).astype(jnp.bfloat16)   # (L, L*NC)
    cpat = jnp.tile(jnp.arange(NC, dtype=jnp.float32), L)[None, :]           # (1, L*NC) f32
    whw = jnp.concatenate([params['wproj'], params['wgate']], axis=1)        # (E, 2E) f32
    bias = jnp.concatenate([params['bconv'], params['bproj'], params['bgate']], axis=1)  # (1, 3E)
    return r, cpat, bigw, whw, bias


def model_embeddings_forward(input_ids, params, *, tile_n=512):
    """input_ids: (sentence_length, batch_size, max_word_length) int32
       returns:   (sentence_length, batch_size, embed_size) float32"""
    S, B, L = input_ids.shape
    K, E, NC = KERNEL_SIZE, EMBED_SIZE, N_CHARS
    P = L - K + 1
    N = S * B

    r, cpat, bigw, whw, bias = _build_tables(params, L)

    ids = input_ids.reshape(N, L).astype(jnp.int32)
    n8 = ((N + 7) // 8) * 8
    tile_n = max(8, (min(tile_n, n8) // 8) * 8)          # multiple of 8, clamped for tiny inputs
    n_pad = ((N + tile_n - 1) // tile_n) * tile_n
    if n_pad != N:                                       # padded words produce garbage rows,
        ids = jnp.pad(ids, ((0, n_pad - N), (0, 0)),     # sliced off after the call
                      constant_values=PAD_IDX)

    out = pl.pallas_call(
        _make_kernel(P, K, E),
        out_shape=jax.ShapeDtypeStruct((n_pad, E), jnp.float32),
        grid_spec=pltpu.PrefetchScalarGridSpec(
            num_scalar_prefetch=0,
            grid=(n_pad // tile_n,),
            in_specs=[
                pl.BlockSpec((tile_n, L), lambda i: (i, 0)),        # ids: tiled over words
                pl.BlockSpec((L, L * NC), lambda i: (0, 0)),        # replication matrix (resident)
                pl.BlockSpec((1, L * NC), lambda i: (0, 0)),        # char-id pattern   (resident)
                pl.BlockSpec((L * NC, P * E), lambda i: (0, 0)),    # fused conv weight (resident)
                pl.BlockSpec((E, 2 * E), lambda i: (0, 0)),         # highway weights   (resident)
                pl.BlockSpec((1, 3 * E), lambda i: (0, 0)),         # packed biases     (resident)
            ],
            out_specs=pl.BlockSpec((tile_n, E), lambda i: (i, 0)),
        ),
        compiler_params=pltpu.CompilerParams(
            dimension_semantics=("parallel",),
            vmem_limit_bytes=48 * 1024 * 1024),
    )(ids, r, cpat, bigw, whw, bias)

    return out[:N].reshape(S, B, E)


def _reference_forward(input_ids, params):
    """Pure-JAX f32 reference mirroring the PyTorch module (eval mode)."""
    S, B, L = input_ids.shape
    K, E = KERNEL_SIZE, EMBED_SIZE
    P = L - K + 1
    N = S * B
    x = jnp.take(params['emb'], input_ids.reshape(N, L), axis=0)             # (N, L, C)
    conv = jnp.stack(
        [jnp.einsum('nkc,kce->ne', x[:, t:t + K, :], params['wconv']) for t in range(P)],
        axis=1) + params['bconv'][:, None, :]                                # (N, P, E)
    pooled = jnp.max(jax.nn.relu(conv), axis=1)                              # (N, E)
    proj = jax.nn.relu(pooled @ params['wproj'] + params['bproj'])
    gate = jax.nn.sigmoid(pooled @ params['wgate'] + params['bgate'])
    out = gate * proj + (1.0 - gate) * pooled
    return out.reshape(S, B, E)


if __name__ == "__main__":
    key = jax.random.PRNGKey(0)
    k_param, k_in = jax.random.split(key)
    params = init_params(k_param)

    S, B, L = 8, 2, MAX_WORD_LEN
    input_ids = jax.random.randint(k_in, (S, B, L), 0, N_CHARS, dtype=jnp.int32)

    out = model_embeddings_forward(input_ids, params)
    out = jax.block_until_ready(out)
    assert out.shape == (S, B, EMBED_SIZE)
    assert bool(jnp.all(jnp.isfinite(out)))

    ref = _reference_forward(input_ids, params)
    # Tolerance deliberately relaxed vs the f32 reference: the fused conv table is shipped in
    # bf16 (perf review item 1); everything else in the kernel is exact / f32-accumulated.
    assert jnp.allclose(out, ref, rtol=1e-2, atol=1e-2), float(jnp.max(jnp.abs(out - ref)))
    print("KERNEL_OK")
</pallas_src>

<mosaic_0001>
module attributes {stable_mosaic.version = 11 : i64} {
  func.func @kernel(%arg0: i32, %arg1: memref<16x21xi32, #tpu.memory_space<vmem>>, %arg2: memref<21x2016xbf16, #tpu.memory_space<vmem>>, %arg3: memref<1x2016xf32, #tpu.memory_space<vmem>>, %arg4: memref<2016x544xbf16, #tpu.memory_space<vmem>>, %arg5: memref<32x64xf32, #tpu.memory_space<vmem>>, %arg6: memref<1x96xf32, #tpu.memory_space<vmem>>, %arg7: memref<16x32xf32, #tpu.memory_space<vmem>>) attributes {dimension_semantics = [#tpu.dimension_semantics<parallel>], iteration_bounds = array<i64: 1>, scalar_prefetch = 0 : i64, scratch_operands = 0 : i64, tpu.core_type = #tpu.core_type<tc>, window_params = [{transform_indices = @transform_0, window_bounds = array<i64: 16, 21>}, {pipeline_mode = #tpu.pipeline_mode<synchronous>, transform_indices = @transform_1, window_bounds = array<i64: 21, 2016>}, {pipeline_mode = #tpu.pipeline_mode<synchronous>, transform_indices = @transform_2, window_bounds = array<i64: 1, 2016>}, {pipeline_mode = #tpu.pipeline_mode<synchronous>, transform_indices = @transform_3, window_bounds = array<i64: 2016, 544>}, {pipeline_mode = #tpu.pipeline_mode<synchronous>, transform_indices = @transform_4, window_bounds = array<i64: 32, 64>}, {pipeline_mode = #tpu.pipeline_mode<synchronous>, transform_indices = @transform_5, window_bounds = array<i64: 1, 96>}, {transform_indices = @transform_6, window_bounds = array<i64: 16, 32>}]} {
    %c0 = arith.constant 0 : index
    %c0_0 = arith.constant 0 : index
    %0 = vector.load %arg1[%c0, %c0_0] : memref<16x21xi32, #tpu.memory_space<vmem>>, vector<16x21xi32>
    %1 = arith.sitofp %0 : vector<16x21xi32> to vector<16x21xbf16>
    %c0_1 = arith.constant 0 : index
    %c0_2 = arith.constant 0 : index
    %2 = vector.load %arg2[%c0_1, %c0_2] : memref<21x2016xbf16, #tpu.memory_space<vmem>>, vector<21x2016xbf16>
    %cst = arith.constant dense<0.000000e+00> : vector<16x2016xf32>
    %3 = tpu.matmul %1, %2, %cst {dimension_numbers = #tpu.dot_dimension_numbers<[1], [0], [0], [1], [0, 0, 1, 1], [], []>} : vector<16x21xbf16>, vector<21x2016xbf16>, vector<16x2016xf32> -> vector<16x2016xf32>
    %c0_3 = arith.constant 0 : index
    %c0_4 = arith.constant 0 : index
    %4 = vector.load %arg3[%c0_3, %c0_4] : memref<1x2016xf32, #tpu.memory_space<vmem>>, vector<1x2016xf32>
    %5 = vector.broadcast %4 : vector<1x2016xf32> to vector<16x2016xf32>
    %6 = arith.cmpf oeq, %3, %5 : vector<16x2016xf32>
    %7 = arith.extui %6 : vector<16x2016xi1> to vector<16x2016xi32>
    %8 = arith.sitofp %7 : vector<16x2016xi32> to vector<16x2016xf32>
    %9 = arith.truncf %8 : vector<16x2016xf32> to vector<16x2016xbf16>
    %c0_5 = arith.constant 0 : index
    %c0_6 = arith.constant 0 : index
    %10 = vector.load %arg4[%c0_5, %c0_6] : memref<2016x544xbf16, #tpu.memory_space<vmem>>, vector<2016x544xbf16>
    %cst_7 = arith.constant dense<0.000000e+00> : vector<16x544xf32>
    %11 = tpu.matmul %9, %10, %cst_7 {dimension_numbers = #tpu.dot_dimension_numbers<[1], [0], [0], [1], [0, 0, 1, 1], [], []>} : vector<16x2016xbf16>, vector<2016x544xbf16>, vector<16x544xf32> -> vector<16x544xf32>
    %12 = vector.extract_strided_slice %11 {offsets = [0, 0], sizes = [16, 128], strides = [1, 1]} : vector<16x544xf32> to vector<16x128xf32>
    %13 = vector.extract_strided_slice %11 {offsets = [0, 128], sizes = [16, 128], strides = [1, 1]} : vector<16x544xf32> to vector<16x128xf32>
    %14 = arith.maximumf %12, %13 : vector<16x128xf32>
    %15 = vector.extract_strided_slice %11 {offsets = [0, 256], sizes = [16, 128], strides = [1, 1]} : vector<16x544xf32> to vector<16x128xf32>
    %16 = arith.maximumf %14, %15 : vector<16x128xf32>
    %17 = vector.extract_strided_slice %11 {offsets = [0, 384], sizes = [16, 128], strides = [1, 1]} : vector<16x544xf32> to vector<16x128xf32>
    %18 = arith.maximumf %16, %17 : vector<16x128xf32>
    %c64_i32 = arith.constant 64 : i32
    %19 = tpu.dynamic_rotate %18 by %c64_i32 dim 1 : vector<16x128xf32>, i32 -> vector<16x128xf32>
    %20 = arith.maximumf %18, %19 : vector<16x128xf32>
    %c32_i32 = arith.constant 32 : i32
    %21 = tpu.dynamic_rotate %20 by %c32_i32 dim 1 : vector<16x128xf32>, i32 -> vector<16x128xf32>
    %22 = arith.maximumf %20, %21 : vector<16x128xf32>
    %23 = vector.extract_strided_slice %22 {offsets = [0, 0], sizes = [16, 32], strides = [1, 1]} : vector<16x128xf32> to vector<16x32xf32>
    %24 = vector.extract_strided_slice %11 {offsets = [0, 512], sizes = [16, 32], strides = [1, 1]} : vector<16x544xf32> to vector<16x32xf32>
    %25 = arith.maximumf %23, %24 : vector<16x32xf32>
    %c0_8 = arith.constant 0 : index
    %c0_9 = arith.constant 0 : index
    %26 = vector.load %arg6[%c0_8, %c0_9] : memref<1x96xf32, #tpu.memory_space<vmem>>, vector<1x32xf32>
    %27 = vector.broadcast %26 : vector<1x32xf32> to vector<16x32xf32>
    %28 = arith.addf %25, %27 : vector<16x32xf32>
    %cst_10 = arith.constant 0.000000e+00 : f32
    %29 = vector.broadcast %cst_10 : f32 to vector<16x32xf32>
    %30 = arith.maximumf %28, %29 : vector<16x32xf32>
    %c0_11 = arith.constant 0 : index
    %c0_12 = arith.constant 0 : index
    %31 = vector.load %arg5[%c0_11, %c0_12] : memref<32x64xf32, #tpu.memory_space<vmem>>, vector<32x64xf32>
    %cst_13 = arith.constant dense<0.000000e+00> : vector<16x64xf32>
    %32 = tpu.matmul %30, %31, %cst_13 {dimension_numbers = #tpu.dot_dimension_numbers<[1], [0], [0], [1], [0, 0, 1, 1], [], []>} : vector<16x32xf32>, vector<32x64xf32>, vector<16x64xf32> -> vector<16x64xf32>
    %c0_14 = arith.constant 0 : index
    %c32 = arith.constant 32 : index
    %33 = vector.load %arg6[%c0_14, %c32] : memref<1x96xf32, #tpu.memory_space<vmem>>, vector<1x64xf32>
    %34 = vector.broadcast %33 : vector<1x64xf32> to vector<16x64xf32>
    %35 = arith.addf %32, %34 : vector<16x64xf32>
    %36 = vector.extract_strided_slice %35 {offsets = [0, 0], sizes = [16, 32], strides = [1, 1]} : vector<16x64xf32> to vector<16x32xf32>
    %cst_15 = arith.constant 0.000000e+00 : f32
    %37 = vector.broadcast %cst_15 : f32 to vector<16x32xf32>
    %38 = arith.maximumf %36, %37 : vector<16x32xf32>
    %39 = vector.extract_strided_slice %35 {offsets = [0, 32], sizes = [16, 32], strides = [1, 1]} : vector<16x64xf32> to vector<16x32xf32>
    %40 = arith.negf %39 : vector<16x32xf32>
    %41 = math.exp %40 : vector<16x32xf32>
    %cst_16 = arith.constant 1.000000e+00 : f32
    %42 = vector.broadcast %cst_16 : f32 to vector<16x32xf32>
    %43 = arith.addf %42, %41 : vector<16x32xf32>
    %44 = arith.divf %42, %43 : vector<16x32xf32>
    %45 = arith.mulf %44, %38 : vector<16x32xf32>
    %cst_17 = arith.constant 1.000000e+00 : f32
    %46 = vector.broadcast %cst_17 : f32 to vector<16x32xf32>
    %47 = arith.subf %46, %44 : vector<16x32xf32>
    %48 = arith.mulf %47, %30 : vector<16x32xf32>
    %49 = arith.addf %45, %48 : vector<16x32xf32>
    %c0_18 = arith.constant 0 : index
    %c0_19 = arith.constant 0 : index
    %50 = vector.load %arg7[%c0_18, %c0_19] : memref<16x32xf32, #tpu.memory_space<vmem>>, vector<16x32xf32>
    tpu.vector_store %arg7[%c0_18, %c0_19], %49 {strides = array<i32>} : memref<16x32xf32, #tpu.memory_space<vmem>>, vector<16x32xf32>,
    return
  }
  func.func @transform_0(%arg0: i32) -> (i32, i32) {
    %c0_i32 = arith.constant 0 : i32
    %c0_i32_0 = arith.constant 0 : i32
    return %arg0, %c0_i32 : i32, i32
  }
  func.func @transform_1(%arg0: i32) -> (i32, i32) {
    %c0_i32 = arith.constant 0 : i32
    %c0_i32_0 = arith.constant 0 : i32
    %c0_i32_1 = arith.constant 0 : i32
    return %c0_i32, %c0_i32_0 : i32, i32
  }
  func.func @transform_2(%arg0: i32) -> (i32, i32) {
    %c0_i32 = arith.constant 0 : i32
    %c0_i32_0 = arith.constant 0 : i32
    %c0_i32_1 = arith.constant 0 : i32
    return %c0_i32, %c0_i32_0 : i32, i32
  }
  func.func @transform_3(%arg0: i32) -> (i32, i32) {
    %c0_i32 = arith.constant 0 : i32
    %c0_i32_0 = arith.constant 0 : i32
    %c0_i32_1 = arith.constant 0 : i32
    return %c0_i32, %c0_i32_0 : i32, i32
  }
  func.func @transform_4(%arg0: i32) -> (i32, i32) {
    %c0_i32 = arith.constant 0 : i32
    %c0_i32_0 = arith.constant 0 : i32
    %c0_i32_1 = arith.constant 0 : i32
    return %c0_i32, %c0_i32_0 : i32, i32
  }
  func.func @transform_5(%arg0: i32) -> (i32, i32) {
    %c0_i32 = arith.constant 0 : i32
    %c0_i32_0 = arith.constant 0 : i32
    %c0_i32_1 = arith.constant 0 : i32
    return %c0_i32, %c0_i32_0 : i32, i32
  }
  func.func @transform_6(%arg0: i32) -> (i32, i32) {
    %c0_i32 = arith.constant 0 : i32
    %c0_i32_0 = arith.constant 0 : i32
    return %arg0, %c0_i32 : i32, i32
  }
}

</mosaic_0001>

<bundles_post_ra>
// kernel: tpu_custom_call.1
= control target key start
LH: loop header
LB: loop body
LE: loop exit
PB: predicated region body
PF: predicated region fallthrough
CT: control target
= control target key end

     0   :  { %vm178_vm0 = vcmask 1041408   ;;  %vm179_vm1 = vcmask 1042432   ;;  %v7979_v8 = vmov 65535   ;;  %v7980_v15 = vmov 0   ;;  %s10367_s0 = inlined_call_operand.vmem [shape: s32[16,21], index: 0, kind: input, shape index: {}]   ;;  %s10368_s1 = inlined_call_operand.vmem [shape: bf16[21,2016], index: 1, kind: input, shape index: {}]   ;;  %s10369_s2 = inlined_call_operand.vmem [shape: f32[1,2016], index: 2, kind: input, shape index: {}]   ;;  %s10370_s3 = inlined_call_operand.vmem [shape: bf16[2016,544], index: 3, kind: input, shape index: {}]   ;;  %s10371_s4 = inlined_call_operand.vmem [shape: f32[32,64], index: 4, kind: input, shape index: {}]   ;;  %s10372_s5 = inlined_call_operand.vmem [shape: f32[1,96], index: 5, kind: input, shape index: {}]   ;;  %s10373_s6 = inlined_call_operand.hbm [shape: f32[16,32], index: 6, kind: output, shape index: {}]  }
   0x1   :  { %v30_v0 = vld [vmem:[%s10368_s1] sm:$0xff]  ;;  %v26_v7 = vld [vmem:[%s10367_s0 + $0x8] sm:$0xff]  ;;  %v180_v9 = vsel %vm178_vm0, 4294967295, %v7979_v8  ;;  %262 = vmatprep.mubr.bf16.mxu0 %v7980_v15  ;;  %v33_v18 = vld [vmem:[%s10368_s1 + $0x18] sm:$0xff]  ;;  %391 = vmatprep.mubr.bf16.mxu1 %v7980_v15  ;;  %vm174_vm2 = vcmask 171008  }
   0x2   :  { %v38_v1 = vld [vmem:[%s10368_s1 + $0x40] sm:$0xff]  ;;  %v31_v11 = vld [vmem:[%s10368_s1 + $0x8] sm:$0xff]  ;;  %v8048_v14 = vsel %vm179_vm1, %v180_v9, 0  ;;  %v28_v17 = vcvt.s32.f32 %v26_v7  ;;  %v41_v21 = vld [vmem:[%s10368_s1 + $0x58] sm:$0xff] }
   0x3   :  { %v46_v2 = vld [vmem:[%s10368_s1 + $0x80] sm:$0x77]  ;;  %v6005_v3 = vcombine.high %v30_v0, %v38_v1  ;;  %v6004_v4 = vcombine.low %v30_v0, %v38_v1  ;;  %v39_v12 = vld [vmem:[%s10368_s1 + $0x48] sm:$0xff]  ;;  %v49_v22 = vld [vmem:[%s10368_s1 + $0x98] sm:$0x77]  ;;  %v6011_v25 = vcombine.high %v33_v18, %v41_v21  ;;  %v6010_v27 = vcombine.low %v33_v18, %v41_v21 }
   0x4   :  { %v6021_v5 = vcombine.high %v46_v2, %v46_v2  ;;  %v25_v6 = vld [vmem:[%s10367_s0] sm:$0xff]  ;;  %v6020_v10 = vcombine.low %v46_v2, %v46_v2  ;;  %v47_v13 = vld [vmem:[%s10368_s1 + $0x88] sm:$0x77]  ;;  %v6007_v23 = vcombine.high %v31_v11, %v39_v12  ;;  %v6027_v28 = vcombine.high %v49_v22, %v49_v22  ;;  %v32_v36 = vld [vmem:[%s10368_s1 + $0x10] sm:$0xff] }
   0x5   :  { %230 = vmatprep.subr.bf16.mxu0 %v6005_v3  ;;  %v27_v16 = vcvt.s32.f32 %v25_v6  ;;  %v6023_v24 = vcombine.high %v47_v13, %v47_v13  ;;  %v6026_v29 = vcombine.low %v49_v22, %v49_v22  ;;  %v35_v30 = vld [vmem:[%s10368_s1 + $0x28] sm:$0xff]  ;;  %v6006_v32 = vcombine.low %v31_v11, %v39_v12  ;;  %359 = vmatprep.subr.bf16.mxu1 %v6011_v25  ;;  %v40_v37 = vld [vmem:[%s10368_s1 + $0x50] sm:$0xff]  ;;  %v37_v48 = vld [vmem:[%s10368_s1 + $0x38] sm:$0xff] }
   0x6   :  { %231 = vmatpush1.bf16.msra.mxu0 %v6004_v4  ;;  %v186_v19 = vand.u32 %v6021_v5, %v8048_v14  ;;  %v183_v20 = vand.u32 %v6020_v10, %v8048_v14  ;;  %v43_v31 = vld [vmem:[%s10368_s1 + $0x68] sm:$0xff]  ;;  %v6022_v33 = vcombine.low %v47_v13, %v47_v13  ;;  %360 = vmatpush1.bf16.msra.mxu1 %v6010_v27  ;;  %v48_v40 = vld [vmem:[%s10368_s1 + $0x90] sm:$0x77]  ;;  %v45_v50 = vld [vmem:[%s10368_s1 + $0x78] sm:$0xff] }
   0x7   :  { %v8063_v26 = vpack.c.bf16 %v28_v17, %v27_v16  ;;  %v51_v34 = vld [vmem:[%s10368_s1 + $0xa8] sm:$0x77]  ;;  %v192_v35 = vand.u32 %v6023_v24, %v8048_v14  ;;  %v204_v38 = vand.u32 %v6027_v28, %v8048_v14  ;;  %v201_v39 = vand.u32 %v6026_v29, %v8048_v14  ;;  %v53_v51 = vld [vmem:[%s10368_s1 + $0xb8] sm:$0x77]  ;;  %v34_v55 = vld [vmem:[%s10368_s1 + $0x20] sm:$0xff] }
   0x8   :  { %232 = vmatprep.subr.bf16.mxu0 %v186_v19  ;;  %v6015_v41 = vcombine.high %v35_v30, %v43_v31  ;;  %v6031_v42 = vcombine.high %v51_v34, %v51_v34  ;;  %v189_v43 = vand.u32 %v6022_v33, %v8048_v14  ;;  %v6009_v44 = vcombine.high %v32_v36, %v40_v37  ;;  %v42_v56 = vld [vmem:[%s10368_s1 + $0x60] sm:$0xff]  ;;  %v36_v5 = vld [vmem:[%s10368_s1 + $0x30] sm:$0xff]  ;;  %v7068_v16 = vld [vmem:[%s10370_s3 + $0x8] ss:$20 sps:$4 sm:$0xff]  }
   0x9   :  { %361 = vmatprep.subr.bf16.mxu1 %v204_v38  ;;  %v6025_v45 = vcombine.high %v48_v40, %v48_v40  ;;  %v6014_v46 = vcombine.low %v35_v30, %v43_v31  ;;  %v6030_v47 = vcombine.low %v51_v34, %v51_v34  ;;  %v6008_v52 = vcombine.low %v32_v36, %v40_v37  ;;  %v50_v58 = vld [vmem:[%s10368_s1 + $0xa0] sm:$0x77]  ;;  %v44_v7 = vld [vmem:[%s10368_s1 + $0x70] sm:$0xff]  ;;  %v7080_v25 = vld [vmem:[%s10370_s3 + $0x58] ss:$20 sps:$4 sm:$0xff]  }
   0xa   :  { %233 = vmatpush1.bf16.msra.mxu0 %v183_v20  ;;  %362 = vmatpush1.bf16.msra.mxu1 %v201_v39  ;;  %v216_v49 = vand.u32 %v6031_v42, %v8048_v14  ;;  %v6024_v53 = vcombine.low %v48_v40, %v48_v40  ;;  %v6019_v59 = vcombine.high %v37_v48, %v45_v50  ;;  %v52_v8 = vld [vmem:[%s10368_s1 + $0xb0] sm:$0x77]  ;;  %v7070_v10 = vld [vmem:[%s10370_s3 + $0xc] ss:$20 sps:$4 sm:$0xff]   ;;  %v7067_v24 = vld [vmem:[%s10370_s3 + $0x4] ss:$20 sps:$4 sm:$0xff]  }
   0xb   :  { %273 = vmatprep.subr.bf16.mxu0 %v6007_v23  ;;  %445 = vmatprep.subr.bf16.mxu1 %v6015_v41  ;;  %v198_v54 = vand.u32 %v6025_v45, %v8048_v14  ;;  %v213_v57 = vand.u32 %v6030_v47, %v8048_v14  ;;  %v6035_v60 = vcombine.high %v53_v51, %v53_v51  ;;  %v7076_v17 = vld [vmem:[%s10370_s3 + $0x34] ss:$20 sps:$4 sm:$0xff]   ;;  %v7074_v21 = vld [vmem:[%s10370_s3 + $0x30] ss:$20 sps:$4 sm:$0xff]   ;;  %v7073_v28 = vld [vmem:[%s10370_s3 + $0x2c] ss:$20 sps:$4 sm:$0xff]  }
   0xc   :  { %v195_v61 = vand.u32 %v6024_v53, %v8048_v14  ;;  %v6013_v62 = vcombine.high %v34_v55, %v42_v56  ;;  %v6029_v63 = vcombine.high %v50_v58, %v50_v58  ;;  %v6018_v0 = vcombine.low %v37_v48, %v45_v50  ;;  %v7082_v22 = vld [vmem:[%s10370_s3 + $0x5c] ss:$20 sps:$4 sm:$0xff]   ;;  %v7088_v27 = vld [vmem:[%s10370_s3 + $0x84] ss:$20 sps:$4 sm:$0xff]   ;;  %v7086_v29 = vld [vmem:[%s10370_s3 + $0x80] ss:$20 sps:$4 sm:$0xff]  }
   0xd   :  { %6036 = vmatmul.mubr.msk.bf16.vlgmr.msra.gmra.mrb[0].mxu0 %vm174_vm2, %v8063_v26  ;;  %6039 = vmatmul.mubr.msk.bf16.vlgmr.msra.gmra.mrb[0].mxu1 %vm174_vm2, %v8063_v26  ;;  %v6034_v1 = vcombine.low %v53_v51, %v53_v51  ;;  %v228_v2 = vand.u32 %v6035_v60, %v8048_v14  ;;  %v6012_v3 = vcombine.low %v34_v55, %v42_v56  ;;  %v7094_v30 = vld [vmem:[%s10370_s3 + $0xac] ss:$20 sps:$4 sm:$0xff]   ;;  %v7071_v31 = vld [vmem:[%s10370_s3 + $0x28] ss:$20 sps:$4 sm:$0xff]   ;;  %v7077_v34 = vld [vmem:[%s10370_s3 + $0x50] ss:$20 sps:$4 sm:$0xff]  }
   0xe   :  { %274 = vmatpush1.bf16.msra.mxu0 %v6006_v32  ;;  %305 = vmatprep.mubr.bf16.mxu0 %v7980_v15  ;;  %v6028_v4 = vcombine.low %v50_v58, %v50_v58  ;;  %v210_v6 = vand.u32 %v6029_v63, %v8048_v14  ;;  %v6017_v12 = vcombine.high %v36_v5, %v44_v7  ;;  %v7079_v32 = vld [vmem:[%s10370_s3 + $0x54] ss:$20 sps:$4 sm:$0xff]   ;;  %v7098_v36 = vld [vmem:[%s10370_s3 + $0xd0] ss:$20 sps:$4 sm:$0xff]   ;;  %v7083_v38 = vld [vmem:[%s10370_s3 + $0x78] ss:$20 sps:$4 sm:$0xff]  }
   0xf   :  { %275 = vmatprep.subr.bf16.mxu0 %v192_v35  ;;  %446 = vmatpush1.bf16.msra.mxu1 %v6014_v46  ;;  %v225_v9 = vand.u32 %v6034_v1, %v8048_v14  ;;  %v6033_v13 = vcombine.high %v52_v8, %v52_v8  ;;  %v6016_v18 = vcombine.low %v36_v5, %v44_v7  ;;  %v7092_v33 = vld [vmem:[%s10370_s3 + $0xa8] ss:$20 sps:$4 sm:$0xff]   ;;  %v7091_v39 = vld [vmem:[%s10370_s3 + $0xa4] ss:$20 sps:$4 sm:$0xff]   ;;  %v7089_v42 = vld [vmem:[%s10370_s3 + $0xa0] ss:$20 sps:$4 sm:$0xff]  }
  0x10   :  { %447 = vmatprep.subr.bf16.mxu1 %v216_v49  ;;  %477 = vmatprep.mubr.bf16.mxu1 %v7980_v15  ;;  %v207_v11 = vand.u32 %v6028_v4, %v8048_v14  ;;  %v6032_v19 = vcombine.low %v52_v8, %v52_v8  ;;  %v7085_v35 = vld [vmem:[%s10370_s3 + $0x7c] ss:$20 sps:$4 sm:$0xff]   ;;  %v7104_v40 = vld [vmem:[%s10370_s3 + $0xf8] ss:$20 sps:$4 sm:$0xff]   ;;  %v7103_v47 = vld [vmem:[%s10370_s3 + $0xf4] ss:$20 sps:$4 sm:$0xff]  }
  0x11   :  { %v222_v20 = vand.u32 %v6033_v13, %v8048_v14  ;;  %v7106_v37 = vld [vmem:[%s10370_s3 + $0xfc] ss:$20 sps:$4 sm:$0xff]   ;;  %v7112_v41 = vld [vmem:[%s10370_s3 + $0x124] ss:$20 sps:$4 sm:$0xff]   ;;  %v7118_v45 = vld [vmem:[%s10370_s3 + $0x14c] ss:$20 sps:$4 sm:$0xff]  }
  0x12   :  { %276 = vmatpush1.bf16.msra.mxu0 %v189_v43  ;;  %v219_v23 = vand.u32 %v6032_v19, %v8048_v14  ;;  %v7065_v14 = vld [vmem:[%s10370_s3] ss:$20 sps:$4 sm:$0xff]   ;;  %v7095_v46 = vld [vmem:[%s10370_s3 + $0xc8] ss:$20 sps:$4 sm:$0xff]   ;;  %v7101_v50 = vld [vmem:[%s10370_s3 + $0xf0] ss:$20 sps:$4 sm:$0xff]  }
  0x13   :  { %316 = vmatprep.subr.bf16.mxu0 %v6009_v44  ;;  %448 = vmatpush1.bf16.msra.mxu1 %v213_v57  ;;  %v7097_v43 = vld [vmem:[%s10370_s3 + $0xcc] ss:$20 sps:$4 sm:$0xff]   ;;  %v7116_v48 = vld [vmem:[%s10370_s3 + $0x148] ss:$20 sps:$4 sm:$0xff]   ;;  %v7115_v55 = vld [vmem:[%s10370_s3 + $0x144] ss:$20 sps:$4 sm:$0xff]  }
  0x14   :  { %531 = vmatprep.subr.bf16.mxu1 %v6019_v59  ;;  %v7110_v44 = vld [vmem:[%s10370_s3 + $0x120] ss:$20 sps:$4 sm:$0xff]   ;;  %v7109_v51 = vld [vmem:[%s10370_s3 + $0x11c] ss:$20 sps:$4 sm:$0xff]   ;;  %v7128_v56 = vld [vmem:[%s10370_s3 + $0x198] ss:$20 sps:$4 sm:$0xff]  }
  0x15   :  { %6037 = vmatmul.mubr.msk.bf16.vlgmr.msra.gmra.mrb[4].mxu0 %vm174_vm2, %v8063_v26  ;;  %v7124_v49 = vld [vmem:[%s10370_s3 + $0x174] ss:$20 sps:$4 sm:$0xff]   ;;  %v7130_v53 = vld [vmem:[%s10370_s3 + $0x19c] ss:$20 sps:$4 sm:$0xff]   ;;  %v7136_v57 = vld [vmem:[%s10370_s3 + $0x1c4] ss:$20 sps:$4 sm:$0xff]  }
  0x16   :  { %317 = vmatpush1.bf16.msra.mxu0 %v6008_v52  ;;  %348 = vmatprep.mubr.bf16.mxu0 %v7980_v15  ;;  %v7122_v52 = vld [vmem:[%s10370_s3 + $0x170] ss:$20 sps:$4 sm:$0xff]   ;;  %v7113_v58 = vld [vmem:[%s10370_s3 + $0x140] ss:$20 sps:$4 sm:$0xff]   ;;  %v7152_v8 = vld [vmem:[%s10370_s3 + $0x238] ss:$20 sps:$4 sm:$0xff]  }
  0x17   :  { %318 = vmatprep.subr.bf16.mxu0 %v198_v54  ;;  %6041 = vmatmul.mubr.msk.bf16.vlgmr.msra.gmra.mrb[4].mxu1 %vm174_vm2, %v8063_v26  ;;  %v7107_v54 = vld [vmem:[%s10370_s3 + $0x118] ss:$20 sps:$4 sm:$0xff]   ;;  %v7134_v60 = vld [vmem:[%s10370_s3 + $0x1c0] ss:$20 sps:$4 sm:$0xff]   ;;  %v7146_v4 = vld [vmem:[%s10370_s3 + $0x210] ss:$20 sps:$4 sm:$0xff]  }
  0x18   :  { %532 = vmatpush1.bf16.msra.mxu1 %v6018_v0  ;;  %563 = vmatprep.mubr.bf16.mxu1 %v7980_v15  ;;  %v7121_v59 = vld [vmem:[%s10370_s3 + $0x16c] ss:$20 sps:$4 sm:$0xff]   ;;  %v7127_v63 = vld [vmem:[%s10370_s3 + $0x194] ss:$20 sps:$4 sm:$0xff]   ;;  %v7154_v5 = vld [vmem:[%s10370_s3 + $0x23c] ss:$20 sps:$4 sm:$0xff]  }
  0x19   :  { %533 = vmatprep.subr.bf16.mxu1 %v228_v2  ;;  %v7140_v0 = vld [vmem:[%s10370_s3 + $0x1e8] ss:$20 sps:$4 sm:$0xff]   ;;  %v7125_v2 = vld [vmem:[%s10370_s3 + $0x190] ss:$20 sps:$4 sm:$0xff]   ;;  %v7166_v19 = vld [vmem:[%s10370_s3 + $0x28c] ss:$20 sps:$4 sm:$0xff]  }
  0x1a   :  { %319 = vmatpush1.bf16.msra.mxu0 %v195_v61  ;;  %v7142_v61 = vld [vmem:[%s10370_s3 + $0x1ec] ss:$20 sps:$4 sm:$0xff]   ;;  %v7148_v1 = vld [vmem:[%s10370_s3 + $0x214] ss:$20 sps:$4 sm:$0xff]   ;;  %v7139_v7 = vld [vmem:[%s10370_s3 + $0x1e4] ss:$20 sps:$4 sm:$0xff]  }
  0x1b   :  { %402 = vmatprep.subr.bf16.mxu0 %v6013_v62  ;;  %v7119_v62 = vld [vmem:[%s10370_s3 + $0x168] ss:$20 sps:$4 sm:$0xff]   ;;  %v7149_v13 = vld [vmem:[%s10370_s3 + $0x230] ss:$20 sps:$4 sm:$0xff]  }
  0x1c   :  { %534 = vmatpush1.bf16.msra.mxu1 %v225_v9  ;;  %v7137_v9 = vld [vmem:[%s10370_s3 + $0x1e0] ss:$20 sps:$4 sm:$0xff]  }
  0x1d   :  { %6038 = vmatmul.mubr.msk.bf16.vlgmr.msra.gmra.mrb[8].mxu0 %vm174_vm2, %v8063_v26  ;;  %5150 = vmatprep.subr.bf16.mxu1 %v7070_v10  ;;  %v7145_v10 = vld [vmem:[%s10370_s3 + $0x20c] ss:$20 sps:$4 sm:$0xff]  }
  0x1e   :  { %403 = vmatpush1.bf16.msra.mxu0 %v6012_v3  ;;  %434 = vmatprep.mubr.bf16.mxu0 %v7980_v15  ;;  %v7133_v3 = vld [vmem:[%s10370_s3 + $0x1bc] ss:$20 sps:$4 sm:$0xff]  }
  0x1f   :  { %404 = vmatprep.subr.bf16.mxu0 %v210_v6  ;;  %6043 = vmatmul.mubr.msk.bf16.vlgmr.msra.gmra.mrb[8].mxu1 %vm174_vm2, %v8063_v26  ;;  %v7131_v6 = vld [vmem:[%s10370_s3 + $0x1b8] ss:$20 sps:$4 sm:$0xff]  }
  0x20   :  { %5151 = vmatpush1.bf16.msra.mxu1 %v7068_v16  ;;  %v7160_v16 = vld [vmem:[%s10370_s3 + $0x264] ss:$20 sps:$4 sm:$0xff]  }
  0x21   :  { %5152 = vmatprep.subr.bf16.mxu1 %v7076_v17  ;;  %v7157_v17 = vld [vmem:[%s10370_s3 + $0x25c] ss:$20 sps:$4 sm:$0xff]  }
  0x22   :  { %405 = vmatpush1.bf16.msra.mxu0 %v207_v11  ;;  %v7143_v11 = vld [vmem:[%s10370_s3 + $0x208] ss:$20 sps:$4 sm:$0xff]  }
  0x23   :  { %488 = vmatprep.subr.bf16.mxu0 %v6017_v12  ;;  %v7151_v12 = vld [vmem:[%s10370_s3 + $0x234] ss:$20 sps:$4 sm:$0xff]  }
  0x24   :  { %5153 = vmatpush1.bf16.msra.mxu1 %v7074_v21  ;;  %v7163_v21 = vld [vmem:[%s10370_s3 + $0x284] ss:$20 sps:$4 sm:$0xff]  }
  0x25   :  { %6040 = vmatmul.mubr.msk.bf16.vlgmr.msra.gmra.mrb[12].mxu0 %vm174_vm2, %v8063_v26  ;;  %5154 = vmatprep.subr.bf16.mxu1 %v7082_v22  ;;  %v578_v22 = vlaneseq }
  0x26   :  { %489 = vmatpush1.bf16.msra.mxu0 %v6016_v18  ;;  %520 = vmatprep.mubr.bf16.mxu0 %v7980_v15  ;;  %v7158_v18 = vld [vmem:[%s10370_s3 + $0x260] ss:$20 sps:$4 sm:$0xff]  }
  0x27   :  { %490 = vmatprep.subr.bf16.mxu0 %v222_v20  ;;  %v7155_v20 = vld [vmem:[%s10370_s3 + $0x258] ss:$20 sps:$4 sm:$0xff]  }
  0x28   :  { %5155 = vmatpush1.bf16.msra.mxu1 %v7080_v25  ;;  %v8350_v25 = vld [vmem:[%s10369_s2] sm:$0xff] }
  0x29   :  { %5156 = vmatprep.subr.bf16.mxu1 %v7088_v27 }
  0x2a   :  { %491 = vmatpush1.bf16.msra.mxu0 %v219_v23  ;;  %v8344_v23 = vshrl.u32 %v578_v22, 7  ;;  %v7185_v22 = vld [vmem:[%s10370_s3 + $0x320] ss:$20 sps:$4 sm:$0xff]  }
  0x2b   :  { %4806 = vmatprep.subr.bf16.mxu0 %v7067_v24 }
  0x2c   :  { %5157 = vmatpush1.bf16.msra.mxu1 %v7086_v29  ;;  %v580_v24 = vsub.s32 0, %v8344_v23  ;;  %v584_v27 = vsub.s32 1, %v8344_v23 }
  0x2d   :  { %6042 = vmatmul.mubr.msk.bf16.vlgmr.msra.gmra.mrb[16].mxu0 %vm174_vm2, %v8063_v26  ;;  %5158 = vmatprep.subr.bf16.mxu1 %v7094_v30  ;;  %v7100_v26 = vld [vmem:[%s10370_s3 + $0xd4] ss:$20 sps:$4 sm:$0xff]  }
  0x2e   :  { %4807 = vmatpush1.bf16.msra.mxu0 %v7065_v14  ;;  %v581_v14 = vrot.slane %v8350_v25, %v580_v24  ;;  %v585_v29 = vrot.slane %v8350_v25, %v584_v27 }
  0x2f   :  { %4808 = vmatprep.subr.bf16.mxu0 %v7073_v28 }
  0x30   :  { %5159 = vmatpush1.bf16.msra.mxu1 %v7092_v33  ;;  %v7161_v33 = vld [vmem:[%s10370_s3 + $0x280] ss:$20 sps:$4 sm:$0xff]  }
  0x31   :  { %5160 = vmatprep.subr.bf16.mxu1 %v7100_v26  ;;  %v592_v26 = vsub.s32 3, %v8344_v23 }
  0x32   :  { %4809 = vmatpush1.bf16.msra.mxu0 %v7071_v31  ;;  %v588_v31 = vsub.s32 2, %v8344_v23 }
  0x33   :  { %4810 = vmatprep.subr.bf16.mxu0 %v7079_v32 }
  0x34   :  { %5161 = vmatpush1.bf16.msra.mxu1 %v7098_v36  ;;  %v10377_v36 = vmov 0 }
  0x35   :  { %5162 = vmatprep.subr.bf16.mxu1 %v7106_v37  ;;  %v10379_v37 = vmov 0 }
  0x36   :  { %4811 = vmatpush1.bf16.msra.mxu0 %v7077_v34  ;;  %v7164_v34 = vld [vmem:[%s10370_s3 + $0x288] ss:$20 sps:$4 sm:$0xff]  }
  0x37   :  { %4812 = vmatprep.subr.bf16.mxu0 %v7085_v35 }
  0x38   :  { %5163 = vmatpush1.bf16.msra.mxu1 %v7104_v40  ;;  %v589_v40 = vrot.slane %v8350_v25, %v588_v31 }
  0x39   :  { %5164 = vmatprep.subr.bf16.mxu1 %v7112_v41  ;;  %v7981_v41 = vmov 1.0|1.0  }
  0x3a   :  { %4813 = vmatpush1.bf16.msra.mxu0 %v7083_v38  ;;  %v7169_v38 = vld [vmem:[%s10370_s3 + $0x2ac] ss:$20 sps:$4 sm:$0xff]  }
  0x3b   :  { %4814 = vmatprep.subr.bf16.mxu0 %v7091_v39  ;;  %v7172_v39 = vld [vmem:[%s10370_s3 + $0x2b4] ss:$20 sps:$4 sm:$0xff]  }
  0x3c   :  { %5165 = vmatpush1.bf16.msra.mxu1 %v7110_v44  ;;  %v593_v44 = vrot.slane %v8350_v25, %v592_v26 }
  0x3d   :  { %5166 = vmatprep.subr.bf16.mxu1 %v7118_v45  ;;  %v7175_v45 = vld [vmem:[%s10370_s3 + $0x2d4] ss:$20 sps:$4 sm:$0xff]  }
  0x3e   :  { %4815 = vmatpush1.bf16.msra.mxu0 %v7089_v42  ;;  %v7167_v42 = vld [vmem:[%s10370_s3 + $0x2a8] ss:$20 sps:$4 sm:$0xff]  }
  0x3f   :  { %4816 = vmatprep.subr.bf16.mxu0 %v7097_v43  ;;  %v7170_v43 = vld [vmem:[%s10370_s3 + $0x2b0] ss:$20 sps:$4 sm:$0xff]  }
  0x40   :  { %5167 = vmatpush1.bf16.msra.mxu1 %v7116_v48  ;;  %v604_v48 = vsub.s32 6, %v8344_v23 }
  0x41   :  { %5168 = vmatprep.subr.bf16.mxu1 %v7124_v49  ;;  %v7178_v49 = vld [vmem:[%s10370_s3 + $0x2dc] ss:$20 sps:$4 sm:$0xff]  }
  0x42   :  { %4817 = vmatpush1.bf16.msra.mxu0 %v7095_v46 }
  0x43   :  { %4818 = vmatprep.subr.bf16.mxu0 %v7103_v47 }
  0x44   :  { %5169 = vmatpush1.bf16.msra.mxu1 %v7122_v52 }
  0x45   :  { %5170 = vmatprep.subr.bf16.mxu1 %v7130_v53 }
  0x46   :  { %4819 = vmatpush1.bf16.msra.mxu0 %v7101_v50 }
  0x47   :  { %4820 = vmatprep.subr.bf16.mxu0 %v7109_v51  ;;  %v596_v51 = vsub.s32 4, %v8344_v23 }
  0x48   :  { %5171 = vmatpush1.bf16.msra.mxu1 %v7128_v56  ;;  %v608_v56 = vsub.s32 7, %v8344_v23 }
  0x49   :  { %5172 = vmatprep.subr.bf16.mxu1 %v7136_v57 }
  0x4a   :  { %4821 = vmatpush1.bf16.msra.mxu0 %v7107_v54  ;;  %v600_v54 = vsub.s32 5, %v8344_v23 }
  0x4b   :  { %4822 = vmatprep.subr.bf16.mxu0 %v7115_v55  ;;  %v605_v55 = vrot.slane %v8350_v25, %v604_v48 }
  0x4c   :  { %5173 = vmatpush1.bf16.msra.mxu1 %v7134_v60 }
  0x4d   :  { %5174 = vmatprep.subr.bf16.mxu1 %v7142_v61  ;;  %v609_v61 = vrot.slane %v8350_v25, %v608_v56 }
  0x4e   :  { %4823 = vmatpush1.bf16.msra.mxu0 %v7113_v58  ;;  %v7173_v58 = vld [vmem:[%s10370_s3 + $0x2d0] ss:$20 sps:$4 sm:$0xff]  }
  0x4f   :  { %4824 = vmatprep.subr.bf16.mxu0 %v7121_v59  ;;  %v7176_v59 = vld [vmem:[%s10370_s3 + $0x2d8] ss:$20 sps:$4 sm:$0xff]  }
  0x50   :  { %5175 = vmatpush1.bf16.msra.mxu1 %v7140_v0  ;;  %v7184_v0 = vld [vmem:[%s10370_s3 + $0x304] ss:$20 sps:$4 sm:$0xff]  }
  0x51   :  { %5176 = vmatprep.subr.bf16.mxu1 %v7148_v1  ;;  %v10383_v1 = vmov 0 }
  0x52   :  { %4825 = vmatpush1.bf16.msra.mxu0 %v7119_v62 }
  0x53   :  { %4826 = vmatprep.subr.bf16.mxu0 %v7127_v63  ;;  %v7181_v63 = vld [vmem:[%s10370_s3 + $0x2fc] ss:$20 sps:$4 sm:$0xff]  }
  0x54   :  { %5177 = vmatpush1.bf16.msra.mxu1 %v7146_v4  ;;  %v601_v4 = vrot.slane %v8350_v25, %v600_v54 }
  0x55   :  { %5178 = vmatprep.subr.bf16.mxu1 %v7154_v5 }
  0x56   :  { %4827 = vmatpush1.bf16.msra.mxu0 %v7125_v2  ;;  %v597_v2 = vrot.slane %v8350_v25, %v596_v51  ;;  %v7188_v25 = vld [vmem:[%s10370_s3 + $0x328] ss:$20 sps:$4 sm:$0xff]  }
  0x57   :  { %4828 = vmatprep.subr.bf16.mxu0 %v7133_v3 }
  0x58   :  { %5179 = vmatpush1.bf16.msra.mxu1 %v7152_v8  ;;  %v7179_v8 = vld [vmem:[%s10370_s3 + $0x2f8] ss:$20 sps:$4 sm:$0xff]  }
  0x59   :  { %5180 = vmatprep.subr.bf16.mxu1 %v7160_v16  ;;  %v7190_v16 = vld [vmem:[%s10370_s3 + $0x32c] ss:$20 sps:$4 sm:$0xff]  }
  0x5a   :  { %4829 = vmatpush1.bf16.msra.mxu0 %v7131_v6  ;;  %v575_v6 = vld [vmem:[%s10369_s2 + $0x8] sm:$0xff] }
  0x5b   :  { %4830 = vmatprep.subr.bf16.mxu0 %v7139_v7 }
  0x5c   :  { %5181 = vmatpush1.bf16.msra.mxu1 %v7158_v18 }
  0x5d   :  { %5193 = vmatprep.subr.bf16.mxu1 %v7166_v19  ;;  %v625_v19 = vrot.slane %v575_v6, %v592_v26  ;;  %v617_v26 = vrot.slane %v575_v6, %v584_v27  ;;  %v7194_v27 = vld [vmem:[%s10370_s3 + $0x350] ss:$20 sps:$4 sm:$0xff]  }
  0x5e   :  { %4831 = vmatpush1.bf16.msra.mxu0 %v7137_v9  ;;  %v7182_v9 = vld [vmem:[%s10370_s3 + $0x300] ss:$20 sps:$4 sm:$0xff]  }
  0x5f   :  { %4832 = vmatprep.subr.bf16.mxu0 %v7145_v10 }
  0x62   :  { %4833 = vmatpush1.bf16.msra.mxu0 %v7143_v11 }
  0x63   :  { %4834 = vmatprep.subr.bf16.mxu0 %v7151_v12  ;;  %v621_v12 = vrot.slane %v575_v6, %v588_v31 }
  0x66   :  { %4835 = vmatpush1.bf16.msra.mxu0 %v7149_v13  ;;  %v7187_v13 = vld [vmem:[%s10370_s3 + $0x324] ss:$20 sps:$4 sm:$0xff]  }
  0x67   :  { %4836 = vmatprep.subr.bf16.mxu0 %v7157_v17 }
  0x6a   :  { %4837 = vmatpush1.bf16.msra.mxu0 %v7155_v20 }
  0x6b   :  { %4849 = vmatprep.subr.bf16.mxu0 %v7163_v21 }
  0xe0   :  { %v264_v28 = vpop.f32.mrb[0].mxu0  ;;  %v393_v47 = vpop.f32.mrb[0].mxu1 }
  0xe1   :  { %v266_v30 = vpop.f32.mrb[1].mxu0  ;;  %vm658_vm3 = vcmp.eq.f32.partialorder %v264_v28, %v581_v14  ;;  %v395_v52 = vpop.f32.mrb[1].mxu1  ;;  %vm664_vm14 = vcmp.eq.f32.partialorder %v393_v47, %v605_v55 }
  0xe2   :  { %v268_v32 = vpop.f32.mrb[2].mxu0  ;;  %vm659_vm5 = vcmp.eq.f32.partialorder %v266_v30, %v585_v29  ;;  %v397_v62 = vpop.f32.mrb[2].mxu1  ;;  %vm665_vm1 = vcmp.eq.f32.partialorder %v395_v52, %v609_v61  ;;  %v7196_v30 = vld [vmem:[%s10370_s3 + $0x354] ss:$20 sps:$4 sm:$0xff]   ;;  %v7200_v52 = vld [vmem:[%s10370_s3 + $0x378] ss:$20 sps:$4 sm:$0xff]  }
  0xe3   :  { %vm674_vm4 = vcmp.eq.f32.partialorder %v268_v32, %v581_v14  ;;  %v270_v35 = vpop.f32.mrb[3].mxu0  ;;  %vm680_vm0 = vcmp.eq.f32.partialorder %v397_v62, %v605_v55  ;;  %v399_v3 = vpop.f32.mrb[3].mxu1  ;;  %v613_v32 = vrot.slane %v575_v6, %v580_v24  ;;  %v7191_v24 = vld [vmem:[%s10370_s3 + $0x348] ss:$20 sps:$4 sm:$0xff]   ;;  %v7208_v55 = vld [vmem:[%s10370_s3 + $0x3a4] ss:$20 sps:$4 sm:$0xff]  }
  0xe4   :  { %vm8367_vm6 = vmpackc.low %vm674_vm4, %vm658_vm3  ;;  %vm675_vm7 = vcmp.eq.f32.partialorder %v270_v35, %v585_v29  ;;  %vm681_vm3 = vcmp.eq.f32.partialorder %v399_v3, %v609_v61  ;;  %v7193_v29 = vld [vmem:[%s10370_s3 + $0x34c] ss:$20 sps:$4 sm:$0xff]  }
  0xe5   :  { %v10378_v36 = vsel %vm8367_vm6, 4294967295, %v10377_v36  ;;  %vm8371_vm8 = vmpackc.low %vm675_vm7, %vm659_vm5 }
  0xe6   :  { %v10380_v37 = vsel %vm8371_vm8, 4294967295, %v10379_v37  ;;  %6707 = vmatprep.mubr.msk.bf16.mxu0 %vm8371_vm8, %v7981_v41  ;;  %6738 = vmatprep.mubr.msk.bf16.mxu1 %vm8371_vm8, %v7981_v41  ;;  %vm8456_vm2 = vmpackc.low %vm680_vm0, %vm664_vm14 }
  0xe7   :  { %6709 = vmatmul.mubr.msk.bf16.vlgmr.msra.gmra.mrb[20].mxu0 %vm8367_vm6, %v7981_v41  ;;  %6740 = vmatmul.mubr.msk.bf16.vlgmr.msra.gmra.mrb[12].mxu1 %vm8367_vm6, %v7981_v41  ;;  %vm8463_vm4 = vmpackc.low %vm681_vm3, %vm665_vm1 }
  0xe8   :  { %4850 = vmatpush1.bf16.msra.mxu0 %v7161_v33  ;;  %5194 = vmatpush1.bf16.msra.mxu1 %v7164_v34  ;;  %v307_v46 = vpop.f32.mrb[4].mxu0  ;;  %v8508_v34 = vrot.slane %v575_v6, %v596_v51  ;;  %v7197_v51 = vld [vmem:[%s10370_s3 + $0x370] ss:$20 sps:$4 sm:$0xff]  }
  0xe9   :  { %4851 = vmatprep.subr.bf16.mxu0 %v7169_v38  ;;  %5195 = vmatprep.subr.bf16.mxu1 %v7172_v39  ;;  %vm660_vm9 = vcmp.eq.f32.partialorder %v307_v46, %v589_v40  ;;  %v309_v50 = vpop.f32.mrb[5].mxu0 }
  0xea   :  { %vm661_vm10 = vcmp.eq.f32.partialorder %v309_v50, %v593_v44  ;;  %v311_v53 = vpop.f32.mrb[6].mxu0  ;;  %v479_v11 = vpop.f32.mrb[4].mxu1 }
  0xeb   :  { %vm676_vm11 = vcmp.eq.f32.partialorder %v311_v53, %v589_v40  ;;  %v313_v57 = vpop.f32.mrb[7].mxu0  ;;  %v481_v18 = vpop.f32.mrb[5].mxu1  ;;  %v633_v40 = vrot.slane %v575_v6, %v600_v54  ;;  %v7205_v54 = vld [vmem:[%s10370_s3 + $0x39c] ss:$20 sps:$4 sm:$0xff]  }
  0xec   :  { %4852 = vmatpush1.bf16.msra.mxu0 %v7167_v42  ;;  %5196 = vmatpush1.bf16.msra.mxu1 %v7170_v43  ;;  %vm8425_vm12 = vmpackc.low %vm676_vm11, %vm660_vm9  ;;  %vm677_vm13 = vcmp.eq.f32.partialorder %v313_v57, %v593_v44  ;;  %vm668_vm9 = vcmp.eq.f32.partialorder %v479_v11, %v621_v12  ;;  %vm669_vm11 = vcmp.eq.f32.partialorder %v481_v18, %v625_v19  ;;  %v483_v28 = vpop.f32.mrb[6].mxu1  ;;  %v7199_v44 = vld [vmem:[%s10370_s3 + $0x374] ss:$20 sps:$4 sm:$0xff]   ;;  %v7982_v57 = vmov 0.0  }
  0xed   :  { %4853 = vmatprep.subr.bf16.mxu0 %v7175_v45  ;;  %5197 = vmatprep.subr.bf16.mxu1 %v7178_v49  ;;  %vm8439_vm15 = vmpackc.low %vm677_vm13, %vm661_vm10  ;;  %vm684_vm1 = vcmp.eq.f32.partialorder %v483_v28, %v621_v12  ;;  %v485_v33 = vpop.f32.mrb[7].mxu1  ;;  %v637_v43 = vrot.slane %v575_v6, %v604_v48  ;;  %v7202_v45 = vld [vmem:[%s10370_s3 + $0x37c] ss:$20 sps:$4 sm:$0xff]   ;;  %v641_v49 = vrot.slane %v575_v6, %v608_v56  ;;  %v7214_v6 = vld [vmem:[%s10370_s3 + $0x3cc] ss:$20 sps:$4 sm:$0xff]  }
  0xee   :  { %v10384_v1 = vsel %vm8439_vm15, 4294967295, %v10383_v1  ;;  %6711 = vmatprep.mubr.msk.bf16.mxu0 %vm8439_vm15, %v7981_v41  ;;  %6742 = vmatprep.mubr.msk.bf16.mxu1 %vm8439_vm15, %v7981_v41  ;;  %vm8513_vm3 = vmpackc.low %vm684_vm1, %vm668_vm9  ;;  %v7209_v11 = vld [vmem:[%s10370_s3 + $0x3c0] ss:$20 sps:$4 sm:$0xff]   ;;  %v7212_v12 = vld [vmem:[%s10370_s3 + $0x3c8] ss:$20 sps:$4 sm:$0xff]  }
  0xef   :  { %v7224_v28 = vld [vmem:[%s10370_s3 + $0x418] ss:$20 sps:$4 sm:$0xff]  }
  0xf0   :  { %4854 = vmatpush1.bf16.msra.mxu0 %v7173_v58  ;;  %5198 = vmatpush1.bf16.msra.mxu1 %v7176_v59  ;;  %v350_v10 = vpop.f32.mrb[8].mxu0 }
  0xf1   :  { %4855 = vmatprep.subr.bf16.mxu0 %v7181_v63  ;;  %5199 = vmatprep.subr.bf16.mxu1 %v7184_v0  ;;  %vm662_vm5 = vcmp.eq.f32.partialorder %v350_v10, %v597_v2  ;;  %v352_v17 = vpop.f32.mrb[9].mxu0  ;;  %v7203_v63 = vld [vmem:[%s10370_s3 + $0x398] ss:$20 sps:$4 sm:$0xff]   ;;  %v7206_v0 = vld [vmem:[%s10370_s3 + $0x3a0] ss:$20 sps:$4 sm:$0xff]  }
  0xf2   :  { %vm663_vm7 = vcmp.eq.f32.partialorder %v352_v17, %v601_v4  ;;  %v354_v20 = vpop.f32.mrb[10].mxu0  ;;  %v565_v42 = vpop.f32.mrb[8].mxu1  ;;  %v7220_v17 = vld [vmem:[%s10370_s3 + $0x3f4] ss:$20 sps:$4 sm:$0xff]  }
  0xf3   :  { %vm678_vm10 = vcmp.eq.f32.partialorder %v354_v20, %v597_v2  ;;  %v356_v21 = vpop.f32.mrb[11].mxu0  ;;  %v567_v47 = vpop.f32.mrb[9].mxu1  ;;  %v7218_v20 = vld [vmem:[%s10370_s3 + $0x3f0] ss:$20 sps:$4 sm:$0xff]  }
  0xf4   :  { %4856 = vmatpush1.bf16.msra.mxu0 %v7179_v8  ;;  %5200 = vmatpush1.bf16.msra.mxu1 %v7182_v9  ;;  %vm8489_vm13 = vmpackc.low %vm678_vm10, %vm662_vm5  ;;  %vm679_vm14 = vcmp.eq.f32.partialorder %v356_v21, %v601_v4  ;;  %vm685_vm5 = vcmp.eq.f32.partialorder %v485_v33, %v625_v19  ;;  %vm673_vm1 = vcmp.eq.f32.partialorder %v567_v47, %v641_v49  ;;  %v569_v23 = vpop.f32.mrb[10].mxu1  ;;  %v7211_v4 = vld [vmem:[%s10370_s3 + $0x3c4] ss:$20 sps:$4 sm:$0xff]   ;;  %v7215_v19 = vld [vmem:[%s10370_s3 + $0x3e8] ss:$20 sps:$4 sm:$0xff]  }
  0xf5   :  { %4857 = vmatprep.subr.bf16.mxu0 %v7187_v13  ;;  %5201 = vmatprep.subr.bf16.mxu1 %v7190_v16  ;;  %vm8500_vm0 = vmpackc.low %vm679_vm14, %vm663_vm7  ;;  %v6059_v58 = vsel %vm673_vm1, 1.0, %v7982_v57  ;;  %v571_v59 = vpop.f32.mrb[11].mxu1  ;;  %v7217_v16 = vld [vmem:[%s10370_s3 + $0x3ec] ss:$20 sps:$4 sm:$0xff]   ;;  %v7223_v21 = vld [vmem:[%s10370_s3 + $0x414] ss:$20 sps:$4 sm:$0xff]  }
  0xf6   :  { %vm8518_vm7 = vmpackc.low %vm685_vm5, %vm669_vm11  ;;  %vm689_vm8 = vcmp.eq.f32.partialorder %v571_v59, %v641_v49  ;;  %v7230_v33 = vld [vmem:[%s10370_s3 + $0x440] ss:$20 sps:$4 sm:$0xff]   ;;  %v7248_v47 = vld [vmem:[%s10370_s3 + $0x4b8] ss:$20 sps:$4 sm:$0xff]  }
  0xf7   :  { %v6075_v62 = vsel %vm689_vm8, 1.0, %v7982_v57  ;;  %v7253_v49 = vld [vmem:[%s10370_s3 + $0x4dc] ss:$20 sps:$4 sm:$0xff]   ;;  %v7265_v57 = vld [vmem:[%s10370_s3 + $0x52c] ss:$20 sps:$4 sm:$0xff]  }
  0xf8   :  { %4858 = vmatpush1.bf16.msra.mxu0 %v7185_v22  ;;  %5202 = vmatpush1.bf16.msra.mxu1 %v7188_v25  ;;  %v436_v39 = vpop.f32.mrb[12].mxu0  ;;  %v8572_v3 = vpack.c.bf16 %v6075_v62, %v6059_v58  ;;  %v7226_v22 = vld [vmem:[%s10370_s3 + $0x41c] ss:$20 sps:$4 sm:$0xff]   ;;  %v7268_v58 = vld [vmem:[%s10370_s3 + $0x534] ss:$20 sps:$4 sm:$0xff]  }
  0xf9   :  { %4859 = vmatprep.subr.bf16.mxu0 %v7193_v29  ;;  %5203 = vmatprep.subr.bf16.mxu1 %v7196_v30  ;;  %vm666_vm9 = vcmp.eq.f32.partialorder %v436_v39, %v613_v32  ;;  %v438_v46 = vpop.f32.mrb[13].mxu0  ;;  %v7221_v25 = vld [vmem:[%s10370_s3 + $0x410] ss:$20 sps:$4 sm:$0xff]   ;;  %v7241_v39 = vld [vmem:[%s10370_s3 + $0x48c] ss:$20 sps:$4 sm:$0xff]  }
  0xfa   :  { %v440_v50 = vpop.f32.mrb[14].mxu0  ;;  %vm10399_vm11 = vcmp.eq.f32.partialorder %v438_v46, %v617_v26  ;;  %v7229_v29 = vld [vmem:[%s10370_s3 + $0x43c] ss:$20 sps:$4 sm:$0xff]   ;;  %v7232_v30 = vld [vmem:[%s10370_s3 + $0x444] ss:$20 sps:$4 sm:$0xff]  }
  0xfb   :  { %vm682_vm14 = vcmp.eq.f32.partialorder %v440_v50, %v613_v32  ;;  %v442_v48 = vpop.f32.mrb[15].mxu0  ;;  %v7227_v32 = vld [vmem:[%s10370_s3 + $0x438] ss:$20 sps:$4 sm:$0xff]   ;;  %v7245_v46 = vld [vmem:[%s10370_s3 + $0x4b0] ss:$20 sps:$4 sm:$0xff]  }
  0xfc   :  { %4860 = vmatpush1.bf16.msra.mxu0 %v7191_v24  ;;  %5204 = vmatpush1.bf16.msra.mxu1 %v7194_v27  ;;  %vm8546_vm5 = vmpackc.low %vm682_vm14, %vm666_vm9  ;;  %vm683_vm10 = vcmp.eq.f32.partialorder %v442_v48, %v617_v26  ;;  %vm688_vm9 = vcmp.eq.f32.partialorder %v569_v23, %v637_v43  ;;  %vm10402_vm14 = vcmp.eq.f32.partialorder %v565_v42, %v637_v43  ;;  %v7238_v26 = vld [vmem:[%s10370_s3 + $0x46c] ss:$20 sps:$4 sm:$0xff]   ;;  %v7236_v27 = vld [vmem:[%s10370_s3 + $0x468] ss:$20 sps:$4 sm:$0xff]  }
  0xfd   :  { %4861 = vmatprep.subr.bf16.mxu0 %v7199_v44  ;;  %5205 = vmatprep.subr.bf16.mxu1 %v7202_v45  ;;  %vm8557_vm6 = vmpackc.low %vm683_vm10, %vm10399_vm11  ;;  %v7233_v24 = vld [vmem:[%s10370_s3 + $0x460] ss:$20 sps:$4 sm:$0xff]   ;;  %v7239_v42 = vld [vmem:[%s10370_s3 + $0x488] ss:$20 sps:$4 sm:$0xff]  }
  0xfe   :  { %vm8562_vm15 = vmpackc.low %vm688_vm9, %vm10402_vm14  ;;  %v7242_v43 = vld [vmem:[%s10370_s3 + $0x490] ss:$20 sps:$4 sm:$0xff]   ;;  %v7247_v44 = vld [vmem:[%s10370_s3 + $0x4b4] ss:$20 sps:$4 sm:$0xff]  }
  0xff   :  { %v7250_v45 = vld [vmem:[%s10370_s3 + $0x4bc] ss:$20 sps:$4 sm:$0xff]   ;;  %v7256_v50 = vld [vmem:[%s10370_s3 + $0x4e4] ss:$20 sps:$4 sm:$0xff]   ;;  %v7262_v23 = vld [vmem:[%s10370_s3 + $0x50c] ss:$20 sps:$4 sm:$0xff]  }
 0x100   :  { %4862 = vmatpush1.bf16.msra.mxu0 %v7197_v51  ;;  %5206 = vmatpush1.bf16.msra.mxu1 %v7200_v52  ;;  %v522_v2 = vpop.f32.mrb[16].mxu0  ;;  %v7251_v48 = vld [vmem:[%s10370_s3 + $0x4d8] ss:$20 sps:$4 sm:$0xff]   ;;  %v7254_v51 = vld [vmem:[%s10370_s3 + $0x4e0] ss:$20 sps:$4 sm:$0xff]  }
 0x101   :  { %4863 = vmatprep.subr.bf16.mxu0 %v7205_v54  ;;  %5207 = vmatprep.subr.bf16.mxu1 %v7208_v55  ;;  %vm670_vm8 = vcmp.eq.f32.partialorder %v522_v2, %v8508_v34  ;;  %v524_v8 = vpop.f32.mrb[17].mxu0  ;;  %v7259_v52 = vld [vmem:[%s10370_s3 + $0x504] ss:$20 sps:$4 sm:$0xff]   ;;  %v7257_v54 = vld [vmem:[%s10370_s3 + $0x500] ss:$20 sps:$4 sm:$0xff]  }
 0x102   :  { %vm671_vm10 = vcmp.eq.f32.partialorder %v524_v8, %v633_v40  ;;  %v526_v9 = vpop.f32.mrb[18].mxu0  ;;  %v7260_v55 = vld [vmem:[%s10370_s3 + $0x508] ss:$20 sps:$4 sm:$0xff]   ;;  %v7266_v62 = vld [vmem:[%s10370_s3 + $0x530] ss:$20 sps:$4 sm:$0xff]  }
 0x103   :  { %vm686_vm11 = vcmp.eq.f32.partialorder %v526_v9, %v8508_v34  ;;  %v528_v10 = vpop.f32.mrb[19].mxu0  ;;  %v7235_v34 = vld [vmem:[%s10370_s3 + $0x464] ss:$20 sps:$4 sm:$0xff]   ;;  %v7263_v59 = vld [vmem:[%s10370_s3 + $0x528] ss:$20 sps:$4 sm:$0xff]  }
 0x104   :  { %4864 = vmatpush1.bf16.msra.mxu0 %v7203_v63  ;;  %5208 = vmatpush1.bf16.msra.mxu1 %v7206_v0  ;;  %vm8588_vm1 = vmpackc.low %vm686_vm11, %vm670_vm8  ;;  %vm687_vm9 = vcmp.eq.f32.partialorder %v528_v10, %v633_v40  ;;  %v7244_v40 = vld [vmem:[%s10370_s3 + $0x494] ss:$20 sps:$4 sm:$0xff]   ;;  %v7274_v0 = vld [vmem:[%s10370_s3 + $0x55c] ss:$20 sps:$4 sm:$0xff]  }
 0x105   :  { %4865 = vmatprep.subr.bf16.mxu0 %v7211_v4  ;;  %5209 = vmatprep.subr.bf16.mxu1 %v7214_v6  ;;  %vm8598_vm14 = vmpackc.low %vm687_vm9, %vm671_vm10  ;;  %v7271_v63 = vld [vmem:[%s10370_s3 + $0x554] ss:$20 sps:$4 sm:$0xff]   ;;  %v7269_v2 = vld [vmem:[%s10370_s3 + $0x550] ss:$20 sps:$4 sm:$0xff]  }
 0x106   :  { %v7272_v4 = vld [vmem:[%s10370_s3 + $0x558] ss:$20 sps:$4 sm:$0xff]   ;;  %v7277_v6 = vld [vmem:[%s10370_s3 + $0x57c] ss:$20 sps:$4 sm:$0xff]   ;;  %v7278_v10 = vld [vmem:[%s10370_s3 + $0x580] ss:$20 sps:$4 sm:$0xff]  }
 0x107   :  { %v7280_v8 = vld [vmem:[%s10370_s3 + $0x584] ss:$20 sps:$4 sm:$0xff]  }
 0x108   :  { %4866 = vmatpush1.bf16.msra.mxu0 %v7209_v11  ;;  %5210 = vmatpush1.bf16.msra.mxu1 %v7212_v12  ;;  %v7275_v9 = vld [vmem:[%s10370_s3 + $0x578] ss:$20 sps:$4 sm:$0xff]  }
 0x109   :  { %4867 = vmatprep.subr.bf16.mxu0 %v7217_v16  ;;  %5211 = vmatprep.subr.bf16.mxu1 %v7220_v17  ;;  %v7283_v11 = vld [vmem:[%s10370_s3 + $0x5a4] ss:$20 sps:$4 sm:$0xff]   ;;  %v7286_v12 = vld [vmem:[%s10370_s3 + $0x5ac] ss:$20 sps:$4 sm:$0xff]   ;;  %v7284_v17 = vld [vmem:[%s10370_s3 + $0x5a8] ss:$20 sps:$4 sm:$0xff]  }
 0x10a   :  { %v7281_v16 = vld [vmem:[%s10370_s3 + $0x5a0] ss:$20 sps:$4 sm:$0xff]  }
 0x10c   :  { %4868 = vmatpush1.bf16.msra.mxu0 %v7215_v19  ;;  %5212 = vmatpush1.bf16.msra.mxu1 %v7218_v20  ;;  %v7289_v19 = vld [vmem:[%s10370_s3 + $0x5cc] ss:$20 sps:$4 sm:$0xff]   ;;  %v7292_v20 = vld [vmem:[%s10370_s3 + $0x5d4] ss:$20 sps:$4 sm:$0xff]  }
 0x10d   :  { %4869 = vmatprep.subr.bf16.mxu0 %v7223_v21  ;;  %5213 = vmatprep.subr.bf16.mxu1 %v7226_v22  ;;  %v7287_v21 = vld [vmem:[%s10370_s3 + $0x5c8] ss:$20 sps:$4 sm:$0xff]   ;;  %v7290_v22 = vld [vmem:[%s10370_s3 + $0x5d0] ss:$20 sps:$4 sm:$0xff]  }
 0x110   :  { %4870 = vmatpush1.bf16.msra.mxu0 %v7221_v25  ;;  %5214 = vmatpush1.bf16.msra.mxu1 %v7224_v28  ;;  %v7295_v25 = vld [vmem:[%s10370_s3 + $0x5f4] ss:$20 sps:$4 sm:$0xff]   ;;  %v7298_v28 = vld [vmem:[%s10370_s3 + $0x5fc] ss:$20 sps:$4 sm:$0xff]  }
 0x111   :  { %4871 = vmatprep.subr.bf16.mxu0 %v7229_v29  ;;  %5215 = vmatprep.subr.bf16.mxu1 %v7232_v30  ;;  %v7293_v29 = vld [vmem:[%s10370_s3 + $0x5f0] ss:$20 sps:$4 sm:$0xff]   ;;  %v7296_v30 = vld [vmem:[%s10370_s3 + $0x5f8] ss:$20 sps:$4 sm:$0xff]  }
 0x114   :  { %4872 = vmatpush1.bf16.msra.mxu0 %v7227_v32  ;;  %5216 = vmatpush1.bf16.msra.mxu1 %v7230_v33  ;;  %v7301_v32 = vld [vmem:[%s10370_s3 + $0x61c] ss:$20 sps:$4 sm:$0xff]   ;;  %v7304_v33 = vld [vmem:[%s10370_s3 + $0x624] ss:$20 sps:$4 sm:$0xff]  }
 0x115   :  { %4873 = vmatprep.subr.bf16.mxu0 %v7235_v34  ;;  %5217 = vmatprep.subr.bf16.mxu1 %v7238_v26  ;;  %v7299_v34 = vld [vmem:[%s10370_s3 + $0x618] ss:$20 sps:$4 sm:$0xff]   ;;  %v7302_v26 = vld [vmem:[%s10370_s3 + $0x620] ss:$20 sps:$4 sm:$0xff]  }
 0x118   :  { %4874 = vmatpush1.bf16.msra.mxu0 %v7233_v24  ;;  %5218 = vmatpush1.bf16.msra.mxu1 %v7236_v27  ;;  %v7307_v24 = vld [vmem:[%s10370_s3 + $0x644] ss:$20 sps:$4 sm:$0xff]   ;;  %v7310_v27 = vld [vmem:[%s10370_s3 + $0x64c] ss:$20 sps:$4 sm:$0xff]  }
 0x119   :  { %4875 = vmatprep.subr.bf16.mxu0 %v7241_v39  ;;  %5219 = vmatprep.subr.bf16.mxu1 %v7244_v40  ;;  %v7305_v39 = vld [vmem:[%s10370_s3 + $0x640] ss:$20 sps:$4 sm:$0xff]   ;;  %v7308_v40 = vld [vmem:[%s10370_s3 + $0x648] ss:$20 sps:$4 sm:$0xff]  }
 0x11c   :  { %4876 = vmatpush1.bf16.msra.mxu0 %v7239_v42  ;;  %5220 = vmatpush1.bf16.msra.mxu1 %v7242_v43  ;;  %v7313_v42 = vld [vmem:[%s10370_s3 + $0x66c] ss:$20 sps:$4 sm:$0xff]   ;;  %v7316_v43 = vld [vmem:[%s10370_s3 + $0x674] ss:$20 sps:$4 sm:$0xff]  }
 0x11d   :  { %4877 = vmatprep.subr.bf16.mxu0 %v7247_v44  ;;  %5221 = vmatprep.subr.bf16.mxu1 %v7250_v45  ;;  %v7311_v44 = vld [vmem:[%s10370_s3 + $0x668] ss:$20 sps:$4 sm:$0xff]   ;;  %v7314_v45 = vld [vmem:[%s10370_s3 + $0x670] ss:$20 sps:$4 sm:$0xff]  }
 0x120   :  { %4878 = vmatpush1.bf16.msra.mxu0 %v7245_v46  ;;  %5222 = vmatpush1.bf16.msra.mxu1 %v7248_v47  ;;  %v7319_v46 = vld [vmem:[%s10370_s3 + $0x694] ss:$20 sps:$4 sm:$0xff]   ;;  %v7322_v47 = vld [vmem:[%s10370_s3 + $0x69c] ss:$20 sps:$4 sm:$0xff]  }
 0x121   :  { %4879 = vmatprep.subr.bf16.mxu0 %v7253_v49  ;;  %5223 = vmatprep.subr.bf16.mxu1 %v7256_v50  ;;  %v7317_v49 = vld [vmem:[%s10370_s3 + $0x690] ss:$20 sps:$4 sm:$0xff]   ;;  %v7320_v50 = vld [vmem:[%s10370_s3 + $0x698] ss:$20 sps:$4 sm:$0xff]  }
 0x124   :  { %4880 = vmatpush1.bf16.msra.mxu0 %v7251_v48  ;;  %5224 = vmatpush1.bf16.msra.mxu1 %v7254_v51  ;;  %v7325_v48 = vld [vmem:[%s10370_s3 + $0x6bc] ss:$20 sps:$4 sm:$0xff]   ;;  %v7328_v51 = vld [vmem:[%s10370_s3 + $0x6c4] ss:$20 sps:$4 sm:$0xff]  }
 0x125   :  { %4892 = vmatprep.subr.bf16.mxu0 %v7259_v52  ;;  %5236 = vmatprep.subr.bf16.mxu1 %v7262_v23  ;;  %v7323_v52 = vld [vmem:[%s10370_s3 + $0x6b8] ss:$20 sps:$4 sm:$0xff]   ;;  %v7326_v23 = vld [vmem:[%s10370_s3 + $0x6c0] ss:$20 sps:$4 sm:$0xff]  }
 0x127   :  { %6713 = vmatmul.mubr.msk.bf16.vlgmr.msra.gmra.mrb[20].mxu0 %vm8425_vm12, %v7981_v41  ;;  %6744 = vmatmul.mubr.msk.bf16.vlgmr.msra.gmra.mrb[12].mxu1 %vm8425_vm12, %v7981_v41 }
 0x128   :  { %4893 = vmatpush1.bf16.msra.mxu0 %v7257_v54  ;;  %5237 = vmatpush1.bf16.msra.mxu1 %v7260_v55  ;;  %v7331_v54 = vld [vmem:[%s10370_s3 + $0x6e4] ss:$20 sps:$4 sm:$0xff]   ;;  %v7334_v55 = vld [vmem:[%s10370_s3 + $0x6ec] ss:$20 sps:$4 sm:$0xff]  }
 0x129   :  { %4894 = vmatprep.subr.bf16.mxu0 %v7265_v57  ;;  %5238 = vmatprep.subr.bf16.mxu1 %v7268_v58  ;;  %v7329_v57 = vld [vmem:[%s10370_s3 + $0x6e0] ss:$20 sps:$4 sm:$0xff]   ;;  %v7332_v58 = vld [vmem:[%s10370_s3 + $0x6e8] ss:$20 sps:$4 sm:$0xff]  }
 0x12a   :  { %6715 = vmatprep.mubr.msk.bf16.mxu0 %vm8500_vm0, %v7981_v41  ;;  %6746 = vmatprep.mubr.msk.bf16.mxu1 %vm8500_vm0, %v7981_v41 }
 0x12c   :  { %4895 = vmatpush1.bf16.msra.mxu0 %v7263_v59  ;;  %5239 = vmatpush1.bf16.msra.mxu1 %v7266_v62  ;;  %v7337_v59 = vld [vmem:[%s10370_s3 + $0x70c] ss:$20 sps:$4 sm:$0xff]   ;;  %v7340_v62 = vld [vmem:[%s10370_s3 + $0x714] ss:$20 sps:$4 sm:$0xff]  }
 0x12d   :  { %4896 = vmatprep.subr.bf16.mxu0 %v7271_v63  ;;  %5240 = vmatprep.subr.bf16.mxu1 %v7274_v0  ;;  %v7335_v63 = vld [vmem:[%s10370_s3 + $0x708] ss:$20 sps:$4 sm:$0xff]   ;;  %v7338_v0 = vld [vmem:[%s10370_s3 + $0x710] ss:$20 sps:$4 sm:$0xff]  }
 0x130   :  { %4897 = vmatpush1.bf16.msra.mxu0 %v7269_v2  ;;  %5241 = vmatpush1.bf16.msra.mxu1 %v7272_v4  ;;  %v7343_v2 = vld [vmem:[%s10370_s3 + $0x734] ss:$20 sps:$4 sm:$0xff]   ;;  %v7346_v4 = vld [vmem:[%s10370_s3 + $0x73c] ss:$20 sps:$4 sm:$0xff]  }
 0x131   :  { %4898 = vmatprep.subr.bf16.mxu0 %v7277_v6  ;;  %5242 = vmatprep.subr.bf16.mxu1 %v7280_v8  ;;  %v7341_v6 = vld [vmem:[%s10370_s3 + $0x730] ss:$20 sps:$4 sm:$0xff]   ;;  %v7344_v8 = vld [vmem:[%s10370_s3 + $0x738] ss:$20 sps:$4 sm:$0xff]  }
 0x134   :  { %4899 = vmatpush1.bf16.msra.mxu0 %v7275_v9  ;;  %5243 = vmatpush1.bf16.msra.mxu1 %v7278_v10  ;;  %v7349_v9 = vld [vmem:[%s10370_s3 + $0x75c] ss:$20 sps:$4 sm:$0xff]   ;;  %v7352_v10 = vld [vmem:[%s10370_s3 + $0x764] ss:$20 sps:$4 sm:$0xff]  }
 0x135   :  { %4900 = vmatprep.subr.bf16.mxu0 %v7283_v11  ;;  %5244 = vmatprep.subr.bf16.mxu1 %v7286_v12  ;;  %v7347_v11 = vld [vmem:[%s10370_s3 + $0x758] ss:$20 sps:$4 sm:$0xff]   ;;  %v7350_v12 = vld [vmem:[%s10370_s3 + $0x760] ss:$20 sps:$4 sm:$0xff]  }
 0x138   :  { %4901 = vmatpush1.bf16.msra.mxu0 %v7281_v16  ;;  %5245 = vmatpush1.bf16.msra.mxu1 %v7284_v17  ;;  %v7355_v16 = vld [vmem:[%s10370_s3 + $0x784] ss:$20 sps:$4 sm:$0xff]   ;;  %v7358_v17 = vld [vmem:[%s10370_s3 + $0x78c] ss:$20 sps:$4 sm:$0xff]  }
 0x139   :  { %4902 = vmatprep.subr.bf16.mxu0 %v7289_v19  ;;  %5246 = vmatprep.subr.bf16.mxu1 %v7292_v20  ;;  %v7353_v19 = vld [vmem:[%s10370_s3 + $0x780] ss:$20 sps:$4 sm:$0xff]   ;;  %v7356_v20 = vld [vmem:[%s10370_s3 + $0x788] ss:$20 sps:$4 sm:$0xff]  }
 0x13c   :  { %4903 = vmatpush1.bf16.msra.mxu0 %v7287_v21  ;;  %5247 = vmatpush1.bf16.msra.mxu1 %v7290_v22  ;;  %v7361_v21 = vld [vmem:[%s10370_s3 + $0x7ac] ss:$20 sps:$4 sm:$0xff]   ;;  %v7364_v22 = vld [vmem:[%s10370_s3 + $0x7b4] ss:$20 sps:$4 sm:$0xff]  }
 0x13d   :  { %4904 = vmatprep.subr.bf16.mxu0 %v7295_v25  ;;  %5248 = vmatprep.subr.bf16.mxu1 %v7298_v28  ;;  %v7359_v25 = vld [vmem:[%s10370_s3 + $0x7a8] ss:$20 sps:$4 sm:$0xff]   ;;  %v7362_v28 = vld [vmem:[%s10370_s3 + $0x7b0] ss:$20 sps:$4 sm:$0xff]  }
 0x140   :  { %4905 = vmatpush1.bf16.msra.mxu0 %v7293_v29  ;;  %5249 = vmatpush1.bf16.msra.mxu1 %v7296_v30  ;;  %v7367_v29 = vld [vmem:[%s10370_s3 + $0x7d4] ss:$20 sps:$4 sm:$0xff]   ;;  %v7370_v30 = vld [vmem:[%s10370_s3 + $0x7dc] ss:$20 sps:$4 sm:$0xff]  }
 0x141   :  { %4906 = vmatprep.subr.bf16.mxu0 %v7301_v32  ;;  %5250 = vmatprep.subr.bf16.mxu1 %v7304_v33  ;;  %v7365_v32 = vld [vmem:[%s10370_s3 + $0x7d0] ss:$20 sps:$4 sm:$0xff]   ;;  %v7368_v33 = vld [vmem:[%s10370_s3 + $0x7d8] ss:$20 sps:$4 sm:$0xff]  }
 0x144   :  { %4907 = vmatpush1.bf16.msra.mxu0 %v7299_v34  ;;  %5251 = vmatpush1.bf16.msra.mxu1 %v7302_v26  ;;  %v7373_v34 = vld [vmem:[%s10370_s3 + $0x7fc] ss:$20 sps:$4 sm:$0xff]   ;;  %v7376_v26 = vld [vmem:[%s10370_s3 + $0x804] ss:$20 sps:$4 sm:$0xff]  }
 0x145   :  { %4908 = vmatprep.subr.bf16.mxu0 %v7307_v24  ;;  %5252 = vmatprep.subr.bf16.mxu1 %v7310_v27  ;;  %v7371_v24 = vld [vmem:[%s10370_s3 + $0x7f8] ss:$20 sps:$4 sm:$0xff]   ;;  %v7374_v27 = vld [vmem:[%s10370_s3 + $0x800] ss:$20 sps:$4 sm:$0xff]  }
 0x148   :  { %4909 = vmatpush1.bf16.msra.mxu0 %v7305_v39  ;;  %5253 = vmatpush1.bf16.msra.mxu1 %v7308_v40  ;;  %v7379_v39 = vld [vmem:[%s10370_s3 + $0x824] ss:$20 sps:$4 sm:$0xff]   ;;  %v7382_v40 = vld [vmem:[%s10370_s3 + $0x82c] ss:$20 sps:$4 sm:$0xff]  }
 0x149   :  { %4910 = vmatprep.subr.bf16.mxu0 %v7313_v42  ;;  %5254 = vmatprep.subr.bf16.mxu1 %v7316_v43  ;;  %v7377_v42 = vld [vmem:[%s10370_s3 + $0x820] ss:$20 sps:$4 sm:$0xff]   ;;  %v7380_v43 = vld [vmem:[%s10370_s3 + $0x828] ss:$20 sps:$4 sm:$0xff]  }
 0x14c   :  { %4911 = vmatpush1.bf16.msra.mxu0 %v7311_v44  ;;  %5255 = vmatpush1.bf16.msra.mxu1 %v7314_v45  ;;  %v7385_v44 = vld [vmem:[%s10370_s3 + $0x84c] ss:$20 sps:$4 sm:$0xff]   ;;  %v7388_v45 = vld [vmem:[%s10370_s3 + $0x854] ss:$20 sps:$4 sm:$0xff]  }
 0x14d   :  { %4912 = vmatprep.subr.bf16.mxu0 %v7319_v46  ;;  %5256 = vmatprep.subr.bf16.mxu1 %v7322_v47  ;;  %v7383_v46 = vld [vmem:[%s10370_s3 + $0x848] ss:$20 sps:$4 sm:$0xff]   ;;  %v7386_v47 = vld [vmem:[%s10370_s3 + $0x850] ss:$20 sps:$4 sm:$0xff]  }
 0x150   :  { %4913 = vmatpush1.bf16.msra.mxu0 %v7317_v49  ;;  %5257 = vmatpush1.bf16.msra.mxu1 %v7320_v50  ;;  %v7391_v49 = vld [vmem:[%s10370_s3 + $0x874] ss:$20 sps:$4 sm:$0xff]   ;;  %v7394_v50 = vld [vmem:[%s10370_s3 + $0x87c] ss:$20 sps:$4 sm:$0xff]  }
 0x151   :  { %4914 = vmatprep.subr.bf16.mxu0 %v7325_v48  ;;  %5258 = vmatprep.subr.bf16.mxu1 %v7328_v51  ;;  %v7389_v48 = vld [vmem:[%s10370_s3 + $0x870] ss:$20 sps:$4 sm:$0xff]   ;;  %v7392_v51 = vld [vmem:[%s10370_s3 + $0x878] ss:$20 sps:$4 sm:$0xff]  }
 0x154   :  { %4915 = vmatpush1.bf16.msra.mxu0 %v7323_v52  ;;  %5259 = vmatpush1.bf16.msra.mxu1 %v7326_v23  ;;  %v7397_v52 = vld [vmem:[%s10370_s3 + $0x89c] ss:$20 sps:$4 sm:$0xff]   ;;  %v7400_v23 = vld [vmem:[%s10370_s3 + $0x8a4] ss:$20 sps:$4 sm:$0xff]  }
 0x155   :  { %4916 = vmatprep.subr.bf16.mxu0 %v7331_v54  ;;  %5260 = vmatprep.subr.bf16.mxu1 %v7334_v55  ;;  %v7395_v54 = vld [vmem:[%s10370_s3 + $0x898] ss:$20 sps:$4 sm:$0xff]   ;;  %v7398_v55 = vld [vmem:[%s10370_s3 + $0x8a0] ss:$20 sps:$4 sm:$0xff]  }
 0x158   :  { %4917 = vmatpush1.bf16.msra.mxu0 %v7329_v57  ;;  %5261 = vmatpush1.bf16.msra.mxu1 %v7332_v58  ;;  %v7403_v57 = vld [vmem:[%s10370_s3 + $0x8c4] ss:$20 sps:$4 sm:$0xff]   ;;  %v7406_v58 = vld [vmem:[%s10370_s3 + $0x8cc] ss:$20 sps:$4 sm:$0xff]  }
 0x159   :  { %4918 = vmatprep.subr.bf16.mxu0 %v7337_v59  ;;  %5262 = vmatprep.subr.bf16.mxu1 %v7340_v62  ;;  %v7401_v59 = vld [vmem:[%s10370_s3 + $0x8c0] ss:$20 sps:$4 sm:$0xff]   ;;  %v7404_v62 = vld [vmem:[%s10370_s3 + $0x8c8] ss:$20 sps:$4 sm:$0xff]  }
 0x15c   :  { %4919 = vmatpush1.bf16.msra.mxu0 %v7335_v63  ;;  %5263 = vmatpush1.bf16.msra.mxu1 %v7338_v0 }
 0x15d   :  { %4920 = vmatprep.subr.bf16.mxu0 %v7343_v2  ;;  %5264 = vmatprep.subr.bf16.mxu1 %v7346_v4 }
 0x160   :  { %4921 = vmatpush1.bf16.msra.mxu0 %v7341_v6  ;;  %5265 = vmatpush1.bf16.msra.mxu1 %v7344_v8 }
 0x161   :  { %4922 = vmatprep.subr.bf16.mxu0 %v7349_v9  ;;  %5266 = vmatprep.subr.bf16.mxu1 %v7352_v10 }
 0x164   :  { %4923 = vmatpush1.bf16.msra.mxu0 %v7347_v11  ;;  %5267 = vmatpush1.bf16.msra.mxu1 %v7350_v12 }
 0x165   :  { %4935 = vmatprep.subr.bf16.mxu0 %v7355_v16  ;;  %5279 = vmatprep.subr.bf16.mxu1 %v7358_v17 }
 0x167   :  { %6717 = vmatmul.mubr.msk.bf16.vlgmr.msra.gmra.mrb[20].mxu0 %vm8489_vm13, %v7981_v41  ;;  %6748 = vmatmul.mubr.msk.bf16.vlgmr.msra.gmra.mrb[12].mxu1 %vm8489_vm13, %v7981_v41 }
 0x168   :  { %4936 = vmatpush1.bf16.msra.mxu0 %v7353_v19  ;;  %5280 = vmatpush1.bf16.msra.mxu1 %v7356_v20 }
 0x169   :  { %4937 = vmatprep.subr.bf16.mxu0 %v7361_v21  ;;  %5281 = vmatprep.subr.bf16.mxu1 %v7364_v22 }
 0x16a   :  { %6719 = vmatprep.mubr.msk.bf16.mxu0 %vm8463_vm4, %v7981_v41  ;;  %6750 = vmatprep.mubr.msk.bf16.mxu1 %vm8463_vm4, %v7981_v41 }
 0x16c   :  { %4938 = vmatpush1.bf16.msra.mxu0 %v7359_v25  ;;  %5282 = vmatpush1.bf16.msra.mxu1 %v7362_v28 }
 0x16d   :  { %4939 = vmatprep.subr.bf16.mxu0 %v7367_v29  ;;  %5283 = vmatprep.subr.bf16.mxu1 %v7370_v30 }
 0x170   :  { %4940 = vmatpush1.bf16.msra.mxu0 %v7365_v32  ;;  %5284 = vmatpush1.bf16.msra.mxu1 %v7368_v33 }
 0x171   :  { %4941 = vmatprep.subr.bf16.mxu0 %v7373_v34  ;;  %5285 = vmatprep.subr.bf16.mxu1 %v7376_v26 }
 0x174   :  { %4942 = vmatpush1.bf16.msra.mxu0 %v7371_v24  ;;  %5286 = vmatpush1.bf16.msra.mxu1 %v7374_v27 }
 0x175   :  { %4943 = vmatprep.subr.bf16.mxu0 %v7379_v39  ;;  %5287 = vmatprep.subr.bf16.mxu1 %v7382_v40 }
 0x178   :  { %4944 = vmatpush1.bf16.msra.mxu0 %v7377_v42  ;;  %5288 = vmatpush1.bf16.msra.mxu1 %v7380_v43 }
 0x179   :  { %4945 = vmatprep.subr.bf16.mxu0 %v7385_v44  ;;  %5289 = vmatprep.subr.bf16.mxu1 %v7388_v45 }
 0x17c   :  { %4946 = vmatpush1.bf16.msra.mxu0 %v7383_v46  ;;  %5290 = vmatpush1.bf16.msra.mxu1 %v7386_v47 }
 0x17d   :  { %4947 = vmatprep.subr.bf16.mxu0 %v7391_v49  ;;  %5291 = vmatprep.subr.bf16.mxu1 %v7394_v50 }
 0x180   :  { %4948 = vmatpush1.bf16.msra.mxu0 %v7389_v48  ;;  %5292 = vmatpush1.bf16.msra.mxu1 %v7392_v51 }
 0x181   :  { %4949 = vmatprep.subr.bf16.mxu0 %v7397_v52  ;;  %5293 = vmatprep.subr.bf16.mxu1 %v7400_v23 }
 0x184   :  { %4950 = vmatpush1.bf16.msra.mxu0 %v7395_v54  ;;  %5294 = vmatpush1.bf16.msra.mxu1 %v7398_v55 }
 0x185   :  { %11 = vsyncpa [#allocation3], 0  ;;  %4951 = vmatprep.subr.bf16.mxu0 %v7403_v57  ;;  %5295 = vmatprep.subr.bf16.mxu1 %v7406_v58  ;;  %v7409_v63 = vld [vmem:[%s10370_s3 + $0x8ec] ss:$20 sps:$4 sm:$0xff]   ;;  %v7412_v0 = vld [vmem:[%s10370_s3 + $0x8f4] ss:$20 sps:$4 sm:$0xff]   ;;  %vm10409_vm10 = vnez %v10380_v37  ;;  %vm10410_vm11 = vnez %v10384_v1  ;;  %vm10411_vm9 = vnez %v10378_v36 }
 0x186   :  { %v7407_v2 = vld [vmem:[%s10370_s3 + $0x8e8] ss:$20 sps:$4 sm:$0xff]   ;;  %v7410_v4 = vld [vmem:[%s10370_s3 + $0x8f0] ss:$20 sps:$4 sm:$0xff]   ;;  %v7416_v10 = vld [vmem:[%s10370_s3 + $0x918] ss:$20 sps:$4 sm:$0xff]  }
 0x187   :  { %v7415_v6 = vld [vmem:[%s10370_s3 + $0x914] ss:$20 sps:$4 sm:$0xff]   ;;  %v7418_v8 = vld [vmem:[%s10370_s3 + $0x91c] ss:$20 sps:$4 sm:$0xff]   ;;  %v7424_v12 = vld [vmem:[%s10370_s3 + $0x944] ss:$20 sps:$4 sm:$0xff]  }
 0x188   :  { %4952 = vmatpush1.bf16.msra.mxu0 %v7401_v59  ;;  %5296 = vmatpush1.bf16.msra.mxu1 %v7404_v62  ;;  %v7413_v9 = vld [vmem:[%s10370_s3 + $0x910] ss:$20 sps:$4 sm:$0xff]   ;;  %v7419_v16 = vld [vmem:[%s10370_s3 + $0x938] ss:$20 sps:$4 sm:$0xff]   ;;  %v7422_v17 = vld [vmem:[%s10370_s3 + $0x940] ss:$20 sps:$4 sm:$0xff]  }
 0x189   :  { %4953 = vmatprep.subr.bf16.mxu0 %v7409_v63  ;;  %5297 = vmatprep.subr.bf16.mxu1 %v7412_v0  ;;  %v7421_v11 = vld [vmem:[%s10370_s3 + $0x93c] ss:$20 sps:$4 sm:$0xff]   ;;  %v7427_v19 = vld [vmem:[%s10370_s3 + $0x964] ss:$20 sps:$4 sm:$0xff]   ;;  %v7430_v20 = vld [vmem:[%s10370_s3 + $0x96c] ss:$20 sps:$4 sm:$0xff]  }
 0x18a   :  { %v7425_v21 = vld [vmem:[%s10370_s3 + $0x960] ss:$20 sps:$4 sm:$0xff]   ;;  %v7428_v22 = vld [vmem:[%s10370_s3 + $0x968] ss:$20 sps:$4 sm:$0xff]   ;;  %v7434_v30 = vld [vmem:[%s10370_s3 + $0x990] ss:$20 sps:$4 sm:$0xff]  }
 0x18b   :  { %v7433_v25 = vld [vmem:[%s10370_s3 + $0x98c] ss:$20 sps:$4 sm:$0xff]   ;;  %v7436_v28 = vld [vmem:[%s10370_s3 + $0x994] ss:$20 sps:$4 sm:$0xff]   ;;  %v7442_v33 = vld [vmem:[%s10370_s3 + $0x9bc] ss:$20 sps:$4 sm:$0xff]  }
 0x18c   :  { %4954 = vmatpush1.bf16.msra.mxu0 %v7407_v2  ;;  %5298 = vmatpush1.bf16.msra.mxu1 %v7410_v4  ;;  %v7431_v29 = vld [vmem:[%s10370_s3 + $0x988] ss:$20 sps:$4 sm:$0xff]   ;;  %v7437_v34 = vld [vmem:[%s10370_s3 + $0x9b0] ss:$20 sps:$4 sm:$0xff]   ;;  %v7440_v26 = vld [vmem:[%s10370_s3 + $0x9b8] ss:$20 sps:$4 sm:$0xff]  }
 0x18d   :  { %4955 = vmatprep.subr.bf16.mxu0 %v7415_v6  ;;  %5299 = vmatprep.subr.bf16.mxu1 %v7418_v8  ;;  %v7439_v32 = vld [vmem:[%s10370_s3 + $0x9b4] ss:$20 sps:$4 sm:$0xff]   ;;  %v7445_v24 = vld [vmem:[%s10370_s3 + $0x9dc] ss:$20 sps:$4 sm:$0xff]   ;;  %v7448_v27 = vld [vmem:[%s10370_s3 + $0x9e4] ss:$20 sps:$4 sm:$0xff]  }
 0x18e   :  { %v7443_v39 = vld [vmem:[%s10370_s3 + $0x9d8] ss:$20 sps:$4 sm:$0xff]   ;;  %v7446_v40 = vld [vmem:[%s10370_s3 + $0x9e0] ss:$20 sps:$4 sm:$0xff]   ;;  %v7452_v45 = vld [vmem:[%s10370_s3 + $0xa08] ss:$20 sps:$4 sm:$0xff]  }
 0x18f   :  { %v7451_v42 = vld [vmem:[%s10370_s3 + $0xa04] ss:$20 sps:$4 sm:$0xff]   ;;  %v7454_v43 = vld [vmem:[%s10370_s3 + $0xa0c] ss:$20 sps:$4 sm:$0xff]   ;;  %v7460_v47 = vld [vmem:[%s10370_s3 + $0xa34] ss:$20 sps:$4 sm:$0xff]  }
 0x190   :  { %4956 = vmatpush1.bf16.msra.mxu0 %v7413_v9  ;;  %5300 = vmatpush1.bf16.msra.mxu1 %v7416_v10  ;;  %v7449_v44 = vld [vmem:[%s10370_s3 + $0xa00] ss:$20 sps:$4 sm:$0xff]   ;;  %v7455_v49 = vld [vmem:[%s10370_s3 + $0xa28] ss:$20 sps:$4 sm:$0xff]   ;;  %v7458_v50 = vld [vmem:[%s10370_s3 + $0xa30] ss:$20 sps:$4 sm:$0xff]  }
 0x191   :  { %4957 = vmatprep.subr.bf16.mxu0 %v7421_v11  ;;  %5301 = vmatprep.subr.bf16.mxu1 %v7424_v12  ;;  %v7457_v46 = vld [vmem:[%s10370_s3 + $0xa2c] ss:$20 sps:$4 sm:$0xff]   ;;  %v7463_v48 = vld [vmem:[%s10370_s3 + $0xa54] ss:$20 sps:$4 sm:$0xff]   ;;  %v7466_v51 = vld [vmem:[%s10370_s3 + $0xa5c] ss:$20 sps:$4 sm:$0xff]  }
 0x192   :  { %v7461_v52 = vld [vmem:[%s10370_s3 + $0xa50] ss:$20 sps:$4 sm:$0xff]   ;;  %v7464_v23 = vld [vmem:[%s10370_s3 + $0xa58] ss:$20 sps:$4 sm:$0xff]   ;;  %v7470_v58 = vld [vmem:[%s10370_s3 + $0xa80] ss:$20 sps:$4 sm:$0xff]  }
 0x193   :  { %v7469_v54 = vld [vmem:[%s10370_s3 + $0xa7c] ss:$20 sps:$4 sm:$0xff]   ;;  %v7472_v55 = vld [vmem:[%s10370_s3 + $0xa84] ss:$20 sps:$4 sm:$0xff]   ;;  %v7478_v62 = vld [vmem:[%s10370_s3 + $0xaac] ss:$20 sps:$4 sm:$0xff]  }
 0x194   :  { %4958 = vmatpush1.bf16.msra.mxu0 %v7419_v16  ;;  %5302 = vmatpush1.bf16.msra.mxu1 %v7422_v17  ;;  %v7467_v57 = vld [vmem:[%s10370_s3 + $0xa78] ss:$20 sps:$4 sm:$0xff]   ;;  %v7473_v63 = vld [vmem:[%s10370_s3 + $0xaa0] ss:$20 sps:$4 sm:$0xff]   ;;  %v7476_v0 = vld [vmem:[%s10370_s3 + $0xaa8] ss:$20 sps:$4 sm:$0xff]  }
 0x195   :  { %4959 = vmatprep.subr.bf16.mxu0 %v7427_v19  ;;  %5303 = vmatprep.subr.bf16.mxu1 %v7430_v20  ;;  %v7475_v59 = vld [vmem:[%s10370_s3 + $0xaa4] ss:$20 sps:$4 sm:$0xff]   ;;  %v7481_v2 = vld [vmem:[%s10370_s3 + $0xacc] ss:$20 sps:$4 sm:$0xff]   ;;  %v7484_v4 = vld [vmem:[%s10370_s3 + $0xad4] ss:$20 sps:$4 sm:$0xff]  }
 0x196   :  { %v7479_v6 = vld [vmem:[%s10370_s3 + $0xac8] ss:$20 sps:$4 sm:$0xff]   ;;  %v7482_v8 = vld [vmem:[%s10370_s3 + $0xad0] ss:$20 sps:$4 sm:$0xff]   ;;  %v7488_v12 = vld [vmem:[%s10370_s3 + $0xaf8] ss:$20 sps:$4 sm:$0xff]  }
 0x197   :  { %v7487_v9 = vld [vmem:[%s10370_s3 + $0xaf4] ss:$20 sps:$4 sm:$0xff]   ;;  %v7490_v10 = vld [vmem:[%s10370_s3 + $0xafc] ss:$20 sps:$4 sm:$0xff]   ;;  %v7496_v17 = vld [vmem:[%s10370_s3 + $0xb24] ss:$20 sps:$4 sm:$0xff]  }
 0x198   :  { %4960 = vmatpush1.bf16.msra.mxu0 %v7425_v21  ;;  %5304 = vmatpush1.bf16.msra.mxu1 %v7428_v22  ;;  %v7485_v11 = vld [vmem:[%s10370_s3 + $0xaf0] ss:$20 sps:$4 sm:$0xff]   ;;  %v7491_v19 = vld [vmem:[%s10370_s3 + $0xb18] ss:$20 sps:$4 sm:$0xff]   ;;  %v7494_v20 = vld [vmem:[%s10370_s3 + $0xb20] ss:$20 sps:$4 sm:$0xff]  }
 0x199   :  { %4961 = vmatprep.subr.bf16.mxu0 %v7433_v25  ;;  %5305 = vmatprep.subr.bf16.mxu1 %v7436_v28  ;;  %v7493_v16 = vld [vmem:[%s10370_s3 + $0xb1c] ss:$20 sps:$4 sm:$0xff]   ;;  %v7499_v21 = vld [vmem:[%s10370_s3 + $0xb44] ss:$20 sps:$4 sm:$0xff]   ;;  %v7502_v22 = vld [vmem:[%s10370_s3 + $0xb4c] ss:$20 sps:$4 sm:$0xff]  }
 0x19a   :  { %v7497_v25 = vld [vmem:[%s10370_s3 + $0xb40] ss:$20 sps:$4 sm:$0xff]   ;;  %v7500_v28 = vld [vmem:[%s10370_s3 + $0xb48] ss:$20 sps:$4 sm:$0xff]   ;;  %vm4802_vm8 = vcmask 785408   ;;  %s7984_s8 = smov 32  }
 0x19b   :  { %v7831_v37 = vld [vmem:[%s10370_s3 + $0x60] ss:$20 sps:$4 sm:$0xff]   ;;  %v7833_v1 = vld [vmem:[%s10370_s3 + $0x1c8] ss:$20 sps:$4 sm:$0xff]   ;;  %v7860_v36 = vld [vmem:[%s10370_s3 + $0x7b8] ss:$20 sps:$4 sm:$0xff]  }
 0x19c   :  { %4962 = vmatpush1.bf16.msra.mxu0 %v7431_v29  ;;  %5306 = vmatpush1.bf16.msra.mxu1 %v7434_v30  ;;  %v7505_v29 = vld [vmem:[%s10370_s3 + $0xb6c] ss:$20 sps:$4 sm:$0xff]   ;;  %v7508_v30 = vld [vmem:[%s10370_s3 + $0xb74] ss:$20 sps:$4 sm:$0xff]   ;;  %s7985_s9 = smov 96  }
 0x19d   :  { %4963 = vmatprep.subr.bf16.mxu0 %v7439_v32  ;;  %5307 = vmatprep.subr.bf16.mxu1 %v7442_v33  ;;  %v7503_v32 = vld [vmem:[%s10370_s3 + $0xb68] ss:$20 sps:$4 sm:$0xff]   ;;  %v7506_v33 = vld [vmem:[%s10370_s3 + $0xb70] ss:$20 sps:$4 sm:$0xff]   ;;  %v7862_v60 = vld [vmem:[%s10370_s3 + $0x920] ss:$20 sps:$4 sm:$0xff]  }
 0x19e   :  { %v7863_v31 = vld [vmem:[%s10370_s3 + $0x560] ss:$20 sps:$4 sm:$0xff]   ;;  %v7865_v7 = vld [vmem:[%s10370_s3 + $0x6c8] ss:$20 sps:$4 sm:$0xff]   ;;  %v7892_v14 = vld [vmem:[%s10370_s3 + $0xcb8] ss:$20 sps:$4 sm:$0xff]  }
 0x19f   :  { %v7894_v5 = vld [vmem:[%s10370_s3 + $0xe20] ss:$20 sps:$4 sm:$0xff]   ;;  %v7897_v38 = vld [vmem:[%s10370_s3 + $0xbc8] ss:$20 sps:$4 sm:$0xff]  }
 0x1a0   :  { %4964 = vmatpush1.bf16.msra.mxu0 %v7437_v34  ;;  %5308 = vmatpush1.bf16.msra.mxu1 %v7440_v26  ;;  %v7511_v34 = vld [vmem:[%s10370_s3 + $0xb94] ss:$20 sps:$4 sm:$0xff]   ;;  %v7514_v26 = vld [vmem:[%s10370_s3 + $0xb9c] ss:$20 sps:$4 sm:$0xff]  }
 0x1a1   :  { %4965 = vmatprep.subr.bf16.mxu0 %v7445_v24  ;;  %5309 = vmatprep.subr.bf16.mxu1 %v7448_v27  ;;  %v7509_v24 = vld [vmem:[%s10370_s3 + $0xb90] ss:$20 sps:$4 sm:$0xff]   ;;  %v7512_v27 = vld [vmem:[%s10370_s3 + $0xb98] ss:$20 sps:$4 sm:$0xff]   ;;  %v7895_v56 = vld [vmem:[%s10370_s3 + $0xa60] ss:$20 sps:$4 sm:$0xff]  }
 0x1a2   :  { %v7923_v53 = vld [vmem:[%s10370_s3 + $0x10a0] ss:$20 sps:$4 sm:$0xff]   ;;  %v7944_v13 = vld [vmem:[%s10370_s3 + $0x1348] ss:$20 sps:$4 sm:$0xff]  }
 0x1a3   :  { %v7924_v35 = vld [vmem:[%s10370_s3 + $0xf60] ss:$20 sps:$4 sm:$0xff]  }
 0x1a4   :  { %4966 = vmatpush1.bf16.msra.mxu0 %v7443_v39  ;;  %5310 = vmatpush1.bf16.msra.mxu1 %v7446_v40  ;;  %v7517_v39 = vld [vmem:[%s10370_s3 + $0xbbc] ss:$20 sps:$4 sm:$0xff]   ;;  %v7520_v40 = vld [vmem:[%s10370_s3 + $0xbc4] ss:$20 sps:$4 sm:$0xff]   ;;  %v7925_v18 = vld [vmem:[%s10370_s3 + $0x11e0] ss:$20 sps:$4 sm:$0xff]  }
 0x1a5   :  { %4978 = vmatprep.subr.bf16.mxu0 %v7451_v42  ;;  %5322 = vmatprep.subr.bf16.mxu1 %v7454_v43  ;;  %v7515_v42 = vld [vmem:[%s10370_s3 + $0xbb8] ss:$20 sps:$4 sm:$0xff]   ;;  %v7518_v43 = vld [vmem:[%s10370_s3 + $0xbc0] ss:$20 sps:$4 sm:$0xff]  }
 0x1a7   :  { %6721 = vmatmul.mubr.msk.bf16.vlgmr.msra.gmra.mrb[20].mxu0 %vm8456_vm2, %v7981_v41  ;;  %6752 = vmatmul.mubr.msk.bf16.vlgmr.msra.gmra.mrb[12].mxu1 %vm8456_vm2, %v7981_v41 }
 0x1a8   :  { %4979 = vmatpush1.bf16.msra.mxu0 %v7449_v44  ;;  %6723 = vmatprep.mubr.msk.bf16.mxu0 %vm8557_vm6, %v7981_v41  ;;  %v7523_v44 = vld [vmem:[%s10370_s3 + $0xbe4] ss:$20 sps:$4 sm:$0xff]  }
 0x1a9   :  { %5323 = vmatpush1.bf16.msra.mxu1 %v7452_v45  ;;  %6754 = vmatprep.mubr.msk.bf16.mxu1 %vm8557_vm6, %v7981_v41  ;;  %v7526_v45 = vld [vmem:[%s10370_s3 + $0xbec] ss:$20 sps:$4 sm:$0xff]  }
 0x1aa   :  { %4980 = vmatprep.subr.bf16.mxu0 %v7457_v46  ;;  %5324 = vmatprep.subr.bf16.mxu1 %v7460_v47  ;;  %v7521_v46 = vld [vmem:[%s10370_s3 + $0xbe0] ss:$20 sps:$4 sm:$0xff]   ;;  %v7524_v47 = vld [vmem:[%s10370_s3 + $0xbe8] ss:$20 sps:$4 sm:$0xff]  }
 0x1ac   :  { %4981 = vmatpush1.bf16.msra.mxu0 %v7455_v49  ;;  %v7529_v49 = vld [vmem:[%s10370_s3 + $0xc0c] ss:$20 sps:$4 sm:$0xff]  }
 0x1ad   :  { %5325 = vmatpush1.bf16.msra.mxu1 %v7458_v50  ;;  %4982 = vmatprep.subr.bf16.mxu0 %v7463_v48  ;;  %v7532_v50 = vld [vmem:[%s10370_s3 + $0xc14] ss:$20 sps:$4 sm:$0xff]  }
 0x1ae   :  { %5326 = vmatprep.subr.bf16.mxu1 %v7466_v51  ;;  %v7527_v48 = vld [vmem:[%s10370_s3 + $0xc08] ss:$20 sps:$4 sm:$0xff]   ;;  %v7530_v51 = vld [vmem:[%s10370_s3 + $0xc10] ss:$20 sps:$4 sm:$0xff]  }
 0x1b0   :  { %4983 = vmatpush1.bf16.msra.mxu0 %v7461_v52  ;;  %v7535_v52 = vld [vmem:[%s10370_s3 + $0xc34] ss:$20 sps:$4 sm:$0xff]  }
 0x1b1   :  { %5327 = vmatpush1.bf16.msra.mxu1 %v7464_v23  ;;  %4984 = vmatprep.subr.bf16.mxu0 %v7469_v54  ;;  %v7538_v23 = vld [vmem:[%s10370_s3 + $0xc3c] ss:$20 sps:$4 sm:$0xff]  }
 0x1b2   :  { %5328 = vmatprep.subr.bf16.mxu1 %v7472_v55  ;;  %v7533_v54 = vld [vmem:[%s10370_s3 + $0xc30] ss:$20 sps:$4 sm:$0xff]   ;;  %v7536_v55 = vld [vmem:[%s10370_s3 + $0xc38] ss:$20 sps:$4 sm:$0xff]  }
 0x1b4   :  { %4985 = vmatpush1.bf16.msra.mxu0 %v7467_v57  ;;  %v7541_v57 = vld [vmem:[%s10370_s3 + $0xc5c] ss:$20 sps:$4 sm:$0xff]  }
 0x1b5   :  { %5329 = vmatpush1.bf16.msra.mxu1 %v7470_v58  ;;  %4986 = vmatprep.subr.bf16.mxu0 %v7475_v59  ;;  %v7544_v58 = vld [vmem:[%s10370_s3 + $0xc64] ss:$20 sps:$4 sm:$0xff]  }
 0x1b6   :  { %5330 = vmatprep.subr.bf16.mxu1 %v7478_v62  ;;  %v7539_v59 = vld [vmem:[%s10370_s3 + $0xc58] ss:$20 sps:$4 sm:$0xff]   ;;  %v7542_v62 = vld [vmem:[%s10370_s3 + $0xc60] ss:$20 sps:$4 sm:$0xff]  }
 0x1b8   :  { %4987 = vmatpush1.bf16.msra.mxu0 %v7473_v63  ;;  %v7547_v63 = vld [vmem:[%s10370_s3 + $0xc84] ss:$20 sps:$4 sm:$0xff]  }
 0x1b9   :  { %5331 = vmatpush1.bf16.msra.mxu1 %v7476_v0  ;;  %4988 = vmatprep.subr.bf16.mxu0 %v7481_v2  ;;  %v7550_v0 = vld [vmem:[%s10370_s3 + $0xc8c] ss:$20 sps:$4 sm:$0xff]  }
 0x1ba   :  { %5332 = vmatprep.subr.bf16.mxu1 %v7484_v4  ;;  %v7545_v2 = vld [vmem:[%s10370_s3 + $0xc80] ss:$20 sps:$4 sm:$0xff]   ;;  %v7548_v4 = vld [vmem:[%s10370_s3 + $0xc88] ss:$20 sps:$4 sm:$0xff]  }
 0x1bc   :  { %4989 = vmatpush1.bf16.msra.mxu0 %v7479_v6  ;;  %v7553_v6 = vld [vmem:[%s10370_s3 + $0xcac] ss:$20 sps:$4 sm:$0xff]  }
 0x1bd   :  { %5333 = vmatpush1.bf16.msra.mxu1 %v7482_v8  ;;  %4990 = vmatprep.subr.bf16.mxu0 %v7487_v9  ;;  %v7556_v8 = vld [vmem:[%s10370_s3 + $0xcb4] ss:$20 sps:$4 sm:$0xff]  }
 0x1be   :  { %5334 = vmatprep.subr.bf16.mxu1 %v7490_v10  ;;  %v7551_v9 = vld [vmem:[%s10370_s3 + $0xca8] ss:$20 sps:$4 sm:$0xff]   ;;  %v7554_v10 = vld [vmem:[%s10370_s3 + $0xcb0] ss:$20 sps:$4 sm:$0xff]  }
 0x1c0   :  { %4991 = vmatpush1.bf16.msra.mxu0 %v7485_v11  ;;  %v7559_v11 = vld [vmem:[%s10370_s3 + $0xcd4] ss:$20 sps:$4 sm:$0xff]  }
 0x1c1   :  { %5335 = vmatpush1.bf16.msra.mxu1 %v7488_v12  ;;  %4992 = vmatprep.subr.bf16.mxu0 %v7493_v16  ;;  %v7562_v12 = vld [vmem:[%s10370_s3 + $0xcdc] ss:$20 sps:$4 sm:$0xff]  }
 0x1c2   :  { %5336 = vmatprep.subr.bf16.mxu1 %v7496_v17  ;;  %v7557_v16 = vld [vmem:[%s10370_s3 + $0xcd0] ss:$20 sps:$4 sm:$0xff]   ;;  %v7560_v17 = vld [vmem:[%s10370_s3 + $0xcd8] ss:$20 sps:$4 sm:$0xff]  }
 0x1c4   :  { %4993 = vmatpush1.bf16.msra.mxu0 %v7491_v19  ;;  %v7565_v19 = vld [vmem:[%s10370_s3 + $0xcfc] ss:$20 sps:$4 sm:$0xff]  }
 0x1c5   :  { %5337 = vmatpush1.bf16.msra.mxu1 %v7494_v20  ;;  %4994 = vmatprep.subr.bf16.mxu0 %v7499_v21  ;;  %v7568_v20 = vld [vmem:[%s10370_s3 + $0xd04] ss:$20 sps:$4 sm:$0xff]  }
 0x1c6   :  { %5338 = vmatprep.subr.bf16.mxu1 %v7502_v22  ;;  %v7563_v21 = vld [vmem:[%s10370_s3 + $0xcf8] ss:$20 sps:$4 sm:$0xff]   ;;  %v7566_v22 = vld [vmem:[%s10370_s3 + $0xd00] ss:$20 sps:$4 sm:$0xff]  }
 0x1c8   :  { %4995 = vmatpush1.bf16.msra.mxu0 %v7497_v25  ;;  %v7571_v25 = vld [vmem:[%s10370_s3 + $0xd24] ss:$20 sps:$4 sm:$0xff]  }
 0x1c9   :  { %5339 = vmatpush1.bf16.msra.mxu1 %v7500_v28  ;;  %4996 = vmatprep.subr.bf16.mxu0 %v7505_v29  ;;  %v7574_v28 = vld [vmem:[%s10370_s3 + $0xd2c] ss:$20 sps:$4 sm:$0xff]  }
 0x1ca   :  { %5340 = vmatprep.subr.bf16.mxu1 %v7508_v30  ;;  %v7569_v29 = vld [vmem:[%s10370_s3 + $0xd20] ss:$20 sps:$4 sm:$0xff]   ;;  %v7572_v30 = vld [vmem:[%s10370_s3 + $0xd28] ss:$20 sps:$4 sm:$0xff]  }
 0x1cc   :  { %4997 = vmatpush1.bf16.msra.mxu0 %v7503_v32  ;;  %v7577_v32 = vld [vmem:[%s10370_s3 + $0xd4c] ss:$20 sps:$4 sm:$0xff]  }
 0x1cd   :  { %5341 = vmatpush1.bf16.msra.mxu1 %v7506_v33  ;;  %4998 = vmatprep.subr.bf16.mxu0 %v7511_v34  ;;  %v7580_v33 = vld [vmem:[%s10370_s3 + $0xd54] ss:$20 sps:$4 sm:$0xff]  }
 0x1ce   :  { %5342 = vmatprep.subr.bf16.mxu1 %v7514_v26  ;;  %v7575_v34 = vld [vmem:[%s10370_s3 + $0xd48] ss:$20 sps:$4 sm:$0xff]   ;;  %v7578_v26 = vld [vmem:[%s10370_s3 + $0xd50] ss:$20 sps:$4 sm:$0xff]  }
 0x1d0   :  { %4999 = vmatpush1.bf16.msra.mxu0 %v7509_v24  ;;  %v7583_v24 = vld [vmem:[%s10370_s3 + $0xd74] ss:$20 sps:$4 sm:$0xff]  }
 0x1d1   :  { %5343 = vmatpush1.bf16.msra.mxu1 %v7512_v27  ;;  %5000 = vmatprep.subr.bf16.mxu0 %v7517_v39  ;;  %v7586_v27 = vld [vmem:[%s10370_s3 + $0xd7c] ss:$20 sps:$4 sm:$0xff]  }
 0x1d2   :  { %5344 = vmatprep.subr.bf16.mxu1 %v7520_v40  ;;  %v7581_v39 = vld [vmem:[%s10370_s3 + $0xd70] ss:$20 sps:$4 sm:$0xff]   ;;  %v7584_v40 = vld [vmem:[%s10370_s3 + $0xd78] ss:$20 sps:$4 sm:$0xff]  }
 0x1d4   :  { %5001 = vmatpush1.bf16.msra.mxu0 %v7515_v42  ;;  %v7589_v42 = vld [vmem:[%s10370_s3 + $0xd9c] ss:$20 sps:$4 sm:$0xff]  }
 0x1d5   :  { %5345 = vmatpush1.bf16.msra.mxu1 %v7518_v43  ;;  %5002 = vmatprep.subr.bf16.mxu0 %v7523_v44  ;;  %v7592_v43 = vld [vmem:[%s10370_s3 + $0xda4] ss:$20 sps:$4 sm:$0xff]  }
 0x1d6   :  { %5346 = vmatprep.subr.bf16.mxu1 %v7526_v45  ;;  %v7587_v44 = vld [vmem:[%s10370_s3 + $0xd98] ss:$20 sps:$4 sm:$0xff]   ;;  %v7590_v45 = vld [vmem:[%s10370_s3 + $0xda0] ss:$20 sps:$4 sm:$0xff]  }
 0x1d8   :  { %5003 = vmatpush1.bf16.msra.mxu0 %v7521_v46  ;;  %v7595_v46 = vld [vmem:[%s10370_s3 + $0xdc4] ss:$20 sps:$4 sm:$0xff]  }
 0x1d9   :  { %5347 = vmatpush1.bf16.msra.mxu1 %v7524_v47  ;;  %5004 = vmatprep.subr.bf16.mxu0 %v7529_v49  ;;  %v7598_v47 = vld [vmem:[%s10370_s3 + $0xdcc] ss:$20 sps:$4 sm:$0xff]  }
 0x1da   :  { %5348 = vmatprep.subr.bf16.mxu1 %v7532_v50  ;;  %v7593_v49 = vld [vmem:[%s10370_s3 + $0xdc0] ss:$20 sps:$4 sm:$0xff]   ;;  %v7596_v50 = vld [vmem:[%s10370_s3 + $0xdc8] ss:$20 sps:$4 sm:$0xff]  }
 0x1dc   :  { %5005 = vmatpush1.bf16.msra.mxu0 %v7527_v48  ;;  %v7601_v48 = vld [vmem:[%s10370_s3 + $0xdec] ss:$20 sps:$4 sm:$0xff]  }
 0x1dd   :  { %5349 = vmatpush1.bf16.msra.mxu1 %v7530_v51  ;;  %5006 = vmatprep.subr.bf16.mxu0 %v7535_v52  ;;  %v7604_v51 = vld [vmem:[%s10370_s3 + $0xdf4] ss:$20 sps:$4 sm:$0xff]  }
 0x1de   :  { %5350 = vmatprep.subr.bf16.mxu1 %v7538_v23  ;;  %v7599_v52 = vld [vmem:[%s10370_s3 + $0xde8] ss:$20 sps:$4 sm:$0xff]   ;;  %v7602_v23 = vld [vmem:[%s10370_s3 + $0xdf0] ss:$20 sps:$4 sm:$0xff]  }
 0x1e0   :  { %5007 = vmatpush1.bf16.msra.mxu0 %v7533_v54  ;;  %v7607_v54 = vld [vmem:[%s10370_s3 + $0xe14] ss:$20 sps:$4 sm:$0xff]  }
 0x1e1   :  { %5351 = vmatpush1.bf16.msra.mxu1 %v7536_v55  ;;  %5008 = vmatprep.subr.bf16.mxu0 %v7541_v57  ;;  %v7610_v55 = vld [vmem:[%s10370_s3 + $0xe1c] ss:$20 sps:$4 sm:$0xff]  }
 0x1e2   :  { %5352 = vmatprep.subr.bf16.mxu1 %v7544_v58  ;;  %v7605_v57 = vld [vmem:[%s10370_s3 + $0xe10] ss:$20 sps:$4 sm:$0xff]   ;;  %v7608_v58 = vld [vmem:[%s10370_s3 + $0xe18] ss:$20 sps:$4 sm:$0xff]  }
 0x1e4   :  { %5009 = vmatpush1.bf16.msra.mxu0 %v7539_v59  ;;  %v7613_v59 = vld [vmem:[%s10370_s3 + $0xe3c] ss:$20 sps:$4 sm:$0xff]  }
 0x1e5   :  { %5353 = vmatpush1.bf16.msra.mxu1 %v7542_v62  ;;  %5021 = vmatprep.subr.bf16.mxu0 %v7547_v63  ;;  %v7616_v62 = vld [vmem:[%s10370_s3 + $0xe44] ss:$20 sps:$4 sm:$0xff]  }
 0x1e6   :  { %5365 = vmatprep.subr.bf16.mxu1 %v7550_v0  ;;  %v7611_v63 = vld [vmem:[%s10370_s3 + $0xe38] ss:$20 sps:$4 sm:$0xff]   ;;  %v7614_v0 = vld [vmem:[%s10370_s3 + $0xe40] ss:$20 sps:$4 sm:$0xff]  }
 0x1e7   :  { %6725 = vmatmul.mubr.msk.bf16.vlgmr.msra.gmra.mrb[20].mxu0 %vm8546_vm5, %v7981_v41 }
 0x1e8   :  { %6756 = vmatmul.mubr.msk.bf16.vlgmr.msra.gmra.mrb[12].mxu1 %vm8546_vm5, %v7981_v41  ;;  %5022 = vmatpush1.bf16.msra.mxu0 %v7545_v2  ;;  %v7619_v2 = vld [vmem:[%s10370_s3 + $0xe64] ss:$20 sps:$4 sm:$0xff]  }
 0x1e9   :  { %6727 = vmatprep.mubr.msk.bf16.mxu0 %vm8518_vm7, %v7981_v41  ;;  %5366 = vmatpush1.bf16.msra.mxu1 %v7548_v4  ;;  %v7622_v4 = vld [vmem:[%s10370_s3 + $0xe6c] ss:$20 sps:$4 sm:$0xff]  }
 0x1ea   :  { %6758 = vmatprep.mubr.msk.bf16.mxu1 %vm8518_vm7, %v7981_v41  ;;  %5023 = vmatprep.subr.bf16.mxu0 %v7553_v6  ;;  %v7617_v6 = vld [vmem:[%s10370_s3 + $0xe60] ss:$20 sps:$4 sm:$0xff]  }
 0x1eb   :  { %5367 = vmatprep.subr.bf16.mxu1 %v7556_v8  ;;  %v7620_v8 = vld [vmem:[%s10370_s3 + $0xe68] ss:$20 sps:$4 sm:$0xff]  }
 0x1ec   :  { %5024 = vmatpush1.bf16.msra.mxu0 %v7551_v9  ;;  %v7625_v9 = vld [vmem:[%s10370_s3 + $0xe8c] ss:$20 sps:$4 sm:$0xff]  }
 0x1ed   :  { %5368 = vmatpush1.bf16.msra.mxu1 %v7554_v10  ;;  %5025 = vmatprep.subr.bf16.mxu0 %v7559_v11  ;;  %v7628_v10 = vld [vmem:[%s10370_s3 + $0xe94] ss:$20 sps:$4 sm:$0xff]  }
 0x1ee   :  { %5369 = vmatprep.subr.bf16.mxu1 %v7562_v12  ;;  %v7623_v11 = vld [vmem:[%s10370_s3 + $0xe88] ss:$20 sps:$4 sm:$0xff]   ;;  %v7626_v12 = vld [vmem:[%s10370_s3 + $0xe90] ss:$20 sps:$4 sm:$0xff]  }
 0x1f0   :  { %5026 = vmatpush1.bf16.msra.mxu0 %v7557_v16  ;;  %v7631_v16 = vld [vmem:[%s10370_s3 + $0xeb4] ss:$20 sps:$4 sm:$0xff]  }
 0x1f1   :  { %5370 = vmatpush1.bf16.msra.mxu1 %v7560_v17  ;;  %5027 = vmatprep.subr.bf16.mxu0 %v7565_v19  ;;  %v7634_v17 = vld [vmem:[%s10370_s3 + $0xebc] ss:$20 sps:$4 sm:$0xff]  }
 0x1f2   :  { %5371 = vmatprep.subr.bf16.mxu1 %v7568_v20  ;;  %v7629_v19 = vld [vmem:[%s10370_s3 + $0xeb0] ss:$20 sps:$4 sm:$0xff]   ;;  %v7632_v20 = vld [vmem:[%s10370_s3 + $0xeb8] ss:$20 sps:$4 sm:$0xff]  }
 0x1f4   :  { %5028 = vmatpush1.bf16.msra.mxu0 %v7563_v21  ;;  %v7637_v21 = vld [vmem:[%s10370_s3 + $0xedc] ss:$20 sps:$4 sm:$0xff]  }
 0x1f5   :  { %5372 = vmatpush1.bf16.msra.mxu1 %v7566_v22  ;;  %5029 = vmatprep.subr.bf16.mxu0 %v7571_v25  ;;  %v7640_v22 = vld [vmem:[%s10370_s3 + $0xee4] ss:$20 sps:$4 sm:$0xff]  }
 0x1f6   :  { %5373 = vmatprep.subr.bf16.mxu1 %v7574_v28  ;;  %v7635_v25 = vld [vmem:[%s10370_s3 + $0xed8] ss:$20 sps:$4 sm:$0xff]   ;;  %v7638_v28 = vld [vmem:[%s10370_s3 + $0xee0] ss:$20 sps:$4 sm:$0xff]  }
 0x1f8   :  { %5030 = vmatpush1.bf16.msra.mxu0 %v7569_v29  ;;  %v7643_v29 = vld [vmem:[%s10370_s3 + $0xf04] ss:$20 sps:$4 sm:$0xff]  }
 0x1f9   :  { %5374 = vmatpush1.bf16.msra.mxu1 %v7572_v30  ;;  %5031 = vmatprep.subr.bf16.mxu0 %v7577_v32  ;;  %v7646_v30 = vld [vmem:[%s10370_s3 + $0xf0c] ss:$20 sps:$4 sm:$0xff]  }
 0x1fa   :  { %5375 = vmatprep.subr.bf16.mxu1 %v7580_v33  ;;  %v7641_v32 = vld [vmem:[%s10370_s3 + $0xf00] ss:$20 sps:$4 sm:$0xff]   ;;  %v7644_v33 = vld [vmem:[%s10370_s3 + $0xf08] ss:$20 sps:$4 sm:$0xff]  }
 0x1fc   :  { %5032 = vmatpush1.bf16.msra.mxu0 %v7575_v34  ;;  %v7649_v34 = vld [vmem:[%s10370_s3 + $0xf2c] ss:$20 sps:$4 sm:$0xff]  }
 0x1fd   :  { %5376 = vmatpush1.bf16.msra.mxu1 %v7578_v26  ;;  %5033 = vmatprep.subr.bf16.mxu0 %v7583_v24  ;;  %v7652_v26 = vld [vmem:[%s10370_s3 + $0xf34] ss:$20 sps:$4 sm:$0xff]  }
 0x1fe   :  { %5377 = vmatprep.subr.bf16.mxu1 %v7586_v27  ;;  %v7647_v24 = vld [vmem:[%s10370_s3 + $0xf28] ss:$20 sps:$4 sm:$0xff]   ;;  %v7650_v27 = vld [vmem:[%s10370_s3 + $0xf30] ss:$20 sps:$4 sm:$0xff]  }
 0x200   :  { %5034 = vmatpush1.bf16.msra.mxu0 %v7581_v39  ;;  %v7655_v39 = vld [vmem:[%s10370_s3 + $0xf54] ss:$20 sps:$4 sm:$0xff]  }
 0x201   :  { %5378 = vmatpush1.bf16.msra.mxu1 %v7584_v40  ;;  %5035 = vmatprep.subr.bf16.mxu0 %v7589_v42  ;;  %v7658_v40 = vld [vmem:[%s10370_s3 + $0xf5c] ss:$20 sps:$4 sm:$0xff]  }
 0x202   :  { %5379 = vmatprep.subr.bf16.mxu1 %v7592_v43  ;;  %v7653_v42 = vld [vmem:[%s10370_s3 + $0xf50] ss:$20 sps:$4 sm:$0xff]   ;;  %v7656_v43 = vld [vmem:[%s10370_s3 + $0xf58] ss:$20 sps:$4 sm:$0xff]  }
 0x204   :  { %5036 = vmatpush1.bf16.msra.mxu0 %v7587_v44  ;;  %v7661_v44 = vld [vmem:[%s10370_s3 + $0xf7c] ss:$20 sps:$4 sm:$0xff]  }
 0x205   :  { %5380 = vmatpush1.bf16.msra.mxu1 %v7590_v45  ;;  %5037 = vmatprep.subr.bf16.mxu0 %v7595_v46  ;;  %v7664_v45 = vld [vmem:[%s10370_s3 + $0xf84] ss:$20 sps:$4 sm:$0xff]  }
 0x206   :  { %5381 = vmatprep.subr.bf16.mxu1 %v7598_v47  ;;  %v7659_v46 = vld [vmem:[%s10370_s3 + $0xf78] ss:$20 sps:$4 sm:$0xff]   ;;  %v7662_v47 = vld [vmem:[%s10370_s3 + $0xf80] ss:$20 sps:$4 sm:$0xff]  }
 0x208   :  { %5038 = vmatpush1.bf16.msra.mxu0 %v7593_v49  ;;  %v7667_v49 = vld [vmem:[%s10370_s3 + $0xfa4] ss:$20 sps:$4 sm:$0xff]  }
 0x209   :  { %5382 = vmatpush1.bf16.msra.mxu1 %v7596_v50  ;;  %5039 = vmatprep.subr.bf16.mxu0 %v7601_v48  ;;  %v7670_v50 = vld [vmem:[%s10370_s3 + $0xfac] ss:$20 sps:$4 sm:$0xff]  }
 0x20a   :  { %5383 = vmatprep.subr.bf16.mxu1 %v7604_v51  ;;  %v7665_v48 = vld [vmem:[%s10370_s3 + $0xfa0] ss:$20 sps:$4 sm:$0xff]   ;;  %v7668_v51 = vld [vmem:[%s10370_s3 + $0xfa8] ss:$20 sps:$4 sm:$0xff]  }
 0x20c   :  { %5040 = vmatpush1.bf16.msra.mxu0 %v7599_v52  ;;  %v7673_v52 = vld [vmem:[%s10370_s3 + $0xfcc] ss:$20 sps:$4 sm:$0xff]  }
 0x20d   :  { %5384 = vmatpush1.bf16.msra.mxu1 %v7602_v23  ;;  %5041 = vmatprep.subr.bf16.mxu0 %v7607_v54  ;;  %v7676_v23 = vld [vmem:[%s10370_s3 + $0xfd4] ss:$20 sps:$4 sm:$0xff]  }
 0x20e   :  { %5385 = vmatprep.subr.bf16.mxu1 %v7610_v55  ;;  %v7671_v54 = vld [vmem:[%s10370_s3 + $0xfc8] ss:$20 sps:$4 sm:$0xff]   ;;  %v7674_v55 = vld [vmem:[%s10370_s3 + $0xfd0] ss:$20 sps:$4 sm:$0xff]  }
 0x210   :  { %5042 = vmatpush1.bf16.msra.mxu0 %v7605_v57  ;;  %v7679_v57 = vld [vmem:[%s10370_s3 + $0xff4] ss:$20 sps:$4 sm:$0xff]  }
 0x211   :  { %5386 = vmatpush1.bf16.msra.mxu1 %v7608_v58  ;;  %5043 = vmatprep.subr.bf16.mxu0 %v7613_v59  ;;  %v7682_v58 = vld [vmem:[%s10370_s3 + $0xffc] ss:$20 sps:$4 sm:$0xff]  }
 0x212   :  { %5387 = vmatprep.subr.bf16.mxu1 %v7616_v62  ;;  %v7677_v59 = vld [vmem:[%s10370_s3 + $0xff0] ss:$20 sps:$4 sm:$0xff]   ;;  %v7680_v62 = vld [vmem:[%s10370_s3 + $0xff8] ss:$20 sps:$4 sm:$0xff]  }
 0x214   :  { %5044 = vmatpush1.bf16.msra.mxu0 %v7611_v63  ;;  %v7685_v63 = vld [vmem:[%s10370_s3 + $0x101c] ss:$20 sps:$4 sm:$0xff]  }
 0x215   :  { %5388 = vmatpush1.bf16.msra.mxu1 %v7614_v0  ;;  %5045 = vmatprep.subr.bf16.mxu0 %v7619_v2  ;;  %v7688_v0 = vld [vmem:[%s10370_s3 + $0x1024] ss:$20 sps:$4 sm:$0xff]  }
 0x216   :  { %5389 = vmatprep.subr.bf16.mxu1 %v7622_v4  ;;  %v7683_v2 = vld [vmem:[%s10370_s3 + $0x1018] ss:$20 sps:$4 sm:$0xff]   ;;  %v7686_v4 = vld [vmem:[%s10370_s3 + $0x1020] ss:$20 sps:$4 sm:$0xff]  }
 0x218   :  { %5046 = vmatpush1.bf16.msra.mxu0 %v7617_v6  ;;  %v7691_v6 = vld [vmem:[%s10370_s3 + $0x1044] ss:$20 sps:$4 sm:$0xff]  }
 0x219   :  { %5390 = vmatpush1.bf16.msra.mxu1 %v7620_v8  ;;  %5047 = vmatprep.subr.bf16.mxu0 %v7625_v9  ;;  %v7694_v8 = vld [vmem:[%s10370_s3 + $0x104c] ss:$20 sps:$4 sm:$0xff]  }
 0x21a   :  { %5391 = vmatprep.subr.bf16.mxu1 %v7628_v10  ;;  %v7689_v9 = vld [vmem:[%s10370_s3 + $0x1040] ss:$20 sps:$4 sm:$0xff]   ;;  %v7692_v10 = vld [vmem:[%s10370_s3 + $0x1048] ss:$20 sps:$4 sm:$0xff]  }
 0x21c   :  { %5048 = vmatpush1.bf16.msra.mxu0 %v7623_v11  ;;  %v7697_v11 = vld [vmem:[%s10370_s3 + $0x106c] ss:$20 sps:$4 sm:$0xff]  }
 0x21d   :  { %5392 = vmatpush1.bf16.msra.mxu1 %v7626_v12  ;;  %5049 = vmatprep.subr.bf16.mxu0 %v7631_v16  ;;  %v7700_v12 = vld [vmem:[%s10370_s3 + $0x1074] ss:$20 sps:$4 sm:$0xff]  }
 0x21e   :  { %5393 = vmatprep.subr.bf16.mxu1 %v7634_v17  ;;  %v7695_v16 = vld [vmem:[%s10370_s3 + $0x1068] ss:$20 sps:$4 sm:$0xff]   ;;  %v7698_v17 = vld [vmem:[%s10370_s3 + $0x1070] ss:$20 sps:$4 sm:$0xff]  }
 0x220   :  { %5050 = vmatpush1.bf16.msra.mxu0 %v7629_v19  ;;  %v7703_v19 = vld [vmem:[%s10370_s3 + $0x1094] ss:$20 sps:$4 sm:$0xff]  }
 0x221   :  { %5394 = vmatpush1.bf16.msra.mxu1 %v7632_v20  ;;  %5051 = vmatprep.subr.bf16.mxu0 %v7637_v21  ;;  %v7706_v20 = vld [vmem:[%s10370_s3 + $0x109c] ss:$20 sps:$4 sm:$0xff]  }
 0x222   :  { %5395 = vmatprep.subr.bf16.mxu1 %v7640_v22  ;;  %v7701_v21 = vld [vmem:[%s10370_s3 + $0x1090] ss:$20 sps:$4 sm:$0xff]   ;;  %v7704_v22 = vld [vmem:[%s10370_s3 + $0x1098] ss:$20 sps:$4 sm:$0xff]  }
 0x224   :  { %5052 = vmatpush1.bf16.msra.mxu0 %v7635_v25  ;;  %v7709_v25 = vld [vmem:[%s10370_s3 + $0x10bc] ss:$20 sps:$4 sm:$0xff]  }
 0x225   :  { %5396 = vmatpush1.bf16.msra.mxu1 %v7638_v28  ;;  %5064 = vmatprep.subr.bf16.mxu0 %v7643_v29  ;;  %v7712_v28 = vld [vmem:[%s10370_s3 + $0x10c4] ss:$20 sps:$4 sm:$0xff]  }
 0x226   :  { %5408 = vmatprep.subr.bf16.mxu1 %v7646_v30  ;;  %v7707_v29 = vld [vmem:[%s10370_s3 + $0x10b8] ss:$20 sps:$4 sm:$0xff]   ;;  %v7710_v30 = vld [vmem:[%s10370_s3 + $0x10c0] ss:$20 sps:$4 sm:$0xff]  }
 0x227   :  { %6729 = vmatmul.mubr.msk.bf16.vlgmr.msra.gmra.mrb[20].mxu0 %vm8513_vm3, %v7981_v41 }
 0x228   :  { %6760 = vmatmul.mubr.msk.bf16.vlgmr.msra.gmra.mrb[12].mxu1 %vm8513_vm3, %v7981_v41  ;;  %5065 = vmatpush1.bf16.msra.mxu0 %v7641_v32  ;;  %v7715_v32 = vld [vmem:[%s10370_s3 + $0x10e4] ss:$20 sps:$4 sm:$0xff]  }
 0x229   :  { %6731 = vmatprep.mubr.msk.bf16.mxu0 %vm8598_vm14, %v7981_v41  ;;  %5409 = vmatpush1.bf16.msra.mxu1 %v7644_v33  ;;  %v7718_v33 = vld [vmem:[%s10370_s3 + $0x10ec] ss:$20 sps:$4 sm:$0xff]  }
 0x22a   :  { %6762 = vmatprep.mubr.msk.bf16.mxu1 %vm8598_vm14, %v7981_v41  ;;  %5066 = vmatprep.subr.bf16.mxu0 %v7649_v34  ;;  %v7713_v34 = vld [vmem:[%s10370_s3 + $0x10e0] ss:$20 sps:$4 sm:$0xff]  }
 0x22b   :  { %5410 = vmatprep.subr.bf16.mxu1 %v7652_v26  ;;  %v7716_v26 = vld [vmem:[%s10370_s3 + $0x10e8] ss:$20 sps:$4 sm:$0xff]  }
 0x22c   :  { %5067 = vmatpush1.bf16.msra.mxu0 %v7647_v24  ;;  %v7721_v24 = vld [vmem:[%s10370_s3 + $0x110c] ss:$20 sps:$4 sm:$0xff]  }
 0x22d   :  { %5411 = vmatpush1.bf16.msra.mxu1 %v7650_v27  ;;  %5068 = vmatprep.subr.bf16.mxu0 %v7655_v39  ;;  %v7724_v27 = vld [vmem:[%s10370_s3 + $0x1114] ss:$20 sps:$4 sm:$0xff]  }
 0x22e   :  { %5412 = vmatprep.subr.bf16.mxu1 %v7658_v40  ;;  %v7719_v39 = vld [vmem:[%s10370_s3 + $0x1108] ss:$20 sps:$4 sm:$0xff]   ;;  %v7722_v40 = vld [vmem:[%s10370_s3 + $0x1110] ss:$20 sps:$4 sm:$0xff]  }
 0x230   :  { %5069 = vmatpush1.bf16.msra.mxu0 %v7653_v42  ;;  %v7727_v42 = vld [vmem:[%s10370_s3 + $0x1134] ss:$20 sps:$4 sm:$0xff]  }
 0x231   :  { %5413 = vmatpush1.bf16.msra.mxu1 %v7656_v43  ;;  %5070 = vmatprep.subr.bf16.mxu0 %v7661_v44  ;;  %v7730_v43 = vld [vmem:[%s10370_s3 + $0x113c] ss:$20 sps:$4 sm:$0xff]  }
 0x232   :  { %5414 = vmatprep.subr.bf16.mxu1 %v7664_v45  ;;  %v7725_v44 = vld [vmem:[%s10370_s3 + $0x1130] ss:$20 sps:$4 sm:$0xff]   ;;  %v7728_v45 = vld [vmem:[%s10370_s3 + $0x1138] ss:$20 sps:$4 sm:$0xff]  }
 0x234   :  { %5071 = vmatpush1.bf16.msra.mxu0 %v7659_v46  ;;  %v7733_v46 = vld [vmem:[%s10370_s3 + $0x115c] ss:$20 sps:$4 sm:$0xff]  }
 0x235   :  { %5415 = vmatpush1.bf16.msra.mxu1 %v7662_v47  ;;  %5072 = vmatprep.subr.bf16.mxu0 %v7667_v49  ;;  %v7736_v47 = vld [vmem:[%s10370_s3 + $0x1164] ss:$20 sps:$4 sm:$0xff]  }
 0x236   :  { %5416 = vmatprep.subr.bf16.mxu1 %v7670_v50  ;;  %v7731_v49 = vld [vmem:[%s10370_s3 + $0x1158] ss:$20 sps:$4 sm:$0xff]   ;;  %v7734_v50 = vld [vmem:[%s10370_s3 + $0x1160] ss:$20 sps:$4 sm:$0xff]  }
 0x238   :  { %5073 = vmatpush1.bf16.msra.mxu0 %v7665_v48  ;;  %v7739_v48 = vld [vmem:[%s10370_s3 + $0x1184] ss:$20 sps:$4 sm:$0xff]  }
 0x239   :  { %5417 = vmatpush1.bf16.msra.mxu1 %v7668_v51  ;;  %5074 = vmatprep.subr.bf16.mxu0 %v7673_v52  ;;  %v7742_v51 = vld [vmem:[%s10370_s3 + $0x118c] ss:$20 sps:$4 sm:$0xff]  }
 0x23a   :  { %5418 = vmatprep.subr.bf16.mxu1 %v7676_v23  ;;  %v7737_v52 = vld [vmem:[%s10370_s3 + $0x1180] ss:$20 sps:$4 sm:$0xff]   ;;  %v7740_v23 = vld [vmem:[%s10370_s3 + $0x1188] ss:$20 sps:$4 sm:$0xff]  }
 0x23c   :  { %5075 = vmatpush1.bf16.msra.mxu0 %v7671_v54  ;;  %v7745_v54 = vld [vmem:[%s10370_s3 + $0x11ac] ss:$20 sps:$4 sm:$0xff]  }
 0x23d   :  { %5419 = vmatpush1.bf16.msra.mxu1 %v7674_v55  ;;  %5076 = vmatprep.subr.bf16.mxu0 %v7679_v57  ;;  %v7748_v55 = vld [vmem:[%s10370_s3 + $0x11b4] ss:$20 sps:$4 sm:$0xff]  }
 0x23e   :  { %5420 = vmatprep.subr.bf16.mxu1 %v7682_v58  ;;  %v7743_v57 = vld [vmem:[%s10370_s3 + $0x11a8] ss:$20 sps:$4 sm:$0xff]   ;;  %v7746_v58 = vld [vmem:[%s10370_s3 + $0x11b0] ss:$20 sps:$4 sm:$0xff]  }
 0x240   :  { %5077 = vmatpush1.bf16.msra.mxu0 %v7677_v59  ;;  %v7751_v59 = vld [vmem:[%s10370_s3 + $0x11d4] ss:$20 sps:$4 sm:$0xff]  }
 0x241   :  { %5421 = vmatpush1.bf16.msra.mxu1 %v7680_v62  ;;  %5078 = vmatprep.subr.bf16.mxu0 %v7685_v63  ;;  %v7754_v62 = vld [vmem:[%s10370_s3 + $0x11dc] ss:$20 sps:$4 sm:$0xff]  }
 0x242   :  { %5422 = vmatprep.subr.bf16.mxu1 %v7688_v0  ;;  %v7749_v63 = vld [vmem:[%s10370_s3 + $0x11d0] ss:$20 sps:$4 sm:$0xff]   ;;  %v7752_v0 = vld [vmem:[%s10370_s3 + $0x11d8] ss:$20 sps:$4 sm:$0xff]  }
 0x244   :  { %5079 = vmatpush1.bf16.msra.mxu0 %v7683_v2  ;;  %v7757_v2 = vld [vmem:[%s10370_s3 + $0x11fc] ss:$20 sps:$4 sm:$0xff]  }
 0x245   :  { %5423 = vmatpush1.bf16.msra.mxu1 %v7686_v4  ;;  %5080 = vmatprep.subr.bf16.mxu0 %v7691_v6  ;;  %v7760_v4 = vld [vmem:[%s10370_s3 + $0x1204] ss:$20 sps:$4 sm:$0xff]  }
 0x246   :  { %5424 = vmatprep.subr.bf16.mxu1 %v7694_v8  ;;  %v7755_v6 = vld [vmem:[%s10370_s3 + $0x11f8] ss:$20 sps:$4 sm:$0xff]   ;;  %v7758_v8 = vld [vmem:[%s10370_s3 + $0x1200] ss:$20 sps:$4 sm:$0xff]  }
 0x248   :  { %5081 = vmatpush1.bf16.msra.mxu0 %v7689_v9  ;;  %v7763_v9 = vld [vmem:[%s10370_s3 + $0x1224] ss:$20 sps:$4 sm:$0xff]  }
 0x249   :  { %5425 = vmatpush1.bf16.msra.mxu1 %v7692_v10  ;;  %5082 = vmatprep.subr.bf16.mxu0 %v7697_v11  ;;  %v7766_v10 = vld [vmem:[%s10370_s3 + $0x122c] ss:$20 sps:$4 sm:$0xff]  }
 0x24a   :  { %5426 = vmatprep.subr.bf16.mxu1 %v7700_v12  ;;  %v7761_v11 = vld [vmem:[%s10370_s3 + $0x1220] ss:$20 sps:$4 sm:$0xff]   ;;  %v7764_v12 = vld [vmem:[%s10370_s3 + $0x1228] ss:$20 sps:$4 sm:$0xff]  }
 0x24c   :  { %5083 = vmatpush1.bf16.msra.mxu0 %v7695_v16  ;;  %v7769_v16 = vld [vmem:[%s10370_s3 + $0x124c] ss:$20 sps:$4 sm:$0xff]  }
 0x24d   :  { %5427 = vmatpush1.bf16.msra.mxu1 %v7698_v17  ;;  %5084 = vmatprep.subr.bf16.mxu0 %v7703_v19  ;;  %v7772_v17 = vld [vmem:[%s10370_s3 + $0x1254] ss:$20 sps:$4 sm:$0xff]  }
 0x24e   :  { %5428 = vmatprep.subr.bf16.mxu1 %v7706_v20  ;;  %v7767_v19 = vld [vmem:[%s10370_s3 + $0x1248] ss:$20 sps:$4 sm:$0xff]   ;;  %v7770_v20 = vld [vmem:[%s10370_s3 + $0x1250] ss:$20 sps:$4 sm:$0xff]  }
 0x250   :  { %5085 = vmatpush1.bf16.msra.mxu0 %v7701_v21  ;;  %v7775_v21 = vld [vmem:[%s10370_s3 + $0x1274] ss:$20 sps:$4 sm:$0xff]  }
 0x251   :  { %5429 = vmatpush1.bf16.msra.mxu1 %v7704_v22  ;;  %5086 = vmatprep.subr.bf16.mxu0 %v7709_v25  ;;  %v7778_v22 = vld [vmem:[%s10370_s3 + $0x127c] ss:$20 sps:$4 sm:$0xff]  }
 0x252   :  { %5430 = vmatprep.subr.bf16.mxu1 %v7712_v28  ;;  %v7773_v25 = vld [vmem:[%s10370_s3 + $0x1270] ss:$20 sps:$4 sm:$0xff]   ;;  %v7776_v28 = vld [vmem:[%s10370_s3 + $0x1278] ss:$20 sps:$4 sm:$0xff]  }
 0x254   :  { %5087 = vmatpush1.bf16.msra.mxu0 %v7707_v29  ;;  %v7781_v29 = vld [vmem:[%s10370_s3 + $0x129c] ss:$20 sps:$4 sm:$0xff]  }
 0x255   :  { %5431 = vmatpush1.bf16.msra.mxu1 %v7710_v30  ;;  %5088 = vmatprep.subr.bf16.mxu0 %v7715_v32  ;;  %v7784_v30 = vld [vmem:[%s10370_s3 + $0x12a4] ss:$20 sps:$4 sm:$0xff]  }
 0x256   :  { %5432 = vmatprep.subr.bf16.mxu1 %v7718_v33  ;;  %v7779_v32 = vld [vmem:[%s10370_s3 + $0x1298] ss:$20 sps:$4 sm:$0xff]   ;;  %v7782_v33 = vld [vmem:[%s10370_s3 + $0x12a0] ss:$20 sps:$4 sm:$0xff]  }
 0x258   :  { %5089 = vmatpush1.bf16.msra.mxu0 %v7713_v34  ;;  %v7787_v34 = vld [vmem:[%s10370_s3 + $0x12c4] ss:$20 sps:$4 sm:$0xff]  }
 0x259   :  { %5433 = vmatpush1.bf16.msra.mxu1 %v7716_v26  ;;  %5090 = vmatprep.subr.bf16.mxu0 %v7721_v24  ;;  %v7790_v26 = vld [vmem:[%s10370_s3 + $0x12cc] ss:$20 sps:$4 sm:$0xff]  }
 0x25a   :  { %5434 = vmatprep.subr.bf16.mxu1 %v7724_v27  ;;  %v7785_v24 = vld [vmem:[%s10370_s3 + $0x12c0] ss:$20 sps:$4 sm:$0xff]   ;;  %v7788_v27 = vld [vmem:[%s10370_s3 + $0x12c8] ss:$20 sps:$4 sm:$0xff]  }
 0x25c   :  { %5091 = vmatpush1.bf16.msra.mxu0 %v7719_v39  ;;  %v7793_v39 = vld [vmem:[%s10370_s3 + $0x12ec] ss:$20 sps:$4 sm:$0xff]  }
 0x25d   :  { %5435 = vmatpush1.bf16.msra.mxu1 %v7722_v40  ;;  %5092 = vmatprep.subr.bf16.mxu0 %v7727_v42  ;;  %v7796_v40 = vld [vmem:[%s10370_s3 + $0x12f4] ss:$20 sps:$4 sm:$0xff]  }
 0x25e   :  { %5436 = vmatprep.subr.bf16.mxu1 %v7730_v43  ;;  %v7791_v42 = vld [vmem:[%s10370_s3 + $0x12e8] ss:$20 sps:$4 sm:$0xff]   ;;  %v7794_v43 = vld [vmem:[%s10370_s3 + $0x12f0] ss:$20 sps:$4 sm:$0xff]  }
 0x260   :  { %5093 = vmatpush1.bf16.msra.mxu0 %v7725_v44  ;;  %v7799_v44 = vld [vmem:[%s10370_s3 + $0x1314] ss:$20 sps:$4 sm:$0xff]  }
 0x261   :  { %5437 = vmatpush1.bf16.msra.mxu1 %v7728_v45  ;;  %5094 = vmatprep.subr.bf16.mxu0 %v7733_v46  ;;  %v7802_v45 = vld [vmem:[%s10370_s3 + $0x131c] ss:$20 sps:$4 sm:$0xff]  }
 0x262   :  { %5438 = vmatprep.subr.bf16.mxu1 %v7736_v47  ;;  %v7797_v46 = vld [vmem:[%s10370_s3 + $0x1310] ss:$20 sps:$4 sm:$0xff]   ;;  %v7800_v47 = vld [vmem:[%s10370_s3 + $0x1318] ss:$20 sps:$4 sm:$0xff]  }
 0x264   :  { %5095 = vmatpush1.bf16.msra.mxu0 %v7731_v49  ;;  %v7805_v49 = vld [vmem:[%s10370_s3 + $0x133c] ss:$20 sps:$4 sm:$0xff]  }
 0x265   :  { %5439 = vmatpush1.bf16.msra.mxu1 %v7734_v50  ;;  %5107 = vmatprep.subr.bf16.mxu0 %v7739_v48  ;;  %v7808_v50 = vld [vmem:[%s10370_s3 + $0x1344] ss:$20 sps:$4 sm:$0xff]  }
 0x266   :  { %5451 = vmatprep.subr.bf16.mxu1 %v7742_v51  ;;  %v7803_v48 = vld [vmem:[%s10370_s3 + $0x1338] ss:$20 sps:$4 sm:$0xff]   ;;  %v7806_v51 = vld [vmem:[%s10370_s3 + $0x1340] ss:$20 sps:$4 sm:$0xff]  }
 0x267   :  { %6733 = vmatmul.mubr.msk.bf16.vlgmr.msra.gmra.mrb[20].mxu0 %vm8588_vm1, %v7981_v41 }
 0x268   :  { %6764 = vmatmul.mubr.msk.bf16.vlgmr.msra.gmra.mrb[12].mxu1 %vm8588_vm1, %v7981_v41  ;;  %5108 = vmatpush1.bf16.msra.mxu0 %v7737_v52  ;;  %v7811_v52 = vld [vmem:[%s10370_s3 + $0x1364] ss:$20 sps:$4 sm:$0xff]  }
 0x269   :  { %6734 = vmatprep.mubr.msk.bf16.mxu0 %vm4802_vm8, %v8572_v3  ;;  %5452 = vmatpush1.bf16.msra.mxu1 %v7740_v23  ;;  %v7814_v23 = vld [vmem:[%s10370_s3 + $0x136c] ss:$20 sps:$4 sm:$0xff]  }
 0x26a   :  { %6765 = vmatprep.mubr.msk.bf16.mxu1 %vm4802_vm8, %v8572_v3  ;;  %5109 = vmatprep.subr.bf16.mxu0 %v7745_v54  ;;  %v7809_v54 = vld [vmem:[%s10370_s3 + $0x1360] ss:$20 sps:$4 sm:$0xff]  }
 0x26b   :  { %5453 = vmatprep.subr.bf16.mxu1 %v7748_v55  ;;  %v7812_v55 = vld [vmem:[%s10370_s3 + $0x1368] ss:$20 sps:$4 sm:$0xff]  }
 0x26c   :  { %5110 = vmatpush1.bf16.msra.mxu0 %v7743_v57  ;;  %v7817_v57 = vld [vmem:[%s10370_s3 + $0x138c] ss:$20 sps:$4 sm:$0xff]  }
 0x26d   :  { %5454 = vmatpush1.bf16.msra.mxu1 %v7746_v58  ;;  %5111 = vmatprep.subr.bf16.mxu0 %v7751_v59  ;;  %v7820_v58 = vld [vmem:[%s10370_s3 + $0x1394] ss:$20 sps:$4 sm:$0xff]  }
 0x26e   :  { %5455 = vmatprep.subr.bf16.mxu1 %v7754_v62  ;;  %v7815_v59 = vld [vmem:[%s10370_s3 + $0x1388] ss:$20 sps:$4 sm:$0xff]   ;;  %v7818_v62 = vld [vmem:[%s10370_s3 + $0x1390] ss:$20 sps:$4 sm:$0xff]  }
 0x270   :  { %5112 = vmatpush1.bf16.msra.mxu0 %v7749_v63  ;;  %v7821_v63 = vld [vmem:[%s10370_s3 + $0x150] ss:$20 sps:$4 sm:$0xff]  }
 0x271   :  { %5456 = vmatpush1.bf16.msra.mxu1 %v7752_v0  ;;  %5113 = vmatprep.subr.bf16.mxu0 %v7757_v2  ;;  %v7822_v0 = vld [vmem:[%s10370_s3 + $0x3d0] ss:$20 sps:$4 sm:$0xff]  }
 0x272   :  { %5457 = vmatprep.subr.bf16.mxu1 %v7760_v4  ;;  %v7823_v2 = vld [vmem:[%s10370_s3 + $0x10] ss:$20 sps:$4 sm:$0xff]  }
 0x273   :  { %v7824_v4 = vld [vmem:[%s10370_s3 + $0x290] ss:$20 sps:$4 sm:$0xff]  }
 0x274   :  { %5114 = vmatpush1.bf16.msra.mxu0 %v7755_v6  ;;  %v7825_v6 = vld [vmem:[%s10370_s3 + $0x178] ss:$20 sps:$4 sm:$0xff]  }
 0x275   :  { %5458 = vmatpush1.bf16.msra.mxu1 %v7758_v8  ;;  %5115 = vmatprep.subr.bf16.mxu0 %v7763_v9  ;;  %v7826_v8 = vld [vmem:[%s10370_s3 + $0x3f8] ss:$20 sps:$4 sm:$0xff]  }
 0x276   :  { %5459 = vmatprep.subr.bf16.mxu1 %v7766_v10  ;;  %v7827_v9 = vld [vmem:[%s10370_s3 + $0x38] ss:$20 sps:$4 sm:$0xff]  }
 0x277   :  { %v7828_v10 = vld [vmem:[%s10370_s3 + $0x2b8] ss:$20 sps:$4 sm:$0xff]  }
 0x278   :  { %5116 = vmatpush1.bf16.msra.mxu0 %v7761_v11  ;;  %v7829_v11 = vld [vmem:[%s10370_s3 + $0x1a0] ss:$20 sps:$4 sm:$0xff]  }
 0x279   :  { %5460 = vmatpush1.bf16.msra.mxu1 %v7764_v12  ;;  %5117 = vmatprep.subr.bf16.mxu0 %v7769_v16  ;;  %v7830_v12 = vld [vmem:[%s10370_s3 + $0x420] ss:$20 sps:$4 sm:$0xff]  }
 0x27a   :  { %5461 = vmatprep.subr.bf16.mxu1 %v7772_v17  ;;  %v7832_v16 = vld [vmem:[%s10370_s3 + $0x2e0] ss:$20 sps:$4 sm:$0xff]   ;;  %v7834_v17 = vld [vmem:[%s10370_s3 + $0x448] ss:$20 sps:$4 sm:$0xff]  }
 0x27c   :  { %5118 = vmatpush1.bf16.msra.mxu0 %v7767_v19  ;;  %v7835_v19 = vld [vmem:[%s10370_s3 + $0x88] ss:$20 sps:$4 sm:$0xff]  }
 0x27d   :  { %5462 = vmatpush1.bf16.msra.mxu1 %v7770_v20  ;;  %5119 = vmatprep.subr.bf16.mxu0 %v7775_v21  ;;  %v7836_v20 = vld [vmem:[%s10370_s3 + $0x308] ss:$20 sps:$4 sm:$0xff]   ;;  %v7837_v21 = vld [vmem:[%s10370_s3 + $0x1f0] ss:$20 sps:$4 sm:$0xff]  }
 0x27e   :  { %5463 = vmatprep.subr.bf16.mxu1 %v7778_v22  ;;  %v7838_v22 = vld [vmem:[%s10370_s3 + $0x470] ss:$20 sps:$4 sm:$0xff]  }
 0x280   :  { %5120 = vmatpush1.bf16.msra.mxu0 %v7773_v25  ;;  %v7839_v25 = vld [vmem:[%s10370_s3 + $0xb0] ss:$20 sps:$4 sm:$0xff]  }
 0x281   :  { %5464 = vmatpush1.bf16.msra.mxu1 %v7776_v28  ;;  %5121 = vmatprep.subr.bf16.mxu0 %v7781_v29  ;;  %v7840_v28 = vld [vmem:[%s10370_s3 + $0x330] ss:$20 sps:$4 sm:$0xff]   ;;  %v7841_v29 = vld [vmem:[%s10370_s3 + $0x218] ss:$20 sps:$4 sm:$0xff]  }
 0x282   :  { %5465 = vmatprep.subr.bf16.mxu1 %v7784_v30  ;;  %v7842_v30 = vld [vmem:[%s10370_s3 + $0x498] ss:$20 sps:$4 sm:$0xff]  }
 0x284   :  { %5122 = vmatpush1.bf16.msra.mxu0 %v7779_v32  ;;  %v7843_v32 = vld [vmem:[%s10370_s3 + $0xd8] ss:$20 sps:$4 sm:$0xff]  }
 0x285   :  { %5466 = vmatpush1.bf16.msra.mxu1 %v7782_v33  ;;  %5123 = vmatprep.subr.bf16.mxu0 %v7787_v34  ;;  %v7844_v33 = vld [vmem:[%s10370_s3 + $0x358] ss:$20 sps:$4 sm:$0xff]   ;;  %v7845_v34 = vld [vmem:[%s10370_s3 + $0x240] ss:$20 sps:$4 sm:$0xff]  }
 0x286   :  { %5467 = vmatprep.subr.bf16.mxu1 %v7790_v26  ;;  %v7846_v26 = vld [vmem:[%s10370_s3 + $0x4c0] ss:$20 sps:$4 sm:$0xff]  }
 0x288   :  { %5124 = vmatpush1.bf16.msra.mxu0 %v7785_v24  ;;  %v7847_v24 = vld [vmem:[%s10370_s3 + $0x100] ss:$20 sps:$4 sm:$0xff]  }
 0x289   :  { %5468 = vmatpush1.bf16.msra.mxu1 %v7788_v27  ;;  %5125 = vmatprep.subr.bf16.mxu0 %v7793_v39  ;;  %v7848_v27 = vld [vmem:[%s10370_s3 + $0x380] ss:$20 sps:$4 sm:$0xff]   ;;  %v7849_v39 = vld [vmem:[%s10370_s3 + $0x268] ss:$20 sps:$4 sm:$0xff]  }
 0x28a   :  { %5469 = vmatprep.subr.bf16.mxu1 %v7796_v40  ;;  %v7850_v40 = vld [vmem:[%s10370_s3 + $0x4e8] ss:$20 sps:$4 sm:$0xff]  }
 0x28c   :  { %5126 = vmatpush1.bf16.msra.mxu0 %v7791_v42  ;;  %v7851_v42 = vld [vmem:[%s10370_s3 + $0x128] ss:$20 sps:$4 sm:$0xff]  }
 0x28d   :  { %5470 = vmatpush1.bf16.msra.mxu1 %v7794_v43  ;;  %5127 = vmatprep.subr.bf16.mxu0 %v7799_v44  ;;  %v7852_v43 = vld [vmem:[%s10370_s3 + $0x3a8] ss:$20 sps:$4 sm:$0xff]   ;;  %v7853_v44 = vld [vmem:[%s10370_s3 + $0x650] ss:$20 sps:$4 sm:$0xff]  }
 0x28e   :  { %5471 = vmatprep.subr.bf16.mxu1 %v7802_v45  ;;  %v7854_v45 = vld [vmem:[%s10370_s3 + $0x8d0] ss:$20 sps:$4 sm:$0xff]  }
 0x290   :  { %5128 = vmatpush1.bf16.msra.mxu0 %v7797_v46  ;;  %v7855_v46 = vld [vmem:[%s10370_s3 + $0x510] ss:$20 sps:$4 sm:$0xff]  }
 0x291   :  { %5472 = vmatpush1.bf16.msra.mxu1 %v7800_v47  ;;  %5129 = vmatprep.subr.bf16.mxu0 %v7805_v49  ;;  %v7856_v47 = vld [vmem:[%s10370_s3 + $0x790] ss:$20 sps:$4 sm:$0xff]   ;;  %v7857_v49 = vld [vmem:[%s10370_s3 + $0x678] ss:$20 sps:$4 sm:$0xff]  }
 0x292   :  { %5473 = vmatprep.subr.bf16.mxu1 %v7808_v50  ;;  %v7858_v50 = vld [vmem:[%s10370_s3 + $0x8f8] ss:$20 sps:$4 sm:$0xff]  }
 0x294   :  { %5130 = vmatpush1.bf16.msra.mxu0 %v7803_v48  ;;  %v7859_v48 = vld [vmem:[%s10370_s3 + $0x538] ss:$20 sps:$4 sm:$0xff]  }
 0x295   :  { %5474 = vmatpush1.bf16.msra.mxu1 %v7806_v51  ;;  %5131 = vmatprep.subr.bf16.mxu0 %v7811_v52  ;;  %v7861_v51 = vld [vmem:[%s10370_s3 + $0x6a0] ss:$20 sps:$4 sm:$0xff]  }
 0x296   :  { %5475 = vmatprep.subr.bf16.mxu1 %v7814_v23  ;;  %v7864_v52 = vld [vmem:[%s10370_s3 + $0x7e0] ss:$20 sps:$4 sm:$0xff]   ;;  %v7866_v23 = vld [vmem:[%s10370_s3 + $0x948] ss:$20 sps:$4 sm:$0xff]  }
 0x298   :  { %5132 = vmatpush1.bf16.msra.mxu0 %v7809_v54  ;;  %v7867_v54 = vld [vmem:[%s10370_s3 + $0x588] ss:$20 sps:$4 sm:$0xff]  }
 0x299   :  { %5476 = vmatpush1.bf16.msra.mxu1 %v7812_v55  ;;  %5133 = vmatprep.subr.bf16.mxu0 %v7817_v57  ;;  %v7868_v55 = vld [vmem:[%s10370_s3 + $0x808] ss:$20 sps:$4 sm:$0xff]   ;;  %v7869_v57 = vld [vmem:[%s10370_s3 + $0x6f0] ss:$20 sps:$4 sm:$0xff]  }
 0x29a   :  { %5477 = vmatprep.subr.bf16.mxu1 %v7820_v58  ;;  %v7870_v58 = vld [vmem:[%s10370_s3 + $0x970] ss:$20 sps:$4 sm:$0xff]  }
 0x29c   :  { %5134 = vmatpush1.bf16.msra.mxu0 %v7815_v59  ;;  %v7871_v59 = vld [vmem:[%s10370_s3 + $0x5b0] ss:$20 sps:$4 sm:$0xff]  }
 0x29d   :  { %5478 = vmatpush1.bf16.msra.mxu1 %v7818_v62  ;;  %6804 = vmatprep.subr.bf16.mxu0 %v7821_v63  ;;  %v7872_v62 = vld [vmem:[%s10370_s3 + $0x830] ss:$20 sps:$4 sm:$0xff]   ;;  %v7873_v63 = vld [vmem:[%s10370_s3 + $0x718] ss:$20 sps:$4 sm:$0xff]  }
 0x29e   :  { %6826 = vmatprep.subr.bf16.mxu1 %v7822_v0  ;;  %v7874_v0 = vld [vmem:[%s10370_s3 + $0x998] ss:$20 sps:$4 sm:$0xff]  }
 0x29f   :  { %6736 = vmatmul.mubr.msk.bf16.vlgmr.msra.gmra.mrb[20].mxu0 %vm8562_vm15, %v7981_v41 }
 0x2a0   :  { %6767 = vmatmul.mubr.msk.bf16.vlgmr.msra.gmra.mrb[12].mxu1 %vm8562_vm15, %v7981_v41  ;;  %6805 = vmatpush3.bf16.msra.mxu0 %v7823_v2  ;;  %v7875_v2 = vld [vmem:[%s10370_s3 + $0x5d8] ss:$20 sps:$4 sm:$0xff]  }
 0x2a1   :  { %6769 = vmatprep.mubr.msk.bf16.mxu0 %vm10409_vm10, %v7981_v41  ;;  %6827 = vmatpush3.bf16.msra.mxu1 %v7824_v4  ;;  %v7876_v4 = vld [vmem:[%s10370_s3 + $0x858] ss:$20 sps:$4 sm:$0xff]  }
 0x2a2   :  { %6773 = vmatprep.mubr.msk.bf16.mxu1 %vm10410_vm11, %v7981_v41  ;;  %6806 = vmatprep.subr.bf16.mxu0 %v7825_v6  ;;  %v7877_v6 = vld [vmem:[%s10370_s3 + $0x740] ss:$20 sps:$4 sm:$0xff]  }
 0x2a3   :  { %6828 = vmatprep.subr.bf16.mxu1 %v7826_v8  ;;  %v7878_v8 = vld [vmem:[%s10370_s3 + $0x9c0] ss:$20 sps:$4 sm:$0xff]  }
 0x2a4   :  { %6807 = vmatpush3.bf16.msra.mxu0 %v7827_v9  ;;  %v7879_v9 = vld [vmem:[%s10370_s3 + $0x600] ss:$20 sps:$4 sm:$0xff]  }
 0x2a5   :  { %6829 = vmatpush3.bf16.msra.mxu1 %v7828_v10  ;;  %6808 = vmatprep.subr.bf16.mxu0 %v7829_v11  ;;  %v7880_v10 = vld [vmem:[%s10370_s3 + $0x880] ss:$20 sps:$4 sm:$0xff]   ;;  %v7881_v11 = vld [vmem:[%s10370_s3 + $0x768] ss:$20 sps:$4 sm:$0xff]  }
 0x2a6   :  { %6830 = vmatprep.subr.bf16.mxu1 %v7830_v12  ;;  %v7882_v12 = vld [vmem:[%s10370_s3 + $0x9e8] ss:$20 sps:$4 sm:$0xff]  }
 0x2a8   :  { %6809 = vmatpush3.bf16.msra.mxu0 %v7831_v37  ;;  %v7883_v37 = vld [vmem:[%s10370_s3 + $0x628] ss:$20 sps:$4 sm:$0xff]  }
 0x2a9   :  { %6831 = vmatpush3.bf16.msra.mxu1 %v7832_v16  ;;  %6810 = vmatprep.subr.bf16.mxu0 %v7833_v1  ;;  %v7884_v16 = vld [vmem:[%s10370_s3 + $0x8a8] ss:$20 sps:$4 sm:$0xff]   ;;  %v7885_v1 = vld [vmem:[%s10370_s3 + $0xb50] ss:$20 sps:$4 sm:$0xff]  }
 0x2aa   :  { %6832 = vmatprep.subr.bf16.mxu1 %v7834_v17  ;;  %v7886_v17 = vld [vmem:[%s10370_s3 + $0xdd0] ss:$20 sps:$4 sm:$0xff]  }
 0x2ac   :  { %6811 = vmatpush3.bf16.msra.mxu0 %v7835_v19  ;;  %v7887_v19 = vld [vmem:[%s10370_s3 + $0xa10] ss:$20 sps:$4 sm:$0xff]  }
 0x2ad   :  { %6833 = vmatpush3.bf16.msra.mxu1 %v7836_v20  ;;  %6812 = vmatprep.subr.bf16.mxu0 %v7837_v21  ;;  %v7888_v20 = vld [vmem:[%s10370_s3 + $0xc90] ss:$20 sps:$4 sm:$0xff]   ;;  %v7889_v21 = vld [vmem:[%s10370_s3 + $0xb78] ss:$20 sps:$4 sm:$0xff]  }
 0x2ae   :  { %6834 = vmatprep.subr.bf16.mxu1 %v7838_v22  ;;  %v7890_v22 = vld [vmem:[%s10370_s3 + $0xdf8] ss:$20 sps:$4 sm:$0xff]  }
 0x2b0   :  { %6813 = vmatpush3.bf16.msra.mxu0 %v7839_v25  ;;  %v7891_v25 = vld [vmem:[%s10370_s3 + $0xa38] ss:$20 sps:$4 sm:$0xff]  }
 0x2b1   :  { %6835 = vmatpush3.bf16.msra.mxu1 %v7840_v28  ;;  %6814 = vmatprep.subr.bf16.mxu0 %v7841_v29  ;;  %v7893_v28 = vld [vmem:[%s10370_s3 + $0xba0] ss:$20 sps:$4 sm:$0xff]  }
 0x2b2   :  { %6836 = vmatprep.subr.bf16.mxu1 %v7842_v30  ;;  %v7896_v29 = vld [vmem:[%s10370_s3 + $0xce0] ss:$20 sps:$4 sm:$0xff]   ;;  %v7898_v30 = vld [vmem:[%s10370_s3 + $0xe48] ss:$20 sps:$4 sm:$0xff]  }
 0x2b4   :  { %6815 = vmatpush3.bf16.msra.mxu0 %v7843_v32  ;;  %v7899_v32 = vld [vmem:[%s10370_s3 + $0xa88] ss:$20 sps:$4 sm:$0xff]  }
 0x2b5   :  { %6837 = vmatpush3.bf16.msra.mxu1 %v7844_v33  ;;  %6816 = vmatprep.subr.bf16.mxu0 %v7845_v34  ;;  %v7900_v33 = vld [vmem:[%s10370_s3 + $0xd08] ss:$20 sps:$4 sm:$0xff]   ;;  %v7901_v34 = vld [vmem:[%s10370_s3 + $0xbf0] ss:$20 sps:$4 sm:$0xff]  }
 0x2b6   :  { %6838 = vmatprep.subr.bf16.mxu1 %v7846_v26  ;;  %v7902_v26 = vld [vmem:[%s10370_s3 + $0xe70] ss:$20 sps:$4 sm:$0xff]  }
 0x2b8   :  { %6817 = vmatpush3.bf16.msra.mxu0 %v7847_v24  ;;  %v7903_v24 = vld [vmem:[%s10370_s3 + $0xab0] ss:$20 sps:$4 sm:$0xff]  }
 0x2b9   :  { %6839 = vmatpush3.bf16.msra.mxu1 %v7848_v27  ;;  %6818 = vmatprep.subr.bf16.mxu0 %v7849_v39  ;;  %v7904_v27 = vld [vmem:[%s10370_s3 + $0xd30] ss:$20 sps:$4 sm:$0xff]   ;;  %v7905_v39 = vld [vmem:[%s10370_s3 + $0xc18] ss:$20 sps:$4 sm:$0xff]  }
 0x2ba   :  { %6840 = vmatprep.subr.bf16.mxu1 %v7850_v40  ;;  %v7906_v40 = vld [vmem:[%s10370_s3 + $0xe98] ss:$20 sps:$4 sm:$0xff]  }
 0x2bc   :  { %6819 = vmatpush3.bf16.msra.mxu0 %v7851_v42  ;;  %v7907_v42 = vld [vmem:[%s10370_s3 + $0xad8] ss:$20 sps:$4 sm:$0xff]  }
 0x2bd   :  { %6841 = vmatpush3.bf16.msra.mxu1 %v7852_v43  ;;  %6848 = vmatprep.subr.bf16.mxu0 %v7853_v44  ;;  %v7908_v43 = vld [vmem:[%s10370_s3 + $0xd58] ss:$20 sps:$4 sm:$0xff]   ;;  %v7909_v44 = vld [vmem:[%s10370_s3 + $0xc40] ss:$20 sps:$4 sm:$0xff]  }
 0x2be   :  { %6870 = vmatprep.subr.bf16.mxu1 %v7854_v45  ;;  %v7910_v45 = vld [vmem:[%s10370_s3 + $0xec0] ss:$20 sps:$4 sm:$0xff]  }
 0x2bf   :  { %6771 = vmatmul.mubr.msk.bf16.vlgmr.msra.gmra.mrb[24].mxu0 %vm10411_vm9, %v7981_v41 }
 0x2c0   :  { %6775 = vmatmul.mubr.msk.bf16.vlgmr.msra.gmra.mrb[16].mxu1 %vm8425_vm12, %v7981_v41  ;;  %6849 = vmatpush3.bf16.msra.mxu0 %v7855_v46  ;;  %v7911_v46 = vld [vmem:[%s10370_s3 + $0xb00] ss:$20 sps:$4 sm:$0xff]  }
 0x2c1   :  { %6777 = vmatprep.mubr.msk.bf16.mxu0 %vm8500_vm0, %v7981_v41  ;;  %6871 = vmatpush3.bf16.msra.mxu1 %v7856_v47  ;;  %v7912_v47 = vld [vmem:[%s10370_s3 + $0xd80] ss:$20 sps:$4 sm:$0xff]  }
 0x2c2   :  { %6781 = vmatprep.mubr.msk.bf16.mxu1 %vm8463_vm4, %v7981_v41  ;;  %6850 = vmatprep.subr.bf16.mxu0 %v7857_v49  ;;  %v7913_v49 = vld [vmem:[%s10370_s3 + $0xc68] ss:$20 sps:$4 sm:$0xff]  }
 0x2c3   :  { %6872 = vmatprep.subr.bf16.mxu1 %v7858_v50  ;;  %v7914_v50 = vld [vmem:[%s10370_s3 + $0xee8] ss:$20 sps:$4 sm:$0xff]  }
 0x2c4   :  { %6851 = vmatpush3.bf16.msra.mxu0 %v7859_v48  ;;  %v7915_v48 = vld [vmem:[%s10370_s3 + $0xb28] ss:$20 sps:$4 sm:$0xff]  }
 0x2c5   :  { %6873 = vmatpush3.bf16.msra.mxu1 %v7860_v36  ;;  %6852 = vmatprep.subr.bf16.mxu0 %v7861_v51  ;;  %v7916_v36 = vld [vmem:[%s10370_s3 + $0xda8] ss:$20 sps:$4 sm:$0xff]   ;;  %v7917_v51 = vld [vmem:[%s10370_s3 + $0x1050] ss:$20 sps:$4 sm:$0xff]  }
 0x2c6   :  { %6874 = vmatprep.subr.bf16.mxu1 %v7862_v60  ;;  %v7918_v60 = vld [vmem:[%s10370_s3 + $0xf10] ss:$20 sps:$4 sm:$0xff]  }
 0x2c8   :  { %6853 = vmatpush3.bf16.msra.mxu0 %v7863_v31  ;;  %v7919_v31 = vld [vmem:[%s10370_s3 + $0x1190] ss:$20 sps:$4 sm:$0xff]  }
 0x2c9   :  { %6875 = vmatpush3.bf16.msra.mxu1 %v7864_v52  ;;  %6854 = vmatprep.subr.bf16.mxu0 %v7865_v7  ;;  %v7920_v52 = vld [vmem:[%s10370_s3 + $0x1078] ss:$20 sps:$4 sm:$0xff]  }
 0x2ca   :  { %6876 = vmatprep.subr.bf16.mxu1 %v7866_v23  ;;  %v7921_v7 = vld [vmem:[%s10370_s3 + $0xf38] ss:$20 sps:$4 sm:$0xff]  }
 0x2cb   :  { %v7922_v23 = vld [vmem:[%s10370_s3 + $0x11b8] ss:$20 sps:$4 sm:$0xff]  }
 0x2cc   :  { %6855 = vmatpush3.bf16.msra.mxu0 %v7867_v54  ;;  %v7926_v54 = vld [vmem:[%s10370_s3 + $0x10c8] ss:$20 sps:$4 sm:$0xff]  }
 0x2cd   :  { %6877 = vmatpush3.bf16.msra.mxu1 %v7868_v55  ;;  %6856 = vmatprep.subr.bf16.mxu0 %v7869_v57  ;;  %v7928_v55 = vld [vmem:[%s10370_s3 + $0x1208] ss:$20 sps:$4 sm:$0xff]   ;;  %v7929_v57 = vld [vmem:[%s10370_s3 + $0x10f0] ss:$20 sps:$4 sm:$0xff]  }
 0x2ce   :  { %6878 = vmatprep.subr.bf16.mxu1 %v7870_v58  ;;  %v7930_v58 = vld [vmem:[%s10370_s3 + $0xfb0] ss:$20 sps:$4 sm:$0xff]  }
 0x2d0   :  { %6857 = vmatpush3.bf16.msra.mxu0 %v7871_v59  ;;  %v7931_v59 = vld [vmem:[%s10370_s3 + $0x1230] ss:$20 sps:$4 sm:$0xff]  }
 0x2d1   :  { %6879 = vmatpush3.bf16.msra.mxu1 %v7872_v62  ;;  %6858 = vmatprep.subr.bf16.mxu0 %v7873_v63  ;;  %v7932_v62 = vld [vmem:[%s10370_s3 + $0x1118] ss:$20 sps:$4 sm:$0xff]  }
 0x2d2   :  { %6880 = vmatprep.subr.bf16.mxu1 %v7874_v0  ;;  %v7933_v63 = vld [vmem:[%s10370_s3 + $0xfd8] ss:$20 sps:$4 sm:$0xff]  }
 0x2d3   :  { %v7934_v0 = vld [vmem:[%s10370_s3 + $0x1258] ss:$20 sps:$4 sm:$0xff]  }
 0x2d4   :  { %6859 = vmatpush3.bf16.msra.mxu0 %v7875_v2  ;;  %v7935_v2 = vld [vmem:[%s10370_s3 + $0x1140] ss:$20 sps:$4 sm:$0xff]  }
 0x2d5   :  { %6881 = vmatpush3.bf16.msra.mxu1 %v7876_v4  ;;  %6860 = vmatprep.subr.bf16.mxu0 %v7877_v6  ;;  %v7936_v4 = vld [vmem:[%s10370_s3 + $0x1000] ss:$20 sps:$4 sm:$0xff]  }
 0x2d6   :  { %6882 = vmatprep.subr.bf16.mxu1 %v7878_v8  ;;  %v7937_v6 = vld [vmem:[%s10370_s3 + $0x1280] ss:$20 sps:$4 sm:$0xff]   ;;  %v7938_v8 = vld [vmem:[%s10370_s3 + $0x1168] ss:$20 sps:$4 sm:$0xff]  }
 0x2d8   :  { %6861 = vmatpush3.bf16.msra.mxu0 %v7879_v9  ;;  %v7939_v9 = vld [vmem:[%s10370_s3 + $0x1028] ss:$20 sps:$4 sm:$0xff]  }
 0x2d9   :  { %6883 = vmatpush3.bf16.msra.mxu1 %v7880_v10  ;;  %6862 = vmatprep.subr.bf16.mxu0 %v7881_v11  ;;  %v7940_v10 = vld [vmem:[%s10370_s3 + $0x12a8] ss:$20 sps:$4 sm:$0xff]   ;;  %v7941_v11 = vld [vmem:[%s10370_s3 + $0x12d0] ss:$20 sps:$4 sm:$0xff]  }
 0x2da   :  { %6884 = vmatprep.subr.bf16.mxu1 %v7882_v12  ;;  %v7942_v12 = vld [vmem:[%s10370_s3 + $0x12f8] ss:$20 sps:$4 sm:$0xff]  }
 0x2dc   :  { %6863 = vmatpush3.bf16.msra.mxu0 %v7883_v37  ;;  %v7943_v37 = vld [vmem:[%s10370_s3 + $0x1320] ss:$20 sps:$4 sm:$0xff]  }
 0x2dd   :  { %6885 = vmatpush3.bf16.msra.mxu1 %v7884_v16  ;;  %6892 = vmatprep.subr.bf16.mxu0 %v7885_v1  ;;  %v7945_v16 = vld [vmem:[%s10370_s3 + $0x1370] ss:$20 sps:$4 sm:$0xff]   ;;  %v7946_v1 = vld [vmem:[%s10370_s3 + $0x1398] ss:$20 sps:$4 sm:$0xff]  }
 0x2de   :  { %6914 = vmatprep.subr.bf16.mxu1 %v7886_v17 }
 0x2df   :  { %6779 = vmatmul.mubr.msk.bf16.vlgmr.msra.gmra.mrb[28].mxu0 %vm8489_vm13, %v7981_v41 }
 0x2e0   :  { %6783 = vmatmul.mubr.msk.bf16.vlgmr.msra.gmra.mrb[20].mxu1 %vm8456_vm2, %v7981_v41  ;;  %6893 = vmatpush3.bf16.msra.mxu0 %v7887_v19 }
 0x2e1   :  { %6785 = vmatprep.mubr.msk.bf16.mxu0 %vm8557_vm6, %v7981_v41  ;;  %6915 = vmatpush3.bf16.msra.mxu1 %v7888_v20  ;;  %vm5860_vm6 = vcmask 261120  }
 0x2e2   :  { %6789 = vmatprep.mubr.msk.bf16.mxu1 %vm8518_vm7, %v7981_v41  ;;  %6894 = vmatprep.subr.bf16.mxu0 %v7889_v21 }
 0x2e3   :  { %6916 = vmatprep.subr.bf16.mxu1 %v7890_v22 }
 0x2e4   :  { %6895 = vmatpush3.bf16.msra.mxu0 %v7891_v25 }
 0x2e5   :  { %6917 = vmatpush3.bf16.msra.mxu1 %v7892_v14  ;;  %6896 = vmatprep.subr.bf16.mxu0 %v7893_v28 }
 0x2e6   :  { %6918 = vmatprep.subr.bf16.mxu1 %v7894_v5 }
 0x2e8   :  { %6897 = vmatpush3.bf16.msra.mxu0 %v7895_v56 }
 0x2e9   :  { %6919 = vmatpush3.bf16.msra.mxu1 %v7896_v29  ;;  %6898 = vmatprep.subr.bf16.mxu0 %v7897_v38 }
 0x2ea   :  { %6920 = vmatprep.subr.bf16.mxu1 %v7898_v30 }
 0x2ec   :  { %6899 = vmatpush3.bf16.msra.mxu0 %v7899_v32 }
 0x2ed   :  { %6921 = vmatpush3.bf16.msra.mxu1 %v7900_v33  ;;  %6900 = vmatprep.subr.bf16.mxu0 %v7901_v34 }
 0x2ee   :  { %6922 = vmatprep.subr.bf16.mxu1 %v7902_v26 }
 0x2f0   :  { %6901 = vmatpush3.bf16.msra.mxu0 %v7903_v24 }
 0x2f1   :  { %6923 = vmatpush3.bf16.msra.mxu1 %v7904_v27  ;;  %6902 = vmatprep.subr.bf16.mxu0 %v7905_v39 }
 0x2f2   :  { %6924 = vmatprep.subr.bf16.mxu1 %v7906_v40 }
 0x2f4   :  { %6903 = vmatpush3.bf16.msra.mxu0 %v7907_v42 }
 0x2f5   :  { %6925 = vmatpush3.bf16.msra.mxu1 %v7908_v43  ;;  %6904 = vmatprep.subr.bf16.mxu0 %v7909_v44 }
 0x2f6   :  { %6926 = vmatprep.subr.bf16.mxu1 %v7910_v45 }
 0x2f8   :  { %6905 = vmatpush3.bf16.msra.mxu0 %v7911_v46 }
 0x2f9   :  { %6927 = vmatpush3.bf16.msra.mxu1 %v7912_v47  ;;  %6906 = vmatprep.subr.bf16.mxu0 %v7913_v49 }
 0x2fa   :  { %6928 = vmatprep.subr.bf16.mxu1 %v7914_v50 }
 0x2fc   :  { %6907 = vmatpush3.bf16.msra.mxu0 %v7915_v48 }
 0x2fd   :  { %6929 = vmatpush3.bf16.msra.mxu1 %v7916_v36  ;;  %6936 = vmatprep.subr.bf16.mxu0 %v7917_v51 }
 0x2fe   :  { %5781 = vmatprep.subr.bf16.mxu1 %v7980_v15 }
 0x2ff   :  { %6787 = vmatmul.mubr.msk.bf16.vlgmr.msra.gmra.mrb[32].mxu0 %vm8546_vm5, %v7981_v41 }
 0x300   :  { %6791 = vmatmul.mubr.msk.bf16.vlgmr.msra.gmra.mrb[24].mxu1 %vm8513_vm3, %v7981_v41  ;;  %6937 = vmatpush3.bf16.msra.mxu0 %v7918_v60 }
 0x301   :  { %6793 = vmatprep.mubr.msk.bf16.mxu0 %vm8598_vm14, %v7981_v41  ;;  %5782 = vmatpush1.bf16.msra.mxu1 %v7919_v31 }
 0x302   :  { %6796 = vmatprep.mubr.msk.bf16.mxu1 %vm4802_vm8, %v8572_v3  ;;  %6938 = vmatprep.subr.bf16.mxu0 %v7920_v52  ;;  %v7927_v3 = vld [vmem:[%s10370_s3 + $0xf88] ss:$20 sps:$4 sm:$0xff]   ;;  %s7983_s3 = smov 64  }
 0x303   :  { %5783 = vmatprep.subr.bf16.mxu1 %v7980_v15 }
 0x304   :  { %6939 = vmatpush3.bf16.msra.mxu0 %v7921_v7 }
 0x305   :  { %5784 = vmatpush1.bf16.msra.mxu1 %v7922_v23  ;;  %6940 = vmatprep.subr.bf16.mxu0 %v7923_v53 }
 0x306   :  { %5785 = vmatprep.subr.bf16.mxu1 %v7980_v15 }
 0x308   :  { %6941 = vmatpush3.bf16.msra.mxu0 %v7924_v35 }
 0x309   :  { %5786 = vmatpush1.bf16.msra.mxu1 %v7925_v18  ;;  %6942 = vmatprep.subr.bf16.mxu0 %v7926_v54 }
 0x30a   :  { %5787 = vmatprep.subr.bf16.mxu1 %v7980_v15 }
 0x30c   :  { %6943 = vmatpush3.bf16.msra.mxu0 %v7927_v3 }
 0x30d   :  { %5788 = vmatpush1.bf16.msra.mxu1 %v7928_v55  ;;  %6944 = vmatprep.subr.bf16.mxu0 %v7929_v57 }
 0x30e   :  { %5789 = vmatprep.subr.bf16.mxu1 %v7980_v15 }
 0x310   :  { %6945 = vmatpush3.bf16.msra.mxu0 %v7930_v58 }
 0x311   :  { %5790 = vmatpush1.bf16.msra.mxu1 %v7931_v59  ;;  %6946 = vmatprep.subr.bf16.mxu0 %v7932_v62 }
 0x312   :  { %5791 = vmatprep.subr.bf16.mxu1 %v7980_v15 }
 0x314   :  { %6947 = vmatpush3.bf16.msra.mxu0 %v7933_v63 }
 0x315   :  { %5792 = vmatpush1.bf16.msra.mxu1 %v7934_v0  ;;  %6948 = vmatprep.subr.bf16.mxu0 %v7935_v2 }
 0x316   :  { %5793 = vmatprep.subr.bf16.mxu1 %v7980_v15 }
 0x318   :  { %6949 = vmatpush3.bf16.msra.mxu0 %v7936_v4 }
 0x319   :  { %5794 = vmatpush1.bf16.msra.mxu1 %v7937_v6  ;;  %6950 = vmatprep.subr.bf16.mxu0 %v7938_v8 }
 0x31a   :  { %5795 = vmatprep.subr.bf16.mxu1 %v7980_v15 }
 0x31c   :  { %6951 = vmatpush3.bf16.msra.mxu0 %v7939_v9 }
 0x31d   :  { %5796 = vmatpush1.bf16.msra.mxu1 %v7940_v10 }
 0x31e   :  { %5797 = vmatprep.subr.bf16.mxu1 %v7980_v15 }
 0x31f   :  { %6795 = vmatmul.mubr.msk.bf16.vlgmr.msra.gmra.mrb[36].mxu0 %vm8588_vm1, %v7981_v41 }
 0x321   :  { %5798 = vmatpush1.bf16.msra.mxu1 %v7941_v11 }
 0x322   :  { %5799 = vmatprep.subr.bf16.mxu1 %v7980_v15 }
 0x325   :  { %5800 = vmatpush1.bf16.msra.mxu1 %v7942_v12 }
 0x326   :  { %5801 = vmatprep.subr.bf16.mxu1 %v7980_v15 }
 0x329   :  { %5802 = vmatpush1.bf16.msra.mxu1 %v7943_v37  ;;  %v5853_v37 = vld [vmem:[%s10371_s4] sm:$0xff] }
 0x32a   :  { %5803 = vmatprep.subr.bf16.mxu1 %v7980_v15 }
 0x32d   :  { %5804 = vmatpush1.bf16.msra.mxu1 %v7944_v13  ;;  %v5854_v13 = vld [vmem:[%s10371_s4 + $0x8] sm:$0xff] }
 0x32e   :  { %5805 = vmatprep.subr.bf16.mxu1 %v7980_v15 }
 0x331   :  { %5806 = vmatpush1.bf16.msra.mxu1 %v7945_v16  ;;  %v6975_v16 = vpack.c.bf16 %v5854_v13, %v5853_v37 }
 0x332   :  { %5807 = vmatprep.subr.bf16.mxu1 %v7980_v15 }
 0x333   :  { %6976 = vmatprep.subr.bf16.mxu0 %v6975_v16 }
 0x334   :  { %6978 = vmatpush3.bf16.msra.mxu0 %v6975_v16 }
 0x335   :  { %5808 = vmatpush1.bf16.msra.mxu1 %v7946_v1  ;;  %v5855_v1 = vld [vmem:[%s10371_s4 + $0x10] sm:$0xff] }
 0x338   :  { %6798 = vmatmul.mubr.msk.bf16.vlgmr.msra.gmra.mrb[28].mxu1 %vm8562_vm15, %v7981_v41 }
 0x372   :  { %v5141_v17 = vpop.f32.mrb[20].mxu0 }
 0x373   :  { %v5485_v19 = vpop.f32.mrb[12].mxu1  ;;  %v5143_v20 = vpop.f32.mrb[21].mxu0 }
 0x374   :  { %v5822_v21 = vmax.f32 %v5141_v17, %v5143_v20  ;;  %v5487_v22 = vpop.f32.mrb[13].mxu1  ;;  %v5145_v25 = vpop.f32.mrb[22].mxu0  ;;  %v5856_v17 = vld [vmem:[%s10371_s4 + $0x18] sm:$0xff]  ;;  %s7986_s4 = smov [#allocation2]  }
 0x375   :  { %v5489_v14 = vpop.f32.mrb[14].mxu1  ;;  %v5147_v28 = vpop.f32.mrb[23].mxu0 }
 0x376   :  { %v5824_v5 = vmax.f32 %v5822_v21, %v5485_v19  ;;  %v5823_v56 = vmax.f32 %v5145_v25, %v5147_v28  ;;  %v5491_v29 = vpop.f32.mrb[15].mxu1  ;;  %v6979_v19 = vpack.c.bf16 %v5856_v17, %v5855_v1 }
 0x378   :  { %v5826_v38 = vmax.f32 %v5824_v5, %v5487_v22  ;;  %v5825_v30 = vmax.f32 %v5823_v56, %v5489_v14  ;;  %6980 = vmatprep.subr.bf16.mxu0 %v6979_v19  ;;  %v6799_v22 = vld [vmem:[%s10372_s5] ss:$0 sm:$0xff]  ;;  %s5993_s5 = sshll.u32 %s7986_s4, 4  ;;  %s5994_s5 = int_to_ptr.vmem [resolvable:$true] %s5993_s5 }
 0x379   :  { %6982 = vmatpush3.bf16.msra.mxu0 %v6979_v19  ;;  %s7955_s10 = scalar_lea.vmem %s5994_s5, 256  ;;  %p7960_p1 = scmp.lt.s32.totalorder %s5994_s5, %s5994_s5 }
 0x37a   :  { %v10323_v32 = vmax.f32 %v5825_v30, %v5491_v29  ;;  %5828 = vrot.lane.b32.xlu0 %v5826_v38, %s7983_s3  ;;  %p7956_p0 = scmp.ne.s32.totalorder %s5994_s5, %s7955_s10  ;;  %p7961_p2 = scmp.lt.s32.totalorder %s7955_s10, %s7955_s10 }
 0x37c   :  { %p7962_p3 = por %p7961_p2, %p7960_p1 }
 0x37e   :  { %5830 = vrot.lane.b32.xlu0 %v10323_v32, %s7983_s3  ;;  %p7963_p4 = pnand %p7962_p3, %p7956_p0 }
 0x382   :  { %5857 = vrot.lane.b32.xlu0 %v6799_v22, %s7985_s9 }
 0x392   :  { %v6820_v15 = vpop.f32.mrb[24].mxu0 }
 0x393   :  { %v6842_v41 = vpop.f32.mrb[16].mxu1  ;;  %v6821_v61 = vpop.f32.mrb[25].mxu0 }
 0x394   :  { %v6822_v33 = vadd.f32 %v6821_v61, %v6820_v15  ;;  %v6843_v34 = vpop.f32.mrb[17].mxu1  ;;  %v6823_v26 = vpop.f32.mrb[26].mxu0 }
 0x395   :  { %v6844_v24 = vadd.f32 %v6843_v34, %v6842_v41  ;;  %v6845_v27 = vpop.f32.mrb[18].mxu1  ;;  %v6824_v39 = vpop.f32.mrb[27].mxu0 }
 0x396   :  { %v6825_v40 = vadd.f32 %v6824_v39, %v6823_v26  ;;  %v6846_v42 = vpop.f32.mrb[19].mxu1 }
 0x397   :  { %v5570_v43 = vadd.f32 %v6844_v24, %v6822_v33  ;;  %v6847_v44 = vadd.f32 %v6846_v42, %v6845_v27 }
 0x399   :  { %v5573_v45 = vadd.f32 %v6847_v44, %v6825_v40 }
 0x3b2   :  { %v6864_v46 = vpop.f32.mrb[28].mxu0 }
 0x3b3   :  { %v6886_v47 = vpop.f32.mrb[20].mxu1  ;;  %v6865_v49 = vpop.f32.mrb[29].mxu0 }
 0x3b4   :  { %v6866_v50 = vadd.f32 %v6865_v49, %v6864_v46  ;;  %v6887_v48 = vpop.f32.mrb[21].mxu1  ;;  %v6867_v36 = vpop.f32.mrb[30].mxu0 }
 0x3b5   :  { %v6888_v51 = vadd.f32 %v6887_v48, %v6886_v47  ;;  %v6889_v60 = vpop.f32.mrb[22].mxu1  ;;  %v6868_v31 = vpop.f32.mrb[31].mxu0 }
 0x3b6   :  { %v5611_v52 = vadd.f32 %v6866_v50, %v5570_v43  ;;  %v6869_v7 = vadd.f32 %v6868_v31, %v6867_v36  ;;  %v6890_v23 = vpop.f32.mrb[23].mxu1 }
 0x3b7   :  { %v6891_v53 = vadd.f32 %v6890_v23, %v6889_v60 }
 0x3b8   :  { %v5652_v35 = vadd.f32 %v6888_v51, %v5611_v52  ;;  %v5614_v18 = vadd.f32 %v6869_v7, %v5573_v45 }
 0x3ba   :  { %v5655_v54 = vadd.f32 %v6891_v53, %v5614_v18 }
 0x3d2   :  { %v6908_v3 = vpop.f32.mrb[32].mxu0 }
 0x3d3   :  { %v6930_v55 = vpop.f32.mrb[24].mxu1  ;;  %v6909_v57 = vpop.f32.mrb[33].mxu0 }
 0x3d4   :  { %v6910_v58 = vadd.f32 %v6909_v57, %v6908_v3  ;;  %v6931_v59 = vpop.f32.mrb[25].mxu1  ;;  %v6911_v62 = vpop.f32.mrb[34].mxu0 }
 0x3d5   :  { %v6932_v63 = vadd.f32 %v6931_v59, %v6930_v55  ;;  %v6933_v0 = vpop.f32.mrb[26].mxu1  ;;  %v6912_v2 = vpop.f32.mrb[35].mxu0 }
 0x3d6   :  { %v5693_v4 = vadd.f32 %v6910_v58, %v5652_v35  ;;  %v6913_v6 = vadd.f32 %v6912_v2, %v6911_v62  ;;  %v6934_v8 = vpop.f32.mrb[27].mxu1 }
 0x3d7   :  { %v6935_v9 = vadd.f32 %v6934_v8, %v6933_v0 }
 0x3d8   :  { %v5734_v10 = vadd.f32 %v6932_v63, %v5693_v4  ;;  %v5696_v11 = vadd.f32 %v6913_v6, %v5655_v54 }
 0x3da   :  { %v5737_v12 = vadd.f32 %v6935_v9, %v5696_v11 }
 0x3ec   :  { %v5829_v20 = vpop.permute.xlu0 %5828 }
 0x3ed   :  { %v5832_v21 = vmax.f32 %v5826_v38, %v5829_v20 }
 0x3ef   :  { %5834 = vrot.lane.b32.xlu1 %v5832_v21, %s7984_s8 }
 0x3f0   :  { %v5831_v25 = vpop.permute.xlu0 %5830 }
 0x3f1   :  { %v5833_v14 = vmax.f32 %v10323_v32, %v5831_v25 }
 0x3f2   :  { %v6952_v28 = vpop.f32.mrb[36].mxu0 }
 0x3f3   :  { %5836 = vrot.lane.b32.xlu1 %v5833_v14, %s7984_s8  ;;  %v6953_v5 = vpop.f32.mrb[37].mxu0 }
 0x3f4   :  { %v6954_v56 = vadd.f32 %v6953_v5, %v6952_v28  ;;  %v6955_v29 = vpop.f32.mrb[38].mxu0  ;;  %v5858_v50 = vpop.permute.xlu0 %5857 }
 0x3f5   :  { %v6956_v38 = vpop.f32.mrb[39].mxu0 }
 0x3f6   :  { %v6957_v30 = vadd.f32 %v6956_v38, %v6955_v29  ;;  %v5775_v15 = vadd.f32 %v6954_v56, %v5734_v10 }
 0x3f8   :  { %v5778_v41 = vadd.f32 %v6957_v30, %v5737_v12 }
 0x40b   :  { %v5815_v61 = vpop.f32.mrb[28].mxu1 }
 0x40c   :  { %v5816_v33 = vadd.f32 %v5815_v61, %v5775_v15  ;;  %v5817_v34 = vpop.f32.mrb[29].mxu1 }
 0x40d   :  { %v5818_v26 = vpop.f32.mrb[30].mxu1 }
 0x40e   :  { %v5819_v24 = vadd.f32 %v5818_v26, %v5778_v41  ;;  %v5820_v27 = vpop.f32.mrb[31].mxu1 }
 0x461   :  { %v5835_v39 = vpop.permute.xlu1 %5834 }
 0x462   :  { %v5838_v40 = vmax.f32 %v5832_v21, %v5835_v39 }
 0x464   :  { %v5840_v42 = vmax.f32 %v5838_v40, %v5816_v33 }
 0x465   :  { %v5837_v32 = vpop.permute.xlu1 %5836 }
 0x466   :  { %v5849_v43 = vadd.f32 %v6799_v22, %v5840_v42  ;;  %v5839_v44 = vmax.f32 %v5833_v14, %v5837_v32 }
 0x468   :  { %v5851_v45 = vmax.f32 %v5849_v43, 0.0  ;;  %v5841_v46 = vmax.f32 %v5839_v44, %v5819_v24 }
 0x46a   :  { %v5850_v47 = vadd.f32 %v6799_v22, %v5841_v46  ;;  %6972 = vmatprep.mubr.msk.f32.mxu0 %vm5860_vm6, %v5851_v45 }
 0x46c   :  { %v5852_v49 = vmax.f32 %v5850_v47, 0.0 }
 0x46e   :  { %6973 = vmatmul.mubr.msk.f32.vlgmr.msra.gmra.mrb[40].mxu0 %vm5860_vm6, %v5852_v49 }
 0x541   :  { %v6974_v48 = vpop.f32.mrb[40].mxu0 }
 0x542   :  { %v5939_v36 = vadd.f32 %v6974_v48, %v5858_v50  ;;  %v5933_v51 = vpop.f32.mrb[41].mxu0 }
 0x543   :  { %v5934_v60 = vadd.f32 %v5933_v51, %v5858_v50 }
 0x544   :  { %v5943_v31 = vmax.f32 %v5939_v36, 0.0  ;;  %v6803_v7 = vmul.f32 -1.442695, %v5939_v36 }
 0x545   :  { %v5942_v52 = vmax.f32 %v5934_v60, 0.0  ;;  %v6802_v23 = vmul.f32 -1.442695, %v5934_v60 }
 0x546   :  { %5960 = vrot.lane.b32.xlu0 %v5943_v31, %s7984_s8  ;;  %7947 = vpow2.f32 %v6803_v7 }
 0x547   :  { %5958 = vrot.lane.b32.xlu1 %v5942_v52, %s7984_s8  ;;  %7949 = vpow2.f32 %v6802_v23 }
 0x54a   :  { %5970 = vrot.lane.b32.xlu0 %v5852_v49, %s7984_s8 }
 0x54b   :  { %5968 = vrot.lane.b32.xlu1 %v5851_v45, %s7984_s8 }
 0x550   :  { %v7948_v53 = vpop.eup %7947 }
 0x551   :  { %v7950_v35 = vpop.eup %7949  ;;  %v5951_v18 = vadd.f32 1.0, %v7948_v53 }
 0x552   :  { %v5950_v54 = vadd.f32 1.0, %v7950_v35 }
 0x553   :  { %7951 = vrcp.f32 %v5951_v18 }
 0x554   :  { %7953 = vrcp.f32 %v5950_v54 }
 0x55d   :  { %v7952_v3 = vpop.eup %7951 }
 0x55e   :  { %v7954_v57 = vpop.eup %7953  ;;  %v5967_v59 = vsub.f32 1.0, %v7952_v3 }
 0x55f   :  { %v5966_v63 = vsub.f32 1.0, %v7954_v57 }
 0x5b8   :  { %v5961_v55 = vpop.permute.xlu0 %5960 }
 0x5b9   :  { %v5959_v58 = vpop.permute.xlu1 %5958  ;;  %v5965_v0 = vmul.f32 %v7952_v3, %v5961_v55 }
 0x5ba   :  { %v5964_v6 = vmul.f32 %v7954_v57, %v5959_v58 }
 0x5bc   :  { %v5971_v62 = vpop.permute.xlu0 %5970 }
 0x5bd   :  { %v5975_v2 = vmul.f32 %v5971_v62, %v5967_v59  ;;  %v5969_v4 = vpop.permute.xlu1 %5968 }
 0x5be   :  { %v5974_v8 = vmul.f32 %v5969_v4, %v5966_v63 }
 0x5bf   :  { %v5977_v9 = vadd.f32 %v5975_v2, %v5965_v0 }
 0x5c0   :  { %v5976_v10 = vadd.f32 %v5974_v8, %v5964_v6 }
 0x5c1   :  { %5982 = vrot.lane.b32.xlu0 %v5977_v9, %s7985_s9 }
 0x5c2   :  { %5980 = vrot.lane.b32.xlu1 %v5976_v10, %s7985_s9 }
 0x633   :  { %v5983_v11 = vpop.permute.xlu0 %5982 }
 0x634   :  { %5987 = vst.msk [vmem:[#allocation2 + $0x8] sm:$0xff] %vm5860_vm6, %v5983_v11  ;;  %v5981_v12 = vpop.permute.xlu1 %5980 }
 0x635   :  { %5986 = vst.msk [vmem:[#allocation2] sm:$0xff] %vm5860_vm6, %v5981_v12 }
 0x636   :  { %7966 = shalt.err (!%p7963_p4)
}
 0x637   :  { %s7967_s0 = scalar_lea.hbm %s10373_s6, 256 }
 0x638   :  { %p7968_p5 = scmp.ne.s32.totalorder %s10373_s6, %s7967_s0  ;;  %p7971_p6 = scmp.lt.u32.totalorder %s7967_s0, %s10373_s6 }
 0x63a   :  { %p7973_p7 = pnand %p7971_p6, %p7968_p5 }
 0x63c   :  { %7976 = shalt.err (!%p7973_p7)
}
 0x63d   :  { %s7987_s17 = smov 128   ;;  %s7988_s18 = smov 8  }
 0x63e   :  { %5999 = dma.vmem_to_hbm [thread:$0]  %s5994_s5, 256, %s10373_s6, [#allocation3], %s7987_s17, %s7987_s17, %s7988_s18  }
 0x63f   :  { %7977 = dma.done.wait [#allocation3], 256  }
 0x640   :  { %7978 = vsyncadd [#allocation3], 4294967040 }
 0x641   :  { %6003 = vsyncpa [#allocation3], 1 }

</bundles_post_ra>
